<compile_context>
chip_gen: v5e
topology: v5e:2x2
jax: 0.10.0
libtpu: 0.0.40
codegen_flags: <defaults>
</compile_context>

<pallas_src>
import functools

import jax
import jax.numpy as jnp
import numpy as np
from jax.experimental import pallas as pl
from jax.experimental.pallas import tpu as pltpu

NUM_BINS = 30

# Accumulator row layout (lane-dense (96, 128) block; lanes are "partial" slots)
ACC_ROWS = 96
CNT_OFF = 0    # rows [0, 30)  : per-bin element counts (lane partials)
LOSS_OFF = 32  # rows [32, 62) : per-bin sum of loss    (lane partials)
G2_OFF = 64    # rows [64, 94) : per-bin sum of g^2     (lane partials)


def _round_up(x, m):
    return (x + m - 1) // m * m


def _ghm_kernel(blocks_per_core, n_ref, pred_ref, true_ref, out_ref):
    # n_ref:    SMEM (1,) int32 -- true (unpadded) element count
    # pred/true: VMEM (TM, 128) f32 tiles
    # out_ref:  VMEM (96, 128) f32 accumulator, resident across the inner grid axis
    @pl.when(pl.program_id(1) == 0)
    def _init():
        out_ref[...] = jnp.zeros_like(out_ref)

    p = pred_ref[...]
    t = true_ref[...]
    tm = p.shape[0]

    # Mask the zero-padded tail: padded elements get bin index NUM_BINS (no match).
    base_row = (pl.program_id(0) * blocks_per_core + pl.program_id(1)) * tm
    row = jax.lax.broadcasted_iota(jnp.int32, p.shape, 0)
    lane = jax.lax.broadcasted_iota(jnp.int32, p.shape, 1)
    eidx = (base_row + row) * 128 + lane
    valid = eidx < n_ref[0]

    # Elementwise loss / gradient-norm, reusing a single exponential.
    e = jnp.exp(-jnp.abs(p))                       # exp(-|p|) in (0, 1]
    r = 1.0 / (1.0 + e)
    sig = jnp.where(p >= 0.0, r, e * r)            # sigmoid(p)
    # softplus(-|p|) = log(1 + e); small-e branch keeps log1p-level accuracy
    # without relying on a log1p lowering.
    log1pe = jnp.where(e > 1e-4, jnp.log(1.0 + e), e * (1.0 - 0.5 * e))
    loss = jnp.maximum(p, 0.0) - p * t + log1pe    # BCE with logits
    g = jnp.abs(sig - t)                           # gradient norm in [0, 1)
    g2 = g * g

    # ind = floor(clamp_max(g, 0.999) * num_bins) in 0..29 ; padded -> NUM_BINS.
    ind = (jnp.minimum(g, 0.999) * float(NUM_BINS)).astype(jnp.int32)
    ind = jnp.where(valid, ind, NUM_BINS)

    # Per-bin masked sublane reductions on the MXU: ones(8,TM) @ masked(TM,128)
    # -> every output row equals the column (sublane) sum; keep row 0.
    ones8 = jnp.ones((8, tm), jnp.float32)
    for b in range(NUM_BINS):
        mf = jnp.where(ind == b, 1.0, 0.0)                                   # (TM,128)
        cpart = jnp.dot(ones8, mf, preferred_element_type=jnp.float32)[0:1, :]
        lpart = jnp.dot(ones8, mf * loss, preferred_element_type=jnp.float32)[0:1, :]
        gpart = jnp.dot(ones8, mf * g2, preferred_element_type=jnp.float32)[0:1, :]
        out_ref[CNT_OFF + b:CNT_OFF + b + 1, :] += cpart
        out_ref[LOSS_OFF + b:LOSS_OFF + b + 1, :] += lpart
        out_ref[G2_OFF + b:G2_OFF + b + 1, :] += gpart


def _ghm_partials(pred2d, true2d, n, *, tm, blocks_per_core, num_cores):
    kernel = functools.partial(_ghm_kernel, blocks_per_core)
    n_arr = jnp.full((1,), n, dtype=jnp.int32)
    return pl.pallas_call(
        kernel,
        out_shape=jax.ShapeDtypeStruct((num_cores, ACC_ROWS, 128), jnp.float32),
        grid=(num_cores, blocks_per_core),
        in_specs=[
            pl.BlockSpec(memory_space=pltpu.MemorySpace.SMEM),                  # n
            pl.BlockSpec((tm, 128), lambda c, i: (c * blocks_per_core + i, 0)),  # pred
            pl.BlockSpec((tm, 128), lambda c, i: (c * blocks_per_core + i, 0)),  # true
        ],
        out_specs=pl.BlockSpec((None, ACC_ROWS, 128), lambda c, i: (c, 0, 0)),
        compiler_params=pltpu.CompilerParams(
            dimension_semantics=("parallel", "arbitrary"),
            vmem_limit_bytes=32 * 1024 * 1024,
        ),
    )(n_arr, pred2d, true2d)


@functools.partial(jax.jit, static_argnames=("block_rows",))
def _ghm_forward(pred, true, mom, ema, *, block_rows=1024):
    flat_p = pred.reshape(-1).astype(jnp.float32)
    flat_t = true.reshape(-1).astype(jnp.float32)
    n = flat_p.shape[0]

    rows = -(-n // 128)
    tm = min(block_rows, _round_up(max(rows, 1), 8))
    blocks = -(-rows // tm)
    num_cores = 2 if blocks >= 2 else 1          # expose both TCs on v7x
    blocks_per_core = -(-blocks // num_cores)
    padded_rows = num_cores * blocks_per_core * tm
    pad = padded_rows * 128 - n

    p2 = jnp.pad(flat_p, (0, pad)).reshape(padded_rows, 128)
    t2 = jnp.pad(flat_t, (0, pad)).reshape(padded_rows, 128)

    partials = _ghm_partials(p2, t2, n, tm=tm,
                             blocks_per_core=blocks_per_core, num_cores=num_cores)
    acc = jnp.sum(partials, axis=0)                                  # (96, 128)
    cnt = jnp.sum(acc[CNT_OFF:CNT_OFF + NUM_BINS], axis=1)           # (30,)
    lsum = jnp.sum(acc[LOSS_OFF:LOSS_OFF + NUM_BINS], axis=1)        # (30,)
    g2sum = jnp.sum(acc[G2_OFF:G2_OFF + NUM_BINS], axis=1)           # (30,)

    # EMA / density on 30 scalars only (mom == 0 on the very first call).
    ema_new = mom * ema + (1.0 - mom) * cnt
    density = float(NUM_BINS) * (ema_new + 1.0)

    reform = jnp.sum(lsum / density)                                 # sum(loss/denom)
    gnorm = jnp.sqrt(jnp.sum(g2sum / (density * density)))           # ||g/denom||_2
    loss_mean = jnp.sum(lsum) / n                                    # disabled path
    g_l2_over_n = jnp.sqrt(jnp.sum(g2sum)) / n                       # disabled path
    return ema_new, reform, gnorm, loss_mean, g_l2_over_n


class GradientHarmonization:
    """JAX/Pallas port of the PyTorch GradientHarmonization module (GHM-C)."""

    def __init__(self, disabled=False, momentum=0.9, number_of_bins=30,
                 block_rows=1024):
        assert number_of_bins == NUM_BINS, "kernel is specialized for 30 bins"
        assert block_rows % 8 == 0
        self.exponential_moving_average = None    # device array (30,) after 1st call
        self.momentum = momentum
        self.disabled = disabled
        self.block_rows = block_rows

    def __call__(self, pred, true):
        if self.exponential_moving_average is None:
            # EMA := freq  <=>  effective momentum 0 with a zero EMA.
            mom = jnp.float32(0.0)
            ema_in = jnp.zeros((NUM_BINS,), jnp.float32)
        else:
            mom = jnp.float32(self.momentum)
            ema_in = self.exponential_moving_average

        ema_new, reform, gnorm, loss_mean, g_l2_over_n = _ghm_forward(
            pred, true, mom, ema_in, block_rows=self.block_rows)
        self.exponential_moving_average = ema_new

        if self.disabled:
            # (loss.mean(), gradient_norm.norm(2) / len(gradient_norm))
            return loss_mean, g_l2_over_n
        # (reformulated.sum(), ||g / density[ind]||_2)
        # NOTE: returned as device scalars (no .item() host sync, per perf review).
        return reform, gnorm


def _reference_forward(ema, momentum, pred, true, num_bins=NUM_BINS):
    """Plain-JAX reference of the forward path (same loss/grad pairing)."""
    p = pred.reshape(-1).astype(jnp.float32)
    t = true.reshape(-1).astype(jnp.float32)
    e = jnp.exp(-jnp.abs(p))
    r = 1.0 / (1.0 + e)
    sig = jnp.where(p >= 0.0, r, e * r)
    loss = jnp.maximum(p, 0.0) - p * t + jnp.log1p(e)
    g = jnp.abs(sig - t)
    ind = (jnp.minimum(g, 0.999) * num_bins).astype(jnp.int32)
    freq = jnp.zeros((num_bins,), jnp.float32).at[ind].add(1.0)
    ema_new = freq if ema is None else momentum * ema + (1.0 - momentum) * freq
    density = num_bins * (ema_new + 1.0)
    denom = density[ind]
    reform = jnp.sum(loss / denom)
    gnorm = jnp.sqrt(jnp.sum((g / denom) ** 2))
    loss_mean = jnp.mean(loss)
    g_l2_over_n = jnp.sqrt(jnp.sum(g * g)) / p.shape[0]
    return reform, gnorm, ema_new, loss_mean, g_l2_over_n


if __name__ == "__main__":
    key = jax.random.PRNGKey(0)
    k1, k2, k3, k4 = jax.random.split(key, 4)
    pred = jax.random.normal(k1, (2, 4, 16, 16), jnp.float32)              # logits, NCHW
    true = (jax.random.uniform(k2, (2, 4, 16, 16)) > 0.5).astype(jnp.float32)

    # --- test 1: single-block path; EMA-init call then EMA-momentum call ---
    ghm = GradientHarmonization(disabled=False, momentum=0.9, number_of_bins=30)
    r1, gb1 = ghm(pred, true)
    r2, gb2 = ghm(pred * 0.5, true)
    jax.block_until_ready((r1, gb1, r2, gb2))

    ref1, refg1, ema1, _, _ = _reference_forward(None, 0.9, pred, true)
    ref2, refg2, ema2, _, _ = _reference_forward(ema1, 0.9, pred * 0.5, true)
    assert np.allclose(float(r1), float(ref1), rtol=1e-2), (float(r1), float(ref1))
    assert np.allclose(float(gb1), float(refg1), rtol=1e-2), (float(gb1), float(refg1))
    assert np.allclose(float(r2), float(ref2), rtol=1e-2), (float(r2), float(ref2))
    assert np.allclose(float(gb2), float(refg2), rtol=1e-2), (float(gb2), float(refg2))
    assert np.allclose(np.asarray(ghm.exponential_moving_average),
                       np.asarray(ema2), rtol=1e-2, atol=0.5)

    # --- test 2: tiled multi-block path (grid (2, 4): parallel + arbitrary axes) ---
    pred_b = jax.random.normal(k3, (2, 4, 32, 32), jnp.float32)
    true_b = (jax.random.uniform(k4, (2, 4, 32, 32)) > 0.5).astype(jnp.float32)
    ghm_t = GradientHarmonization(disabled=False, momentum=0.9, block_rows=8)
    rt, gt = ghm_t(pred_b, true_b)
    reft, refgt, _, _, _ = _reference_forward(None, 0.9, pred_b, true_b)
    assert np.allclose(float(rt), float(reft), rtol=1e-2), (float(rt), float(reft))
    assert np.allclose(float(gt), float(refgt), rtol=1e-2), (float(gt), float(refgt))

    # --- test 3: ragged element count (exercises padded-tail masking) ---
    pred_r = jax.random.normal(k1, (3, 5, 7, 9), jnp.float32)
    true_r = (jax.random.uniform(k2, (3, 5, 7, 9)) > 0.5).astype(jnp.float32)
    ghm_r = GradientHarmonization(disabled=False, momentum=0.9, block_rows=8)
    rr, gr = ghm_r(pred_r, true_r)
    refr, refgr, _, _, _ = _reference_forward(None, 0.9, pred_r, true_r)
    assert np.allclose(float(rr), float(refr), rtol=1e-2), (float(rr), float(refr))
    assert np.allclose(float(gr), float(refgr), rtol=1e-2), (float(gr), float(refgr))

    # --- disabled path ---
    ghm_d = GradientHarmonization(disabled=True, momentum=0.9)
    lm, gn = ghm_d(pred, true)
    _, _, _, ref_lm, ref_gn = _reference_forward(None, 0.9, pred, true)
    assert np.allclose(float(lm), float(ref_lm), rtol=1e-3), (float(lm), float(ref_lm))
    assert np.allclose(float(gn), float(ref_gn), rtol=1e-3), (float(gn), float(ref_gn))

    print("KERNEL_OK")
</pallas_src>

<mosaic_0001>
module attributes {stable_mosaic.version = 11 : i64} {
  func.func @_ghm_kernel(%arg0: i32, %arg1: i32, %arg2: memref<1xi32, #tpu.memory_space<smem>>, %arg3: memref<16x128xf32, #tpu.memory_space<vmem>>, %arg4: memref<16x128xf32, #tpu.memory_space<vmem>>, %arg5: memref<1x96x128xf32, #tpu.memory_space<vmem>>) attributes {dimension_semantics = [#tpu.dimension_semantics<parallel>, #tpu.dimension_semantics<arbitrary>], iteration_bounds = array<i64: 1, 1>, scalar_prefetch = 0 : i64, scratch_operands = 0 : i64, tpu.core_type = #tpu.core_type<tc>, window_params = [{transform_indices = @transform_0, window_bounds = array<i64: 1>}, {transform_indices = @transform_1, window_bounds = array<i64: 16, 128>}, {transform_indices = @transform_2, window_bounds = array<i64: 16, 128>}, {transform_indices = @transform_3, window_bounds = array<i64: 1, 96, 128>}]} {
    %c0_i32 = arith.constant 0 : i32
    %0 = arith.cmpi eq, %arg1, %c0_i32 : i32
    %1 = arith.extui %0 : i1 to i32
    %c0_i32_0 = arith.constant 0 : i32
    %2 = arith.cmpi ne, %1, %c0_i32_0 : i32
    scf.if %2 {
      %cst_620 = arith.constant 0.000000e+00 : f32
      %987 = vector.broadcast %cst_620 : f32 to vector<96x128xf32>
      %c0_621 = arith.constant 0 : index
      %c0_622 = arith.constant 0 : index
      %c0_623 = arith.constant 0 : index
      %988 = vector.load %arg5[%c0_621, %c0_622, %c0_623] : memref<1x96x128xf32, #tpu.memory_space<vmem>>, vector<1x96x128xf32>
      %989 = vector.shape_cast %988 : vector<1x96x128xf32> to vector<96x128xf32>
      %990 = vector.shape_cast %987 : vector<96x128xf32> to vector<1x96x128xf32>
      tpu.vector_store %arg5[%c0_621, %c0_622, %c0_623], %990 {strides = array<i32>} : memref<1x96x128xf32, #tpu.memory_space<vmem>>, vector<1x96x128xf32>,
    } else {
    }
    %c0 = arith.constant 0 : index
    %c0_1 = arith.constant 0 : index
    %3 = vector.load %arg3[%c0, %c0_1] : memref<16x128xf32, #tpu.memory_space<vmem>>, vector<16x128xf32>
    %c0_2 = arith.constant 0 : index
    %c0_3 = arith.constant 0 : index
    %4 = vector.load %arg4[%c0_2, %c0_3] : memref<16x128xf32, #tpu.memory_space<vmem>>, vector<16x128xf32>
    %c1_i32 = arith.constant 1 : i32
    %5 = arith.muli %arg0, %c1_i32 : i32
    %6 = arith.addi %5, %arg1 : i32
    %c16_i32 = arith.constant 16 : i32
    %7 = arith.muli %6, %c16_i32 : i32
    %8 = tpu.iota {dimensions = array<i32: 0>} : vector<16x128xi32>
    %9 = tpu.iota {dimensions = array<i32: 1>} : vector<16x128xi32>
    %10 = vector.broadcast %7 : i32 to vector<16x128xi32>
    %11 = arith.addi %10, %8 : vector<16x128xi32>
    %c128_i32 = arith.constant 128 : i32
    %12 = vector.broadcast %c128_i32 : i32 to vector<16x128xi32>
    %13 = arith.muli %11, %12 : vector<16x128xi32>
    %14 = arith.addi %13, %9 : vector<16x128xi32>
    %c0_4 = arith.constant 0 : index
    %15 = memref.load %arg2[%c0_4] : memref<1xi32, #tpu.memory_space<smem>>
    %16 = vector.broadcast %15 : i32 to vector<16x128xi32>
    %17 = arith.cmpi slt, %14, %16 : vector<16x128xi32>
    %18 = math.absf %3 : vector<16x128xf32>
    %cst = arith.constant 0.000000e+00 : f32
    %19 = vector.broadcast %cst : f32 to vector<16x128xf32>
    %20 = arith.subf %19, %18 : vector<16x128xf32>
    %21 = math.exp %20 : vector<16x128xf32>
    %cst_5 = arith.constant 1.000000e+00 : f32
    %22 = vector.broadcast %cst_5 : f32 to vector<16x128xf32>
    %23 = arith.addf %22, %21 : vector<16x128xf32>
    %cst_6 = arith.constant 1.000000e+00 : f32
    %24 = vector.broadcast %cst_6 : f32 to vector<16x128xf32>
    %25 = arith.divf %24, %23 : vector<16x128xf32>
    %cst_7 = arith.constant 0.000000e+00 : f32
    %26 = vector.broadcast %cst_7 : f32 to vector<16x128xf32>
    %27 = arith.cmpf oge, %3, %26 : vector<16x128xf32>
    %28 = arith.mulf %21, %25 : vector<16x128xf32>
    %29 = arith.select %27, %25, %28 : vector<16x128xi1>, vector<16x128xf32>
    %cst_8 = arith.constant 9.99999974E-5 : f32
    %30 = vector.broadcast %cst_8 : f32 to vector<16x128xf32>
    %31 = arith.cmpf ogt, %21, %30 : vector<16x128xf32>
    %cst_9 = arith.constant 1.000000e+00 : f32
    %32 = vector.broadcast %cst_9 : f32 to vector<16x128xf32>
    %33 = arith.addf %32, %21 : vector<16x128xf32>
    %34 = math.log %33 : vector<16x128xf32>
    %cst_10 = arith.constant 5.000000e-01 : f32
    %35 = vector.broadcast %cst_10 : f32 to vector<16x128xf32>
    %36 = arith.mulf %35, %21 : vector<16x128xf32>
    %cst_11 = arith.constant 1.000000e+00 : f32
    %37 = vector.broadcast %cst_11 : f32 to vector<16x128xf32>
    %38 = arith.subf %37, %36 : vector<16x128xf32>
    %39 = arith.mulf %21, %38 : vector<16x128xf32>
    %40 = arith.select %31, %34, %39 : vector<16x128xi1>, vector<16x128xf32>
    %cst_12 = arith.constant 0.000000e+00 : f32
    %41 = vector.broadcast %cst_12 : f32 to vector<16x128xf32>
    %42 = arith.maximumf %3, %41 : vector<16x128xf32>
    %43 = arith.mulf %3, %4 : vector<16x128xf32>
    %44 = arith.subf %42, %43 : vector<16x128xf32>
    %45 = arith.addf %44, %40 : vector<16x128xf32>
    %46 = arith.subf %29, %4 : vector<16x128xf32>
    %47 = math.absf %46 : vector<16x128xf32>
    %48 = arith.mulf %47, %47 : vector<16x128xf32>
    %cst_13 = arith.constant 9.990000e-01 : f32
    %49 = vector.broadcast %cst_13 : f32 to vector<16x128xf32>
    %50 = arith.minimumf %47, %49 : vector<16x128xf32>
    %cst_14 = arith.constant 3.000000e+01 : f32
    %51 = vector.broadcast %cst_14 : f32 to vector<16x128xf32>
    %52 = arith.mulf %50, %51 : vector<16x128xf32>
    %53 = arith.fptosi %52 : vector<16x128xf32> to vector<16x128xi32>
    %c30_i32 = arith.constant 30 : i32
    %54 = vector.broadcast %c30_i32 : i32 to vector<16x128xi32>
    %55 = arith.select %17, %53, %54 : vector<16x128xi1>, vector<16x128xi32>
    %cst_15 = arith.constant 1.000000e+00 : f32
    %56 = vector.broadcast %cst_15 : f32 to vector<8x16xf32>
    %c0_i32_16 = arith.constant 0 : i32
    %57 = vector.broadcast %c0_i32_16 : i32 to vector<16x128xi32>
    %58 = arith.cmpi eq, %55, %57 : vector<16x128xi32>
    %cst_17 = arith.constant 1.000000e+00 : f32
    %cst_18 = arith.constant 0.000000e+00 : f32
    %59 = vector.broadcast %cst_17 : f32 to vector<16x128xf32>
    %60 = vector.broadcast %cst_18 : f32 to vector<16x128xf32>
    %61 = arith.select %58, %59, %60 : vector<16x128xi1>, vector<16x128xf32>
    %cst_19 = arith.constant dense<0.000000e+00> : vector<8x128xf32>
    %62 = tpu.matmul %56, %61, %cst_19 {dimension_numbers = #tpu.dot_dimension_numbers<[1], [0], [0], [1], [0, 0, 1, 1], [], []>} : vector<8x16xf32>, vector<16x128xf32>, vector<8x128xf32> -> vector<8x128xf32>
    %63 = vector.extract_strided_slice %62 {offsets = [0, 0], sizes = [1, 128], strides = [1, 1]} : vector<8x128xf32> to vector<1x128xf32>
    %64 = arith.mulf %61, %45 : vector<16x128xf32>
    %cst_20 = arith.constant dense<0.000000e+00> : vector<8x128xf32>
    %65 = tpu.matmul %56, %64, %cst_20 {dimension_numbers = #tpu.dot_dimension_numbers<[1], [0], [0], [1], [0, 0, 1, 1], [], []>} : vector<8x16xf32>, vector<16x128xf32>, vector<8x128xf32> -> vector<8x128xf32>
    %66 = vector.extract_strided_slice %65 {offsets = [0, 0], sizes = [1, 128], strides = [1, 1]} : vector<8x128xf32> to vector<1x128xf32>
    %67 = arith.mulf %61, %48 : vector<16x128xf32>
    %cst_21 = arith.constant dense<0.000000e+00> : vector<8x128xf32>
    %68 = tpu.matmul %56, %67, %cst_21 {dimension_numbers = #tpu.dot_dimension_numbers<[1], [0], [0], [1], [0, 0, 1, 1], [], []>} : vector<8x16xf32>, vector<16x128xf32>, vector<8x128xf32> -> vector<8x128xf32>
    %69 = vector.extract_strided_slice %68 {offsets = [0, 0], sizes = [1, 128], strides = [1, 1]} : vector<8x128xf32> to vector<1x128xf32>
    %c0_22 = arith.constant 0 : index
    %c0_23 = arith.constant 0 : index
    %c0_24 = arith.constant 0 : index
    %70 = vector.load %arg5[%c0_22, %c0_23, %c0_24] : memref<1x96x128xf32, #tpu.memory_space<vmem>>, vector<1x1x128xf32>
    %71 = vector.shape_cast %70 : vector<1x1x128xf32> to vector<1x128xf32>
    %72 = arith.addf %71, %63 : vector<1x128xf32>
    %c0_25 = arith.constant 0 : index
    %c0_26 = arith.constant 0 : index
    %c0_27 = arith.constant 0 : index
    %73 = vector.load %arg5[%c0_25, %c0_26, %c0_27] : memref<1x96x128xf32, #tpu.memory_space<vmem>>, vector<1x1x128xf32>
    %74 = vector.shape_cast %73 : vector<1x1x128xf32> to vector<1x128xf32>
    %75 = vector.shape_cast %72 : vector<1x128xf32> to vector<1x1x128xf32>
    tpu.vector_store %arg5[%c0_25, %c0_26, %c0_27], %75 {strides = array<i32>} : memref<1x96x128xf32, #tpu.memory_space<vmem>>, vector<1x1x128xf32>,
    %c0_28 = arith.constant 0 : index
    %c32 = arith.constant 32 : index
    %c0_29 = arith.constant 0 : index
    %76 = vector.load %arg5[%c0_28, %c32, %c0_29] : memref<1x96x128xf32, #tpu.memory_space<vmem>>, vector<1x1x128xf32>
    %77 = vector.shape_cast %76 : vector<1x1x128xf32> to vector<1x128xf32>
    %78 = arith.addf %77, %66 : vector<1x128xf32>
    %c0_30 = arith.constant 0 : index
    %c32_31 = arith.constant 32 : index
    %c0_32 = arith.constant 0 : index
    %79 = vector.load %arg5[%c0_30, %c32_31, %c0_32] : memref<1x96x128xf32, #tpu.memory_space<vmem>>, vector<1x1x128xf32>
    %80 = vector.shape_cast %79 : vector<1x1x128xf32> to vector<1x128xf32>
    %81 = vector.shape_cast %78 : vector<1x128xf32> to vector<1x1x128xf32>
    tpu.vector_store %arg5[%c0_30, %c32_31, %c0_32], %81 {strides = array<i32>} : memref<1x96x128xf32, #tpu.memory_space<vmem>>, vector<1x1x128xf32>,
    %c0_33 = arith.constant 0 : index
    %c64 = arith.constant 64 : index
    %c0_34 = arith.constant 0 : index
    %82 = vector.load %arg5[%c0_33, %c64, %c0_34] : memref<1x96x128xf32, #tpu.memory_space<vmem>>, vector<1x1x128xf32>
    %83 = vector.shape_cast %82 : vector<1x1x128xf32> to vector<1x128xf32>
    %84 = arith.addf %83, %69 : vector<1x128xf32>
    %c0_35 = arith.constant 0 : index
    %c64_36 = arith.constant 64 : index
    %c0_37 = arith.constant 0 : index
    %85 = vector.load %arg5[%c0_35, %c64_36, %c0_37] : memref<1x96x128xf32, #tpu.memory_space<vmem>>, vector<1x1x128xf32>
    %86 = vector.shape_cast %85 : vector<1x1x128xf32> to vector<1x128xf32>
    %87 = vector.shape_cast %84 : vector<1x128xf32> to vector<1x1x128xf32>
    tpu.vector_store %arg5[%c0_35, %c64_36, %c0_37], %87 {strides = array<i32>} : memref<1x96x128xf32, #tpu.memory_space<vmem>>, vector<1x1x128xf32>,
    %c1_i32_38 = arith.constant 1 : i32
    %88 = vector.broadcast %c1_i32_38 : i32 to vector<16x128xi32>
    %89 = arith.cmpi eq, %55, %88 : vector<16x128xi32>
    %cst_39 = arith.constant 1.000000e+00 : f32
    %cst_40 = arith.constant 0.000000e+00 : f32
    %90 = vector.broadcast %cst_39 : f32 to vector<16x128xf32>
    %91 = vector.broadcast %cst_40 : f32 to vector<16x128xf32>
    %92 = arith.select %89, %90, %91 : vector<16x128xi1>, vector<16x128xf32>
    %cst_41 = arith.constant dense<0.000000e+00> : vector<8x128xf32>
    %93 = tpu.matmul %56, %92, %cst_41 {dimension_numbers = #tpu.dot_dimension_numbers<[1], [0], [0], [1], [0, 0, 1, 1], [], []>} : vector<8x16xf32>, vector<16x128xf32>, vector<8x128xf32> -> vector<8x128xf32>
    %94 = vector.extract_strided_slice %93 {offsets = [0, 0], sizes = [1, 128], strides = [1, 1]} : vector<8x128xf32> to vector<1x128xf32>
    %95 = arith.mulf %92, %45 : vector<16x128xf32>
    %cst_42 = arith.constant dense<0.000000e+00> : vector<8x128xf32>
    %96 = tpu.matmul %56, %95, %cst_42 {dimension_numbers = #tpu.dot_dimension_numbers<[1], [0], [0], [1], [0, 0, 1, 1], [], []>} : vector<8x16xf32>, vector<16x128xf32>, vector<8x128xf32> -> vector<8x128xf32>
    %97 = vector.extract_strided_slice %96 {offsets = [0, 0], sizes = [1, 128], strides = [1, 1]} : vector<8x128xf32> to vector<1x128xf32>
    %98 = arith.mulf %92, %48 : vector<16x128xf32>
    %cst_43 = arith.constant dense<0.000000e+00> : vector<8x128xf32>
    %99 = tpu.matmul %56, %98, %cst_43 {dimension_numbers = #tpu.dot_dimension_numbers<[1], [0], [0], [1], [0, 0, 1, 1], [], []>} : vector<8x16xf32>, vector<16x128xf32>, vector<8x128xf32> -> vector<8x128xf32>
    %100 = vector.extract_strided_slice %99 {offsets = [0, 0], sizes = [1, 128], strides = [1, 1]} : vector<8x128xf32> to vector<1x128xf32>
    %c0_44 = arith.constant 0 : index
    %c1 = arith.constant 1 : index
    %c0_45 = arith.constant 0 : index
    %101 = vector.load %arg5[%c0_44, %c1, %c0_45] : memref<1x96x128xf32, #tpu.memory_space<vmem>>, vector<1x1x128xf32>
    %102 = vector.shape_cast %101 : vector<1x1x128xf32> to vector<1x128xf32>
    %103 = arith.addf %102, %94 : vector<1x128xf32>
    %c0_46 = arith.constant 0 : index
    %c1_47 = arith.constant 1 : index
    %c0_48 = arith.constant 0 : index
    %104 = vector.load %arg5[%c0_46, %c1_47, %c0_48] : memref<1x96x128xf32, #tpu.memory_space<vmem>>, vector<1x1x128xf32>
    %105 = vector.shape_cast %104 : vector<1x1x128xf32> to vector<1x128xf32>
    %106 = vector.shape_cast %103 : vector<1x128xf32> to vector<1x1x128xf32>
    tpu.vector_store %arg5[%c0_46, %c1_47, %c0_48], %106 {strides = array<i32>} : memref<1x96x128xf32, #tpu.memory_space<vmem>>, vector<1x1x128xf32>,
    %c0_49 = arith.constant 0 : index
    %c33 = arith.constant 33 : index
    %c0_50 = arith.constant 0 : index
    %107 = vector.load %arg5[%c0_49, %c33, %c0_50] : memref<1x96x128xf32, #tpu.memory_space<vmem>>, vector<1x1x128xf32>
    %108 = vector.shape_cast %107 : vector<1x1x128xf32> to vector<1x128xf32>
    %109 = arith.addf %108, %97 : vector<1x128xf32>
    %c0_51 = arith.constant 0 : index
    %c33_52 = arith.constant 33 : index
    %c0_53 = arith.constant 0 : index
    %110 = vector.load %arg5[%c0_51, %c33_52, %c0_53] : memref<1x96x128xf32, #tpu.memory_space<vmem>>, vector<1x1x128xf32>
    %111 = vector.shape_cast %110 : vector<1x1x128xf32> to vector<1x128xf32>
    %112 = vector.shape_cast %109 : vector<1x128xf32> to vector<1x1x128xf32>
    tpu.vector_store %arg5[%c0_51, %c33_52, %c0_53], %112 {strides = array<i32>} : memref<1x96x128xf32, #tpu.memory_space<vmem>>, vector<1x1x128xf32>,
    %c0_54 = arith.constant 0 : index
    %c65 = arith.constant 65 : index
    %c0_55 = arith.constant 0 : index
    %113 = vector.load %arg5[%c0_54, %c65, %c0_55] : memref<1x96x128xf32, #tpu.memory_space<vmem>>, vector<1x1x128xf32>
    %114 = vector.shape_cast %113 : vector<1x1x128xf32> to vector<1x128xf32>
    %115 = arith.addf %114, %100 : vector<1x128xf32>
    %c0_56 = arith.constant 0 : index
    %c65_57 = arith.constant 65 : index
    %c0_58 = arith.constant 0 : index
    %116 = vector.load %arg5[%c0_56, %c65_57, %c0_58] : memref<1x96x128xf32, #tpu.memory_space<vmem>>, vector<1x1x128xf32>
    %117 = vector.shape_cast %116 : vector<1x1x128xf32> to vector<1x128xf32>
    %118 = vector.shape_cast %115 : vector<1x128xf32> to vector<1x1x128xf32>
    tpu.vector_store %arg5[%c0_56, %c65_57, %c0_58], %118 {strides = array<i32>} : memref<1x96x128xf32, #tpu.memory_space<vmem>>, vector<1x1x128xf32>,
    %c2_i32 = arith.constant 2 : i32
    %119 = vector.broadcast %c2_i32 : i32 to vector<16x128xi32>
    %120 = arith.cmpi eq, %55, %119 : vector<16x128xi32>
    %cst_59 = arith.constant 1.000000e+00 : f32
    %cst_60 = arith.constant 0.000000e+00 : f32
    %121 = vector.broadcast %cst_59 : f32 to vector<16x128xf32>
    %122 = vector.broadcast %cst_60 : f32 to vector<16x128xf32>
    %123 = arith.select %120, %121, %122 : vector<16x128xi1>, vector<16x128xf32>
    %cst_61 = arith.constant dense<0.000000e+00> : vector<8x128xf32>
    %124 = tpu.matmul %56, %123, %cst_61 {dimension_numbers = #tpu.dot_dimension_numbers<[1], [0], [0], [1], [0, 0, 1, 1], [], []>} : vector<8x16xf32>, vector<16x128xf32>, vector<8x128xf32> -> vector<8x128xf32>
    %125 = vector.extract_strided_slice %124 {offsets = [0, 0], sizes = [1, 128], strides = [1, 1]} : vector<8x128xf32> to vector<1x128xf32>
    %126 = arith.mulf %123, %45 : vector<16x128xf32>
    %cst_62 = arith.constant dense<0.000000e+00> : vector<8x128xf32>
    %127 = tpu.matmul %56, %126, %cst_62 {dimension_numbers = #tpu.dot_dimension_numbers<[1], [0], [0], [1], [0, 0, 1, 1], [], []>} : vector<8x16xf32>, vector<16x128xf32>, vector<8x128xf32> -> vector<8x128xf32>
    %128 = vector.extract_strided_slice %127 {offsets = [0, 0], sizes = [1, 128], strides = [1, 1]} : vector<8x128xf32> to vector<1x128xf32>
    %129 = arith.mulf %123, %48 : vector<16x128xf32>
    %cst_63 = arith.constant dense<0.000000e+00> : vector<8x128xf32>
    %130 = tpu.matmul %56, %129, %cst_63 {dimension_numbers = #tpu.dot_dimension_numbers<[1], [0], [0], [1], [0, 0, 1, 1], [], []>} : vector<8x16xf32>, vector<16x128xf32>, vector<8x128xf32> -> vector<8x128xf32>
    %131 = vector.extract_strided_slice %130 {offsets = [0, 0], sizes = [1, 128], strides = [1, 1]} : vector<8x128xf32> to vector<1x128xf32>
    %c0_64 = arith.constant 0 : index
    %c2 = arith.constant 2 : index
    %c0_65 = arith.constant 0 : index
    %132 = vector.load %arg5[%c0_64, %c2, %c0_65] : memref<1x96x128xf32, #tpu.memory_space<vmem>>, vector<1x1x128xf32>
    %133 = vector.shape_cast %132 : vector<1x1x128xf32> to vector<1x128xf32>
    %134 = arith.addf %133, %125 : vector<1x128xf32>
    %c0_66 = arith.constant 0 : index
    %c2_67 = arith.constant 2 : index
    %c0_68 = arith.constant 0 : index
    %135 = vector.load %arg5[%c0_66, %c2_67, %c0_68] : memref<1x96x128xf32, #tpu.memory_space<vmem>>, vector<1x1x128xf32>
    %136 = vector.shape_cast %135 : vector<1x1x128xf32> to vector<1x128xf32>
    %137 = vector.shape_cast %134 : vector<1x128xf32> to vector<1x1x128xf32>
    tpu.vector_store %arg5[%c0_66, %c2_67, %c0_68], %137 {strides = array<i32>} : memref<1x96x128xf32, #tpu.memory_space<vmem>>, vector<1x1x128xf32>,
    %c0_69 = arith.constant 0 : index
    %c34 = arith.constant 34 : index
    %c0_70 = arith.constant 0 : index
    %138 = vector.load %arg5[%c0_69, %c34, %c0_70] : memref<1x96x128xf32, #tpu.memory_space<vmem>>, vector<1x1x128xf32>
    %139 = vector.shape_cast %138 : vector<1x1x128xf32> to vector<1x128xf32>
    %140 = arith.addf %139, %128 : vector<1x128xf32>
    %c0_71 = arith.constant 0 : index
    %c34_72 = arith.constant 34 : index
    %c0_73 = arith.constant 0 : index
    %141 = vector.load %arg5[%c0_71, %c34_72, %c0_73] : memref<1x96x128xf32, #tpu.memory_space<vmem>>, vector<1x1x128xf32>
    %142 = vector.shape_cast %141 : vector<1x1x128xf32> to vector<1x128xf32>
    %143 = vector.shape_cast %140 : vector<1x128xf32> to vector<1x1x128xf32>
    tpu.vector_store %arg5[%c0_71, %c34_72, %c0_73], %143 {strides = array<i32>} : memref<1x96x128xf32, #tpu.memory_space<vmem>>, vector<1x1x128xf32>,
    %c0_74 = arith.constant 0 : index
    %c66 = arith.constant 66 : index
    %c0_75 = arith.constant 0 : index
    %144 = vector.load %arg5[%c0_74, %c66, %c0_75] : memref<1x96x128xf32, #tpu.memory_space<vmem>>, vector<1x1x128xf32>
    %145 = vector.shape_cast %144 : vector<1x1x128xf32> to vector<1x128xf32>
    %146 = arith.addf %145, %131 : vector<1x128xf32>
    %c0_76 = arith.constant 0 : index
    %c66_77 = arith.constant 66 : index
    %c0_78 = arith.constant 0 : index
    %147 = vector.load %arg5[%c0_76, %c66_77, %c0_78] : memref<1x96x128xf32, #tpu.memory_space<vmem>>, vector<1x1x128xf32>
    %148 = vector.shape_cast %147 : vector<1x1x128xf32> to vector<1x128xf32>
    %149 = vector.shape_cast %146 : vector<1x128xf32> to vector<1x1x128xf32>
    tpu.vector_store %arg5[%c0_76, %c66_77, %c0_78], %149 {strides = array<i32>} : memref<1x96x128xf32, #tpu.memory_space<vmem>>, vector<1x1x128xf32>,
    %c3_i32 = arith.constant 3 : i32
    %150 = vector.broadcast %c3_i32 : i32 to vector<16x128xi32>
    %151 = arith.cmpi eq, %55, %150 : vector<16x128xi32>
    %cst_79 = arith.constant 1.000000e+00 : f32
    %cst_80 = arith.constant 0.000000e+00 : f32
    %152 = vector.broadcast %cst_79 : f32 to vector<16x128xf32>
    %153 = vector.broadcast %cst_80 : f32 to vector<16x128xf32>
    %154 = arith.select %151, %152, %153 : vector<16x128xi1>, vector<16x128xf32>
    %cst_81 = arith.constant dense<0.000000e+00> : vector<8x128xf32>
    %155 = tpu.matmul %56, %154, %cst_81 {dimension_numbers = #tpu.dot_dimension_numbers<[1], [0], [0], [1], [0, 0, 1, 1], [], []>} : vector<8x16xf32>, vector<16x128xf32>, vector<8x128xf32> -> vector<8x128xf32>
    %156 = vector.extract_strided_slice %155 {offsets = [0, 0], sizes = [1, 128], strides = [1, 1]} : vector<8x128xf32> to vector<1x128xf32>
    %157 = arith.mulf %154, %45 : vector<16x128xf32>
    %cst_82 = arith.constant dense<0.000000e+00> : vector<8x128xf32>
    %158 = tpu.matmul %56, %157, %cst_82 {dimension_numbers = #tpu.dot_dimension_numbers<[1], [0], [0], [1], [0, 0, 1, 1], [], []>} : vector<8x16xf32>, vector<16x128xf32>, vector<8x128xf32> -> vector<8x128xf32>
    %159 = vector.extract_strided_slice %158 {offsets = [0, 0], sizes = [1, 128], strides = [1, 1]} : vector<8x128xf32> to vector<1x128xf32>
    %160 = arith.mulf %154, %48 : vector<16x128xf32>
    %cst_83 = arith.constant dense<0.000000e+00> : vector<8x128xf32>
    %161 = tpu.matmul %56, %160, %cst_83 {dimension_numbers = #tpu.dot_dimension_numbers<[1], [0], [0], [1], [0, 0, 1, 1], [], []>} : vector<8x16xf32>, vector<16x128xf32>, vector<8x128xf32> -> vector<8x128xf32>
    %162 = vector.extract_strided_slice %161 {offsets = [0, 0], sizes = [1, 128], strides = [1, 1]} : vector<8x128xf32> to vector<1x128xf32>
    %c0_84 = arith.constant 0 : index
    %c3 = arith.constant 3 : index
    %c0_85 = arith.constant 0 : index
    %163 = vector.load %arg5[%c0_84, %c3, %c0_85] : memref<1x96x128xf32, #tpu.memory_space<vmem>>, vector<1x1x128xf32>
    %164 = vector.shape_cast %163 : vector<1x1x128xf32> to vector<1x128xf32>
    %165 = arith.addf %164, %156 : vector<1x128xf32>
    %c0_86 = arith.constant 0 : index
    %c3_87 = arith.constant 3 : index
    %c0_88 = arith.constant 0 : index
    %166 = vector.load %arg5[%c0_86, %c3_87, %c0_88] : memref<1x96x128xf32, #tpu.memory_space<vmem>>, vector<1x1x128xf32>
    %167 = vector.shape_cast %166 : vector<1x1x128xf32> to vector<1x128xf32>
    %168 = vector.shape_cast %165 : vector<1x128xf32> to vector<1x1x128xf32>
    tpu.vector_store %arg5[%c0_86, %c3_87, %c0_88], %168 {strides = array<i32>} : memref<1x96x128xf32, #tpu.memory_space<vmem>>, vector<1x1x128xf32>,
    %c0_89 = arith.constant 0 : index
    %c35 = arith.constant 35 : index
    %c0_90 = arith.constant 0 : index
    %169 = vector.load %arg5[%c0_89, %c35, %c0_90] : memref<1x96x128xf32, #tpu.memory_space<vmem>>, vector<1x1x128xf32>
    %170 = vector.shape_cast %169 : vector<1x1x128xf32> to vector<1x128xf32>
    %171 = arith.addf %170, %159 : vector<1x128xf32>
    %c0_91 = arith.constant 0 : index
    %c35_92 = arith.constant 35 : index
    %c0_93 = arith.constant 0 : index
    %172 = vector.load %arg5[%c0_91, %c35_92, %c0_93] : memref<1x96x128xf32, #tpu.memory_space<vmem>>, vector<1x1x128xf32>
    %173 = vector.shape_cast %172 : vector<1x1x128xf32> to vector<1x128xf32>
    %174 = vector.shape_cast %171 : vector<1x128xf32> to vector<1x1x128xf32>
    tpu.vector_store %arg5[%c0_91, %c35_92, %c0_93], %174 {strides = array<i32>} : memref<1x96x128xf32, #tpu.memory_space<vmem>>, vector<1x1x128xf32>,
    %c0_94 = arith.constant 0 : index
    %c67 = arith.constant 67 : index
    %c0_95 = arith.constant 0 : index
    %175 = vector.load %arg5[%c0_94, %c67, %c0_95] : memref<1x96x128xf32, #tpu.memory_space<vmem>>, vector<1x1x128xf32>
    %176 = vector.shape_cast %175 : vector<1x1x128xf32> to vector<1x128xf32>
    %177 = arith.addf %176, %162 : vector<1x128xf32>
    %c0_96 = arith.constant 0 : index
    %c67_97 = arith.constant 67 : index
    %c0_98 = arith.constant 0 : index
    %178 = vector.load %arg5[%c0_96, %c67_97, %c0_98] : memref<1x96x128xf32, #tpu.memory_space<vmem>>, vector<1x1x128xf32>
    %179 = vector.shape_cast %178 : vector<1x1x128xf32> to vector<1x128xf32>
    %180 = vector.shape_cast %177 : vector<1x128xf32> to vector<1x1x128xf32>
    tpu.vector_store %arg5[%c0_96, %c67_97, %c0_98], %180 {strides = array<i32>} : memref<1x96x128xf32, #tpu.memory_space<vmem>>, vector<1x1x128xf32>,
    %c4_i32 = arith.constant 4 : i32
    %181 = vector.broadcast %c4_i32 : i32 to vector<16x128xi32>
    %182 = arith.cmpi eq, %55, %181 : vector<16x128xi32>
    %cst_99 = arith.constant 1.000000e+00 : f32
    %cst_100 = arith.constant 0.000000e+00 : f32
    %183 = vector.broadcast %cst_99 : f32 to vector<16x128xf32>
    %184 = vector.broadcast %cst_100 : f32 to vector<16x128xf32>
    %185 = arith.select %182, %183, %184 : vector<16x128xi1>, vector<16x128xf32>
    %cst_101 = arith.constant dense<0.000000e+00> : vector<8x128xf32>
    %186 = tpu.matmul %56, %185, %cst_101 {dimension_numbers = #tpu.dot_dimension_numbers<[1], [0], [0], [1], [0, 0, 1, 1], [], []>} : vector<8x16xf32>, vector<16x128xf32>, vector<8x128xf32> -> vector<8x128xf32>
    %187 = vector.extract_strided_slice %186 {offsets = [0, 0], sizes = [1, 128], strides = [1, 1]} : vector<8x128xf32> to vector<1x128xf32>
    %188 = arith.mulf %185, %45 : vector<16x128xf32>
    %cst_102 = arith.constant dense<0.000000e+00> : vector<8x128xf32>
    %189 = tpu.matmul %56, %188, %cst_102 {dimension_numbers = #tpu.dot_dimension_numbers<[1], [0], [0], [1], [0, 0, 1, 1], [], []>} : vector<8x16xf32>, vector<16x128xf32>, vector<8x128xf32> -> vector<8x128xf32>
    %190 = vector.extract_strided_slice %189 {offsets = [0, 0], sizes = [1, 128], strides = [1, 1]} : vector<8x128xf32> to vector<1x128xf32>
    %191 = arith.mulf %185, %48 : vector<16x128xf32>
    %cst_103 = arith.constant dense<0.000000e+00> : vector<8x128xf32>
    %192 = tpu.matmul %56, %191, %cst_103 {dimension_numbers = #tpu.dot_dimension_numbers<[1], [0], [0], [1], [0, 0, 1, 1], [], []>} : vector<8x16xf32>, vector<16x128xf32>, vector<8x128xf32> -> vector<8x128xf32>
    %193 = vector.extract_strided_slice %192 {offsets = [0, 0], sizes = [1, 128], strides = [1, 1]} : vector<8x128xf32> to vector<1x128xf32>
    %c0_104 = arith.constant 0 : index
    %c4 = arith.constant 4 : index
    %c0_105 = arith.constant 0 : index
    %194 = vector.load %arg5[%c0_104, %c4, %c0_105] : memref<1x96x128xf32, #tpu.memory_space<vmem>>, vector<1x1x128xf32>
    %195 = vector.shape_cast %194 : vector<1x1x128xf32> to vector<1x128xf32>
    %196 = arith.addf %195, %187 : vector<1x128xf32>
    %c0_106 = arith.constant 0 : index
    %c4_107 = arith.constant 4 : index
    %c0_108 = arith.constant 0 : index
    %197 = vector.load %arg5[%c0_106, %c4_107, %c0_108] : memref<1x96x128xf32, #tpu.memory_space<vmem>>, vector<1x1x128xf32>
    %198 = vector.shape_cast %197 : vector<1x1x128xf32> to vector<1x128xf32>
    %199 = vector.shape_cast %196 : vector<1x128xf32> to vector<1x1x128xf32>
    tpu.vector_store %arg5[%c0_106, %c4_107, %c0_108], %199 {strides = array<i32>} : memref<1x96x128xf32, #tpu.memory_space<vmem>>, vector<1x1x128xf32>,
    %c0_109 = arith.constant 0 : index
    %c36 = arith.constant 36 : index
    %c0_110 = arith.constant 0 : index
    %200 = vector.load %arg5[%c0_109, %c36, %c0_110] : memref<1x96x128xf32, #tpu.memory_space<vmem>>, vector<1x1x128xf32>
    %201 = vector.shape_cast %200 : vector<1x1x128xf32> to vector<1x128xf32>
    %202 = arith.addf %201, %190 : vector<1x128xf32>
    %c0_111 = arith.constant 0 : index
    %c36_112 = arith.constant 36 : index
    %c0_113 = arith.constant 0 : index
    %203 = vector.load %arg5[%c0_111, %c36_112, %c0_113] : memref<1x96x128xf32, #tpu.memory_space<vmem>>, vector<1x1x128xf32>
    %204 = vector.shape_cast %203 : vector<1x1x128xf32> to vector<1x128xf32>
    %205 = vector.shape_cast %202 : vector<1x128xf32> to vector<1x1x128xf32>
    tpu.vector_store %arg5[%c0_111, %c36_112, %c0_113], %205 {strides = array<i32>} : memref<1x96x128xf32, #tpu.memory_space<vmem>>, vector<1x1x128xf32>,
    %c0_114 = arith.constant 0 : index
    %c68 = arith.constant 68 : index
    %c0_115 = arith.constant 0 : index
    %206 = vector.load %arg5[%c0_114, %c68, %c0_115] : memref<1x96x128xf32, #tpu.memory_space<vmem>>, vector<1x1x128xf32>
    %207 = vector.shape_cast %206 : vector<1x1x128xf32> to vector<1x128xf32>
    %208 = arith.addf %207, %193 : vector<1x128xf32>
    %c0_116 = arith.constant 0 : index
    %c68_117 = arith.constant 68 : index
    %c0_118 = arith.constant 0 : index
    %209 = vector.load %arg5[%c0_116, %c68_117, %c0_118] : memref<1x96x128xf32, #tpu.memory_space<vmem>>, vector<1x1x128xf32>
    %210 = vector.shape_cast %209 : vector<1x1x128xf32> to vector<1x128xf32>
    %211 = vector.shape_cast %208 : vector<1x128xf32> to vector<1x1x128xf32>
    tpu.vector_store %arg5[%c0_116, %c68_117, %c0_118], %211 {strides = array<i32>} : memref<1x96x128xf32, #tpu.memory_space<vmem>>, vector<1x1x128xf32>,
    %c5_i32 = arith.constant 5 : i32
    %212 = vector.broadcast %c5_i32 : i32 to vector<16x128xi32>
    %213 = arith.cmpi eq, %55, %212 : vector<16x128xi32>
    %cst_119 = arith.constant 1.000000e+00 : f32
    %cst_120 = arith.constant 0.000000e+00 : f32
    %214 = vector.broadcast %cst_119 : f32 to vector<16x128xf32>
    %215 = vector.broadcast %cst_120 : f32 to vector<16x128xf32>
    %216 = arith.select %213, %214, %215 : vector<16x128xi1>, vector<16x128xf32>
    %cst_121 = arith.constant dense<0.000000e+00> : vector<8x128xf32>
    %217 = tpu.matmul %56, %216, %cst_121 {dimension_numbers = #tpu.dot_dimension_numbers<[1], [0], [0], [1], [0, 0, 1, 1], [], []>} : vector<8x16xf32>, vector<16x128xf32>, vector<8x128xf32> -> vector<8x128xf32>
    %218 = vector.extract_strided_slice %217 {offsets = [0, 0], sizes = [1, 128], strides = [1, 1]} : vector<8x128xf32> to vector<1x128xf32>
    %219 = arith.mulf %216, %45 : vector<16x128xf32>
    %cst_122 = arith.constant dense<0.000000e+00> : vector<8x128xf32>
    %220 = tpu.matmul %56, %219, %cst_122 {dimension_numbers = #tpu.dot_dimension_numbers<[1], [0], [0], [1], [0, 0, 1, 1], [], []>} : vector<8x16xf32>, vector<16x128xf32>, vector<8x128xf32> -> vector<8x128xf32>
    %221 = vector.extract_strided_slice %220 {offsets = [0, 0], sizes = [1, 128], strides = [1, 1]} : vector<8x128xf32> to vector<1x128xf32>
    %222 = arith.mulf %216, %48 : vector<16x128xf32>
    %cst_123 = arith.constant dense<0.000000e+00> : vector<8x128xf32>
    %223 = tpu.matmul %56, %222, %cst_123 {dimension_numbers = #tpu.dot_dimension_numbers<[1], [0], [0], [1], [0, 0, 1, 1], [], []>} : vector<8x16xf32>, vector<16x128xf32>, vector<8x128xf32> -> vector<8x128xf32>
    %224 = vector.extract_strided_slice %223 {offsets = [0, 0], sizes = [1, 128], strides = [1, 1]} : vector<8x128xf32> to vector<1x128xf32>
    %c0_124 = arith.constant 0 : index
    %c5 = arith.constant 5 : index
    %c0_125 = arith.constant 0 : index
    %225 = vector.load %arg5[%c0_124, %c5, %c0_125] : memref<1x96x128xf32, #tpu.memory_space<vmem>>, vector<1x1x128xf32>
    %226 = vector.shape_cast %225 : vector<1x1x128xf32> to vector<1x128xf32>
    %227 = arith.addf %226, %218 : vector<1x128xf32>
    %c0_126 = arith.constant 0 : index
    %c5_127 = arith.constant 5 : index
    %c0_128 = arith.constant 0 : index
    %228 = vector.load %arg5[%c0_126, %c5_127, %c0_128] : memref<1x96x128xf32, #tpu.memory_space<vmem>>, vector<1x1x128xf32>
    %229 = vector.shape_cast %228 : vector<1x1x128xf32> to vector<1x128xf32>
    %230 = vector.shape_cast %227 : vector<1x128xf32> to vector<1x1x128xf32>
    tpu.vector_store %arg5[%c0_126, %c5_127, %c0_128], %230 {strides = array<i32>} : memref<1x96x128xf32, #tpu.memory_space<vmem>>, vector<1x1x128xf32>,
    %c0_129 = arith.constant 0 : index
    %c37 = arith.constant 37 : index
    %c0_130 = arith.constant 0 : index
    %231 = vector.load %arg5[%c0_129, %c37, %c0_130] : memref<1x96x128xf32, #tpu.memory_space<vmem>>, vector<1x1x128xf32>
    %232 = vector.shape_cast %231 : vector<1x1x128xf32> to vector<1x128xf32>
    %233 = arith.addf %232, %221 : vector<1x128xf32>
    %c0_131 = arith.constant 0 : index
    %c37_132 = arith.constant 37 : index
    %c0_133 = arith.constant 0 : index
    %234 = vector.load %arg5[%c0_131, %c37_132, %c0_133] : memref<1x96x128xf32, #tpu.memory_space<vmem>>, vector<1x1x128xf32>
    %235 = vector.shape_cast %234 : vector<1x1x128xf32> to vector<1x128xf32>
    %236 = vector.shape_cast %233 : vector<1x128xf32> to vector<1x1x128xf32>
    tpu.vector_store %arg5[%c0_131, %c37_132, %c0_133], %236 {strides = array<i32>} : memref<1x96x128xf32, #tpu.memory_space<vmem>>, vector<1x1x128xf32>,
    %c0_134 = arith.constant 0 : index
    %c69 = arith.constant 69 : index
    %c0_135 = arith.constant 0 : index
    %237 = vector.load %arg5[%c0_134, %c69, %c0_135] : memref<1x96x128xf32, #tpu.memory_space<vmem>>, vector<1x1x128xf32>
    %238 = vector.shape_cast %237 : vector<1x1x128xf32> to vector<1x128xf32>
    %239 = arith.addf %238, %224 : vector<1x128xf32>
    %c0_136 = arith.constant 0 : index
    %c69_137 = arith.constant 69 : index
    %c0_138 = arith.constant 0 : index
    %240 = vector.load %arg5[%c0_136, %c69_137, %c0_138] : memref<1x96x128xf32, #tpu.memory_space<vmem>>, vector<1x1x128xf32>
    %241 = vector.shape_cast %240 : vector<1x1x128xf32> to vector<1x128xf32>
    %242 = vector.shape_cast %239 : vector<1x128xf32> to vector<1x1x128xf32>
    tpu.vector_store %arg5[%c0_136, %c69_137, %c0_138], %242 {strides = array<i32>} : memref<1x96x128xf32, #tpu.memory_space<vmem>>, vector<1x1x128xf32>,
    %c6_i32 = arith.constant 6 : i32
    %243 = vector.broadcast %c6_i32 : i32 to vector<16x128xi32>
    %244 = arith.cmpi eq, %55, %243 : vector<16x128xi32>
    %cst_139 = arith.constant 1.000000e+00 : f32
    %cst_140 = arith.constant 0.000000e+00 : f32
    %245 = vector.broadcast %cst_139 : f32 to vector<16x128xf32>
    %246 = vector.broadcast %cst_140 : f32 to vector<16x128xf32>
    %247 = arith.select %244, %245, %246 : vector<16x128xi1>, vector<16x128xf32>
    %cst_141 = arith.constant dense<0.000000e+00> : vector<8x128xf32>
    %248 = tpu.matmul %56, %247, %cst_141 {dimension_numbers = #tpu.dot_dimension_numbers<[1], [0], [0], [1], [0, 0, 1, 1], [], []>} : vector<8x16xf32>, vector<16x128xf32>, vector<8x128xf32> -> vector<8x128xf32>
    %249 = vector.extract_strided_slice %248 {offsets = [0, 0], sizes = [1, 128], strides = [1, 1]} : vector<8x128xf32> to vector<1x128xf32>
    %250 = arith.mulf %247, %45 : vector<16x128xf32>
    %cst_142 = arith.constant dense<0.000000e+00> : vector<8x128xf32>
    %251 = tpu.matmul %56, %250, %cst_142 {dimension_numbers = #tpu.dot_dimension_numbers<[1], [0], [0], [1], [0, 0, 1, 1], [], []>} : vector<8x16xf32>, vector<16x128xf32>, vector<8x128xf32> -> vector<8x128xf32>
    %252 = vector.extract_strided_slice %251 {offsets = [0, 0], sizes = [1, 128], strides = [1, 1]} : vector<8x128xf32> to vector<1x128xf32>
    %253 = arith.mulf %247, %48 : vector<16x128xf32>
    %cst_143 = arith.constant dense<0.000000e+00> : vector<8x128xf32>
    %254 = tpu.matmul %56, %253, %cst_143 {dimension_numbers = #tpu.dot_dimension_numbers<[1], [0], [0], [1], [0, 0, 1, 1], [], []>} : vector<8x16xf32>, vector<16x128xf32>, vector<8x128xf32> -> vector<8x128xf32>
    %255 = vector.extract_strided_slice %254 {offsets = [0, 0], sizes = [1, 128], strides = [1, 1]} : vector<8x128xf32> to vector<1x128xf32>
    %c0_144 = arith.constant 0 : index
    %c6 = arith.constant 6 : index
    %c0_145 = arith.constant 0 : index
    %256 = vector.load %arg5[%c0_144, %c6, %c0_145] : memref<1x96x128xf32, #tpu.memory_space<vmem>>, vector<1x1x128xf32>
    %257 = vector.shape_cast %256 : vector<1x1x128xf32> to vector<1x128xf32>
    %258 = arith.addf %257, %249 : vector<1x128xf32>
    %c0_146 = arith.constant 0 : index
    %c6_147 = arith.constant 6 : index
    %c0_148 = arith.constant 0 : index
    %259 = vector.load %arg5[%c0_146, %c6_147, %c0_148] : memref<1x96x128xf32, #tpu.memory_space<vmem>>, vector<1x1x128xf32>
    %260 = vector.shape_cast %259 : vector<1x1x128xf32> to vector<1x128xf32>
    %261 = vector.shape_cast %258 : vector<1x128xf32> to vector<1x1x128xf32>
    tpu.vector_store %arg5[%c0_146, %c6_147, %c0_148], %261 {strides = array<i32>} : memref<1x96x128xf32, #tpu.memory_space<vmem>>, vector<1x1x128xf32>,
    %c0_149 = arith.constant 0 : index
    %c38 = arith.constant 38 : index
    %c0_150 = arith.constant 0 : index
    %262 = vector.load %arg5[%c0_149, %c38, %c0_150] : memref<1x96x128xf32, #tpu.memory_space<vmem>>, vector<1x1x128xf32>
    %263 = vector.shape_cast %262 : vector<1x1x128xf32> to vector<1x128xf32>
    %264 = arith.addf %263, %252 : vector<1x128xf32>
    %c0_151 = arith.constant 0 : index
    %c38_152 = arith.constant 38 : index
    %c0_153 = arith.constant 0 : index
    %265 = vector.load %arg5[%c0_151, %c38_152, %c0_153] : memref<1x96x128xf32, #tpu.memory_space<vmem>>, vector<1x1x128xf32>
    %266 = vector.shape_cast %265 : vector<1x1x128xf32> to vector<1x128xf32>
    %267 = vector.shape_cast %264 : vector<1x128xf32> to vector<1x1x128xf32>
    tpu.vector_store %arg5[%c0_151, %c38_152, %c0_153], %267 {strides = array<i32>} : memref<1x96x128xf32, #tpu.memory_space<vmem>>, vector<1x1x128xf32>,
    %c0_154 = arith.constant 0 : index
    %c70 = arith.constant 70 : index
    %c0_155 = arith.constant 0 : index
    %268 = vector.load %arg5[%c0_154, %c70, %c0_155] : memref<1x96x128xf32, #tpu.memory_space<vmem>>, vector<1x1x128xf32>
    %269 = vector.shape_cast %268 : vector<1x1x128xf32> to vector<1x128xf32>
    %270 = arith.addf %269, %255 : vector<1x128xf32>
    %c0_156 = arith.constant 0 : index
    %c70_157 = arith.constant 70 : index
    %c0_158 = arith.constant 0 : index
    %271 = vector.load %arg5[%c0_156, %c70_157, %c0_158] : memref<1x96x128xf32, #tpu.memory_space<vmem>>, vector<1x1x128xf32>
    %272 = vector.shape_cast %271 : vector<1x1x128xf32> to vector<1x128xf32>
    %273 = vector.shape_cast %270 : vector<1x128xf32> to vector<1x1x128xf32>
    tpu.vector_store %arg5[%c0_156, %c70_157, %c0_158], %273 {strides = array<i32>} : memref<1x96x128xf32, #tpu.memory_space<vmem>>, vector<1x1x128xf32>,
    %c7_i32 = arith.constant 7 : i32
    %274 = vector.broadcast %c7_i32 : i32 to vector<16x128xi32>
    %275 = arith.cmpi eq, %55, %274 : vector<16x128xi32>
    %cst_159 = arith.constant 1.000000e+00 : f32
    %cst_160 = arith.constant 0.000000e+00 : f32
    %276 = vector.broadcast %cst_159 : f32 to vector<16x128xf32>
    %277 = vector.broadcast %cst_160 : f32 to vector<16x128xf32>
    %278 = arith.select %275, %276, %277 : vector<16x128xi1>, vector<16x128xf32>
    %cst_161 = arith.constant dense<0.000000e+00> : vector<8x128xf32>
    %279 = tpu.matmul %56, %278, %cst_161 {dimension_numbers = #tpu.dot_dimension_numbers<[1], [0], [0], [1], [0, 0, 1, 1], [], []>} : vector<8x16xf32>, vector<16x128xf32>, vector<8x128xf32> -> vector<8x128xf32>
    %280 = vector.extract_strided_slice %279 {offsets = [0, 0], sizes = [1, 128], strides = [1, 1]} : vector<8x128xf32> to vector<1x128xf32>
    %281 = arith.mulf %278, %45 : vector<16x128xf32>
    %cst_162 = arith.constant dense<0.000000e+00> : vector<8x128xf32>
    %282 = tpu.matmul %56, %281, %cst_162 {dimension_numbers = #tpu.dot_dimension_numbers<[1], [0], [0], [1], [0, 0, 1, 1], [], []>} : vector<8x16xf32>, vector<16x128xf32>, vector<8x128xf32> -> vector<8x128xf32>
    %283 = vector.extract_strided_slice %282 {offsets = [0, 0], sizes = [1, 128], strides = [1, 1]} : vector<8x128xf32> to vector<1x128xf32>
    %284 = arith.mulf %278, %48 : vector<16x128xf32>
    %cst_163 = arith.constant dense<0.000000e+00> : vector<8x128xf32>
    %285 = tpu.matmul %56, %284, %cst_163 {dimension_numbers = #tpu.dot_dimension_numbers<[1], [0], [0], [1], [0, 0, 1, 1], [], []>} : vector<8x16xf32>, vector<16x128xf32>, vector<8x128xf32> -> vector<8x128xf32>
    %286 = vector.extract_strided_slice %285 {offsets = [0, 0], sizes = [1, 128], strides = [1, 1]} : vector<8x128xf32> to vector<1x128xf32>
    %c0_164 = arith.constant 0 : index
    %c7 = arith.constant 7 : index
    %c0_165 = arith.constant 0 : index
    %287 = vector.load %arg5[%c0_164, %c7, %c0_165] : memref<1x96x128xf32, #tpu.memory_space<vmem>>, vector<1x1x128xf32>
    %288 = vector.shape_cast %287 : vector<1x1x128xf32> to vector<1x128xf32>
    %289 = arith.addf %288, %280 : vector<1x128xf32>
    %c0_166 = arith.constant 0 : index
    %c7_167 = arith.constant 7 : index
    %c0_168 = arith.constant 0 : index
    %290 = vector.load %arg5[%c0_166, %c7_167, %c0_168] : memref<1x96x128xf32, #tpu.memory_space<vmem>>, vector<1x1x128xf32>
    %291 = vector.shape_cast %290 : vector<1x1x128xf32> to vector<1x128xf32>
    %292 = vector.shape_cast %289 : vector<1x128xf32> to vector<1x1x128xf32>
    tpu.vector_store %arg5[%c0_166, %c7_167, %c0_168], %292 {strides = array<i32>} : memref<1x96x128xf32, #tpu.memory_space<vmem>>, vector<1x1x128xf32>,
    %c0_169 = arith.constant 0 : index
    %c39 = arith.constant 39 : index
    %c0_170 = arith.constant 0 : index
    %293 = vector.load %arg5[%c0_169, %c39, %c0_170] : memref<1x96x128xf32, #tpu.memory_space<vmem>>, vector<1x1x128xf32>
    %294 = vector.shape_cast %293 : vector<1x1x128xf32> to vector<1x128xf32>
    %295 = arith.addf %294, %283 : vector<1x128xf32>
    %c0_171 = arith.constant 0 : index
    %c39_172 = arith.constant 39 : index
    %c0_173 = arith.constant 0 : index
    %296 = vector.load %arg5[%c0_171, %c39_172, %c0_173] : memref<1x96x128xf32, #tpu.memory_space<vmem>>, vector<1x1x128xf32>
    %297 = vector.shape_cast %296 : vector<1x1x128xf32> to vector<1x128xf32>
    %298 = vector.shape_cast %295 : vector<1x128xf32> to vector<1x1x128xf32>
    tpu.vector_store %arg5[%c0_171, %c39_172, %c0_173], %298 {strides = array<i32>} : memref<1x96x128xf32, #tpu.memory_space<vmem>>, vector<1x1x128xf32>,
    %c0_174 = arith.constant 0 : index
    %c71 = arith.constant 71 : index
    %c0_175 = arith.constant 0 : index
    %299 = vector.load %arg5[%c0_174, %c71, %c0_175] : memref<1x96x128xf32, #tpu.memory_space<vmem>>, vector<1x1x128xf32>
    %300 = vector.shape_cast %299 : vector<1x1x128xf32> to vector<1x128xf32>
    %301 = arith.addf %300, %286 : vector<1x128xf32>
    %c0_176 = arith.constant 0 : index
    %c71_177 = arith.constant 71 : index
    %c0_178 = arith.constant 0 : index
    %302 = vector.load %arg5[%c0_176, %c71_177, %c0_178] : memref<1x96x128xf32, #tpu.memory_space<vmem>>, vector<1x1x128xf32>
    %303 = vector.shape_cast %302 : vector<1x1x128xf32> to vector<1x128xf32>
    %304 = vector.shape_cast %301 : vector<1x128xf32> to vector<1x1x128xf32>
    tpu.vector_store %arg5[%c0_176, %c71_177, %c0_178], %304 {strides = array<i32>} : memref<1x96x128xf32, #tpu.memory_space<vmem>>, vector<1x1x128xf32>,
    %c8_i32 = arith.constant 8 : i32
    %305 = vector.broadcast %c8_i32 : i32 to vector<16x128xi32>
    %306 = arith.cmpi eq, %55, %305 : vector<16x128xi32>
    %cst_179 = arith.constant 1.000000e+00 : f32
    %cst_180 = arith.constant 0.000000e+00 : f32
    %307 = vector.broadcast %cst_179 : f32 to vector<16x128xf32>
    %308 = vector.broadcast %cst_180 : f32 to vector<16x128xf32>
    %309 = arith.select %306, %307, %308 : vector<16x128xi1>, vector<16x128xf32>
    %cst_181 = arith.constant dense<0.000000e+00> : vector<8x128xf32>
    %310 = tpu.matmul %56, %309, %cst_181 {dimension_numbers = #tpu.dot_dimension_numbers<[1], [0], [0], [1], [0, 0, 1, 1], [], []>} : vector<8x16xf32>, vector<16x128xf32>, vector<8x128xf32> -> vector<8x128xf32>
    %311 = vector.extract_strided_slice %310 {offsets = [0, 0], sizes = [1, 128], strides = [1, 1]} : vector<8x128xf32> to vector<1x128xf32>
    %312 = arith.mulf %309, %45 : vector<16x128xf32>
    %cst_182 = arith.constant dense<0.000000e+00> : vector<8x128xf32>
    %313 = tpu.matmul %56, %312, %cst_182 {dimension_numbers = #tpu.dot_dimension_numbers<[1], [0], [0], [1], [0, 0, 1, 1], [], []>} : vector<8x16xf32>, vector<16x128xf32>, vector<8x128xf32> -> vector<8x128xf32>
    %314 = vector.extract_strided_slice %313 {offsets = [0, 0], sizes = [1, 128], strides = [1, 1]} : vector<8x128xf32> to vector<1x128xf32>
    %315 = arith.mulf %309, %48 : vector<16x128xf32>
    %cst_183 = arith.constant dense<0.000000e+00> : vector<8x128xf32>
    %316 = tpu.matmul %56, %315, %cst_183 {dimension_numbers = #tpu.dot_dimension_numbers<[1], [0], [0], [1], [0, 0, 1, 1], [], []>} : vector<8x16xf32>, vector<16x128xf32>, vector<8x128xf32> -> vector<8x128xf32>
    %317 = vector.extract_strided_slice %316 {offsets = [0, 0], sizes = [1, 128], strides = [1, 1]} : vector<8x128xf32> to vector<1x128xf32>
    %c0_184 = arith.constant 0 : index
    %c8 = arith.constant 8 : index
    %c0_185 = arith.constant 0 : index
    %318 = vector.load %arg5[%c0_184, %c8, %c0_185] : memref<1x96x128xf32, #tpu.memory_space<vmem>>, vector<1x1x128xf32>
    %319 = vector.shape_cast %318 : vector<1x1x128xf32> to vector<1x128xf32>
    %320 = arith.addf %319, %311 : vector<1x128xf32>
    %c0_186 = arith.constant 0 : index
    %c8_187 = arith.constant 8 : index
    %c0_188 = arith.constant 0 : index
    %321 = vector.load %arg5[%c0_186, %c8_187, %c0_188] : memref<1x96x128xf32, #tpu.memory_space<vmem>>, vector<1x1x128xf32>
    %322 = vector.shape_cast %321 : vector<1x1x128xf32> to vector<1x128xf32>
    %323 = vector.shape_cast %320 : vector<1x128xf32> to vector<1x1x128xf32>
    tpu.vector_store %arg5[%c0_186, %c8_187, %c0_188], %323 {strides = array<i32>} : memref<1x96x128xf32, #tpu.memory_space<vmem>>, vector<1x1x128xf32>,
    %c0_189 = arith.constant 0 : index
    %c40 = arith.constant 40 : index
    %c0_190 = arith.constant 0 : index
    %324 = vector.load %arg5[%c0_189, %c40, %c0_190] : memref<1x96x128xf32, #tpu.memory_space<vmem>>, vector<1x1x128xf32>
    %325 = vector.shape_cast %324 : vector<1x1x128xf32> to vector<1x128xf32>
    %326 = arith.addf %325, %314 : vector<1x128xf32>
    %c0_191 = arith.constant 0 : index
    %c40_192 = arith.constant 40 : index
    %c0_193 = arith.constant 0 : index
    %327 = vector.load %arg5[%c0_191, %c40_192, %c0_193] : memref<1x96x128xf32, #tpu.memory_space<vmem>>, vector<1x1x128xf32>
    %328 = vector.shape_cast %327 : vector<1x1x128xf32> to vector<1x128xf32>
    %329 = vector.shape_cast %326 : vector<1x128xf32> to vector<1x1x128xf32>
    tpu.vector_store %arg5[%c0_191, %c40_192, %c0_193], %329 {strides = array<i32>} : memref<1x96x128xf32, #tpu.memory_space<vmem>>, vector<1x1x128xf32>,
    %c0_194 = arith.constant 0 : index
    %c72 = arith.constant 72 : index
    %c0_195 = arith.constant 0 : index
    %330 = vector.load %arg5[%c0_194, %c72, %c0_195] : memref<1x96x128xf32, #tpu.memory_space<vmem>>, vector<1x1x128xf32>
    %331 = vector.shape_cast %330 : vector<1x1x128xf32> to vector<1x128xf32>
    %332 = arith.addf %331, %317 : vector<1x128xf32>
    %c0_196 = arith.constant 0 : index
    %c72_197 = arith.constant 72 : index
    %c0_198 = arith.constant 0 : index
    %333 = vector.load %arg5[%c0_196, %c72_197, %c0_198] : memref<1x96x128xf32, #tpu.memory_space<vmem>>, vector<1x1x128xf32>
    %334 = vector.shape_cast %333 : vector<1x1x128xf32> to vector<1x128xf32>
    %335 = vector.shape_cast %332 : vector<1x128xf32> to vector<1x1x128xf32>
    tpu.vector_store %arg5[%c0_196, %c72_197, %c0_198], %335 {strides = array<i32>} : memref<1x96x128xf32, #tpu.memory_space<vmem>>, vector<1x1x128xf32>,
    %c9_i32 = arith.constant 9 : i32
    %336 = vector.broadcast %c9_i32 : i32 to vector<16x128xi32>
    %337 = arith.cmpi eq, %55, %336 : vector<16x128xi32>
    %cst_199 = arith.constant 1.000000e+00 : f32
    %cst_200 = arith.constant 0.000000e+00 : f32
    %338 = vector.broadcast %cst_199 : f32 to vector<16x128xf32>
    %339 = vector.broadcast %cst_200 : f32 to vector<16x128xf32>
    %340 = arith.select %337, %338, %339 : vector<16x128xi1>, vector<16x128xf32>
    %cst_201 = arith.constant dense<0.000000e+00> : vector<8x128xf32>
    %341 = tpu.matmul %56, %340, %cst_201 {dimension_numbers = #tpu.dot_dimension_numbers<[1], [0], [0], [1], [0, 0, 1, 1], [], []>} : vector<8x16xf32>, vector<16x128xf32>, vector<8x128xf32> -> vector<8x128xf32>
    %342 = vector.extract_strided_slice %341 {offsets = [0, 0], sizes = [1, 128], strides = [1, 1]} : vector<8x128xf32> to vector<1x128xf32>
    %343 = arith.mulf %340, %45 : vector<16x128xf32>
    %cst_202 = arith.constant dense<0.000000e+00> : vector<8x128xf32>
    %344 = tpu.matmul %56, %343, %cst_202 {dimension_numbers = #tpu.dot_dimension_numbers<[1], [0], [0], [1], [0, 0, 1, 1], [], []>} : vector<8x16xf32>, vector<16x128xf32>, vector<8x128xf32> -> vector<8x128xf32>
    %345 = vector.extract_strided_slice %344 {offsets = [0, 0], sizes = [1, 128], strides = [1, 1]} : vector<8x128xf32> to vector<1x128xf32>
    %346 = arith.mulf %340, %48 : vector<16x128xf32>
    %cst_203 = arith.constant dense<0.000000e+00> : vector<8x128xf32>
    %347 = tpu.matmul %56, %346, %cst_203 {dimension_numbers = #tpu.dot_dimension_numbers<[1], [0], [0], [1], [0, 0, 1, 1], [], []>} : vector<8x16xf32>, vector<16x128xf32>, vector<8x128xf32> -> vector<8x128xf32>
    %348 = vector.extract_strided_slice %347 {offsets = [0, 0], sizes = [1, 128], strides = [1, 1]} : vector<8x128xf32> to vector<1x128xf32>
    %c0_204 = arith.constant 0 : index
    %c9 = arith.constant 9 : index
    %c0_205 = arith.constant 0 : index
    %349 = vector.load %arg5[%c0_204, %c9, %c0_205] : memref<1x96x128xf32, #tpu.memory_space<vmem>>, vector<1x1x128xf32>
    %350 = vector.shape_cast %349 : vector<1x1x128xf32> to vector<1x128xf32>
    %351 = arith.addf %350, %342 : vector<1x128xf32>
    %c0_206 = arith.constant 0 : index
    %c9_207 = arith.constant 9 : index
    %c0_208 = arith.constant 0 : index
    %352 = vector.load %arg5[%c0_206, %c9_207, %c0_208] : memref<1x96x128xf32, #tpu.memory_space<vmem>>, vector<1x1x128xf32>
    %353 = vector.shape_cast %352 : vector<1x1x128xf32> to vector<1x128xf32>
    %354 = vector.shape_cast %351 : vector<1x128xf32> to vector<1x1x128xf32>
    tpu.vector_store %arg5[%c0_206, %c9_207, %c0_208], %354 {strides = array<i32>} : memref<1x96x128xf32, #tpu.memory_space<vmem>>, vector<1x1x128xf32>,
    %c0_209 = arith.constant 0 : index
    %c41 = arith.constant 41 : index
    %c0_210 = arith.constant 0 : index
    %355 = vector.load %arg5[%c0_209, %c41, %c0_210] : memref<1x96x128xf32, #tpu.memory_space<vmem>>, vector<1x1x128xf32>
    %356 = vector.shape_cast %355 : vector<1x1x128xf32> to vector<1x128xf32>
    %357 = arith.addf %356, %345 : vector<1x128xf32>
    %c0_211 = arith.constant 0 : index
    %c41_212 = arith.constant 41 : index
    %c0_213 = arith.constant 0 : index
    %358 = vector.load %arg5[%c0_211, %c41_212, %c0_213] : memref<1x96x128xf32, #tpu.memory_space<vmem>>, vector<1x1x128xf32>
    %359 = vector.shape_cast %358 : vector<1x1x128xf32> to vector<1x128xf32>
    %360 = vector.shape_cast %357 : vector<1x128xf32> to vector<1x1x128xf32>
    tpu.vector_store %arg5[%c0_211, %c41_212, %c0_213], %360 {strides = array<i32>} : memref<1x96x128xf32, #tpu.memory_space<vmem>>, vector<1x1x128xf32>,
    %c0_214 = arith.constant 0 : index
    %c73 = arith.constant 73 : index
    %c0_215 = arith.constant 0 : index
    %361 = vector.load %arg5[%c0_214, %c73, %c0_215] : memref<1x96x128xf32, #tpu.memory_space<vmem>>, vector<1x1x128xf32>
    %362 = vector.shape_cast %361 : vector<1x1x128xf32> to vector<1x128xf32>
    %363 = arith.addf %362, %348 : vector<1x128xf32>
    %c0_216 = arith.constant 0 : index
    %c73_217 = arith.constant 73 : index
    %c0_218 = arith.constant 0 : index
    %364 = vector.load %arg5[%c0_216, %c73_217, %c0_218] : memref<1x96x128xf32, #tpu.memory_space<vmem>>, vector<1x1x128xf32>
    %365 = vector.shape_cast %364 : vector<1x1x128xf32> to vector<1x128xf32>
    %366 = vector.shape_cast %363 : vector<1x128xf32> to vector<1x1x128xf32>
    tpu.vector_store %arg5[%c0_216, %c73_217, %c0_218], %366 {strides = array<i32>} : memref<1x96x128xf32, #tpu.memory_space<vmem>>, vector<1x1x128xf32>,
    %c10_i32 = arith.constant 10 : i32
    %367 = vector.broadcast %c10_i32 : i32 to vector<16x128xi32>
    %368 = arith.cmpi eq, %55, %367 : vector<16x128xi32>
    %cst_219 = arith.constant 1.000000e+00 : f32
    %cst_220 = arith.constant 0.000000e+00 : f32
    %369 = vector.broadcast %cst_219 : f32 to vector<16x128xf32>
    %370 = vector.broadcast %cst_220 : f32 to vector<16x128xf32>
    %371 = arith.select %368, %369, %370 : vector<16x128xi1>, vector<16x128xf32>
    %cst_221 = arith.constant dense<0.000000e+00> : vector<8x128xf32>
    %372 = tpu.matmul %56, %371, %cst_221 {dimension_numbers = #tpu.dot_dimension_numbers<[1], [0], [0], [1], [0, 0, 1, 1], [], []>} : vector<8x16xf32>, vector<16x128xf32>, vector<8x128xf32> -> vector<8x128xf32>
    %373 = vector.extract_strided_slice %372 {offsets = [0, 0], sizes = [1, 128], strides = [1, 1]} : vector<8x128xf32> to vector<1x128xf32>
    %374 = arith.mulf %371, %45 : vector<16x128xf32>
    %cst_222 = arith.constant dense<0.000000e+00> : vector<8x128xf32>
    %375 = tpu.matmul %56, %374, %cst_222 {dimension_numbers = #tpu.dot_dimension_numbers<[1], [0], [0], [1], [0, 0, 1, 1], [], []>} : vector<8x16xf32>, vector<16x128xf32>, vector<8x128xf32> -> vector<8x128xf32>
    %376 = vector.extract_strided_slice %375 {offsets = [0, 0], sizes = [1, 128], strides = [1, 1]} : vector<8x128xf32> to vector<1x128xf32>
    %377 = arith.mulf %371, %48 : vector<16x128xf32>
    %cst_223 = arith.constant dense<0.000000e+00> : vector<8x128xf32>
    %378 = tpu.matmul %56, %377, %cst_223 {dimension_numbers = #tpu.dot_dimension_numbers<[1], [0], [0], [1], [0, 0, 1, 1], [], []>} : vector<8x16xf32>, vector<16x128xf32>, vector<8x128xf32> -> vector<8x128xf32>
    %379 = vector.extract_strided_slice %378 {offsets = [0, 0], sizes = [1, 128], strides = [1, 1]} : vector<8x128xf32> to vector<1x128xf32>
    %c0_224 = arith.constant 0 : index
    %c10 = arith.constant 10 : index
    %c0_225 = arith.constant 0 : index
    %380 = vector.load %arg5[%c0_224, %c10, %c0_225] : memref<1x96x128xf32, #tpu.memory_space<vmem>>, vector<1x1x128xf32>
    %381 = vector.shape_cast %380 : vector<1x1x128xf32> to vector<1x128xf32>
    %382 = arith.addf %381, %373 : vector<1x128xf32>
    %c0_226 = arith.constant 0 : index
    %c10_227 = arith.constant 10 : index
    %c0_228 = arith.constant 0 : index
    %383 = vector.load %arg5[%c0_226, %c10_227, %c0_228] : memref<1x96x128xf32, #tpu.memory_space<vmem>>, vector<1x1x128xf32>
    %384 = vector.shape_cast %383 : vector<1x1x128xf32> to vector<1x128xf32>
    %385 = vector.shape_cast %382 : vector<1x128xf32> to vector<1x1x128xf32>
    tpu.vector_store %arg5[%c0_226, %c10_227, %c0_228], %385 {strides = array<i32>} : memref<1x96x128xf32, #tpu.memory_space<vmem>>, vector<1x1x128xf32>,
    %c0_229 = arith.constant 0 : index
    %c42 = arith.constant 42 : index
    %c0_230 = arith.constant 0 : index
    %386 = vector.load %arg5[%c0_229, %c42, %c0_230] : memref<1x96x128xf32, #tpu.memory_space<vmem>>, vector<1x1x128xf32>
    %387 = vector.shape_cast %386 : vector<1x1x128xf32> to vector<1x128xf32>
    %388 = arith.addf %387, %376 : vector<1x128xf32>
    %c0_231 = arith.constant 0 : index
    %c42_232 = arith.constant 42 : index
    %c0_233 = arith.constant 0 : index
    %389 = vector.load %arg5[%c0_231, %c42_232, %c0_233] : memref<1x96x128xf32, #tpu.memory_space<vmem>>, vector<1x1x128xf32>
    %390 = vector.shape_cast %389 : vector<1x1x128xf32> to vector<1x128xf32>
    %391 = vector.shape_cast %388 : vector<1x128xf32> to vector<1x1x128xf32>
    tpu.vector_store %arg5[%c0_231, %c42_232, %c0_233], %391 {strides = array<i32>} : memref<1x96x128xf32, #tpu.memory_space<vmem>>, vector<1x1x128xf32>,
    %c0_234 = arith.constant 0 : index
    %c74 = arith.constant 74 : index
    %c0_235 = arith.constant 0 : index
    %392 = vector.load %arg5[%c0_234, %c74, %c0_235] : memref<1x96x128xf32, #tpu.memory_space<vmem>>, vector<1x1x128xf32>
    %393 = vector.shape_cast %392 : vector<1x1x128xf32> to vector<1x128xf32>
    %394 = arith.addf %393, %379 : vector<1x128xf32>
    %c0_236 = arith.constant 0 : index
    %c74_237 = arith.constant 74 : index
    %c0_238 = arith.constant 0 : index
    %395 = vector.load %arg5[%c0_236, %c74_237, %c0_238] : memref<1x96x128xf32, #tpu.memory_space<vmem>>, vector<1x1x128xf32>
    %396 = vector.shape_cast %395 : vector<1x1x128xf32> to vector<1x128xf32>
    %397 = vector.shape_cast %394 : vector<1x128xf32> to vector<1x1x128xf32>
    tpu.vector_store %arg5[%c0_236, %c74_237, %c0_238], %397 {strides = array<i32>} : memref<1x96x128xf32, #tpu.memory_space<vmem>>, vector<1x1x128xf32>,
    %c11_i32 = arith.constant 11 : i32
    %398 = vector.broadcast %c11_i32 : i32 to vector<16x128xi32>
    %399 = arith.cmpi eq, %55, %398 : vector<16x128xi32>
    %cst_239 = arith.constant 1.000000e+00 : f32
    %cst_240 = arith.constant 0.000000e+00 : f32
    %400 = vector.broadcast %cst_239 : f32 to vector<16x128xf32>
    %401 = vector.broadcast %cst_240 : f32 to vector<16x128xf32>
    %402 = arith.select %399, %400, %401 : vector<16x128xi1>, vector<16x128xf32>
    %cst_241 = arith.constant dense<0.000000e+00> : vector<8x128xf32>
    %403 = tpu.matmul %56, %402, %cst_241 {dimension_numbers = #tpu.dot_dimension_numbers<[1], [0], [0], [1], [0, 0, 1, 1], [], []>} : vector<8x16xf32>, vector<16x128xf32>, vector<8x128xf32> -> vector<8x128xf32>
    %404 = vector.extract_strided_slice %403 {offsets = [0, 0], sizes = [1, 128], strides = [1, 1]} : vector<8x128xf32> to vector<1x128xf32>
    %405 = arith.mulf %402, %45 : vector<16x128xf32>
    %cst_242 = arith.constant dense<0.000000e+00> : vector<8x128xf32>
    %406 = tpu.matmul %56, %405, %cst_242 {dimension_numbers = #tpu.dot_dimension_numbers<[1], [0], [0], [1], [0, 0, 1, 1], [], []>} : vector<8x16xf32>, vector<16x128xf32>, vector<8x128xf32> -> vector<8x128xf32>
    %407 = vector.extract_strided_slice %406 {offsets = [0, 0], sizes = [1, 128], strides = [1, 1]} : vector<8x128xf32> to vector<1x128xf32>
    %408 = arith.mulf %402, %48 : vector<16x128xf32>
    %cst_243 = arith.constant dense<0.000000e+00> : vector<8x128xf32>
    %409 = tpu.matmul %56, %408, %cst_243 {dimension_numbers = #tpu.dot_dimension_numbers<[1], [0], [0], [1], [0, 0, 1, 1], [], []>} : vector<8x16xf32>, vector<16x128xf32>, vector<8x128xf32> -> vector<8x128xf32>
    %410 = vector.extract_strided_slice %409 {offsets = [0, 0], sizes = [1, 128], strides = [1, 1]} : vector<8x128xf32> to vector<1x128xf32>
    %c0_244 = arith.constant 0 : index
    %c11 = arith.constant 11 : index
    %c0_245 = arith.constant 0 : index
    %411 = vector.load %arg5[%c0_244, %c11, %c0_245] : memref<1x96x128xf32, #tpu.memory_space<vmem>>, vector<1x1x128xf32>
    %412 = vector.shape_cast %411 : vector<1x1x128xf32> to vector<1x128xf32>
    %413 = arith.addf %412, %404 : vector<1x128xf32>
    %c0_246 = arith.constant 0 : index
    %c11_247 = arith.constant 11 : index
    %c0_248 = arith.constant 0 : index
    %414 = vector.load %arg5[%c0_246, %c11_247, %c0_248] : memref<1x96x128xf32, #tpu.memory_space<vmem>>, vector<1x1x128xf32>
    %415 = vector.shape_cast %414 : vector<1x1x128xf32> to vector<1x128xf32>
    %416 = vector.shape_cast %413 : vector<1x128xf32> to vector<1x1x128xf32>
    tpu.vector_store %arg5[%c0_246, %c11_247, %c0_248], %416 {strides = array<i32>} : memref<1x96x128xf32, #tpu.memory_space<vmem>>, vector<1x1x128xf32>,
    %c0_249 = arith.constant 0 : index
    %c43 = arith.constant 43 : index
    %c0_250 = arith.constant 0 : index
    %417 = vector.load %arg5[%c0_249, %c43, %c0_250] : memref<1x96x128xf32, #tpu.memory_space<vmem>>, vector<1x1x128xf32>
    %418 = vector.shape_cast %417 : vector<1x1x128xf32> to vector<1x128xf32>
    %419 = arith.addf %418, %407 : vector<1x128xf32>
    %c0_251 = arith.constant 0 : index
    %c43_252 = arith.constant 43 : index
    %c0_253 = arith.constant 0 : index
    %420 = vector.load %arg5[%c0_251, %c43_252, %c0_253] : memref<1x96x128xf32, #tpu.memory_space<vmem>>, vector<1x1x128xf32>
    %421 = vector.shape_cast %420 : vector<1x1x128xf32> to vector<1x128xf32>
    %422 = vector.shape_cast %419 : vector<1x128xf32> to vector<1x1x128xf32>
    tpu.vector_store %arg5[%c0_251, %c43_252, %c0_253], %422 {strides = array<i32>} : memref<1x96x128xf32, #tpu.memory_space<vmem>>, vector<1x1x128xf32>,
    %c0_254 = arith.constant 0 : index
    %c75 = arith.constant 75 : index
    %c0_255 = arith.constant 0 : index
    %423 = vector.load %arg5[%c0_254, %c75, %c0_255] : memref<1x96x128xf32, #tpu.memory_space<vmem>>, vector<1x1x128xf32>
    %424 = vector.shape_cast %423 : vector<1x1x128xf32> to vector<1x128xf32>
    %425 = arith.addf %424, %410 : vector<1x128xf32>
    %c0_256 = arith.constant 0 : index
    %c75_257 = arith.constant 75 : index
    %c0_258 = arith.constant 0 : index
    %426 = vector.load %arg5[%c0_256, %c75_257, %c0_258] : memref<1x96x128xf32, #tpu.memory_space<vmem>>, vector<1x1x128xf32>
    %427 = vector.shape_cast %426 : vector<1x1x128xf32> to vector<1x128xf32>
    %428 = vector.shape_cast %425 : vector<1x128xf32> to vector<1x1x128xf32>
    tpu.vector_store %arg5[%c0_256, %c75_257, %c0_258], %428 {strides = array<i32>} : memref<1x96x128xf32, #tpu.memory_space<vmem>>, vector<1x1x128xf32>,
    %c12_i32 = arith.constant 12 : i32
    %429 = vector.broadcast %c12_i32 : i32 to vector<16x128xi32>
    %430 = arith.cmpi eq, %55, %429 : vector<16x128xi32>
    %cst_259 = arith.constant 1.000000e+00 : f32
    %cst_260 = arith.constant 0.000000e+00 : f32
    %431 = vector.broadcast %cst_259 : f32 to vector<16x128xf32>
    %432 = vector.broadcast %cst_260 : f32 to vector<16x128xf32>
    %433 = arith.select %430, %431, %432 : vector<16x128xi1>, vector<16x128xf32>
    %cst_261 = arith.constant dense<0.000000e+00> : vector<8x128xf32>
    %434 = tpu.matmul %56, %433, %cst_261 {dimension_numbers = #tpu.dot_dimension_numbers<[1], [0], [0], [1], [0, 0, 1, 1], [], []>} : vector<8x16xf32>, vector<16x128xf32>, vector<8x128xf32> -> vector<8x128xf32>
    %435 = vector.extract_strided_slice %434 {offsets = [0, 0], sizes = [1, 128], strides = [1, 1]} : vector<8x128xf32> to vector<1x128xf32>
    %436 = arith.mulf %433, %45 : vector<16x128xf32>
    %cst_262 = arith.constant dense<0.000000e+00> : vector<8x128xf32>
    %437 = tpu.matmul %56, %436, %cst_262 {dimension_numbers = #tpu.dot_dimension_numbers<[1], [0], [0], [1], [0, 0, 1, 1], [], []>} : vector<8x16xf32>, vector<16x128xf32>, vector<8x128xf32> -> vector<8x128xf32>
    %438 = vector.extract_strided_slice %437 {offsets = [0, 0], sizes = [1, 128], strides = [1, 1]} : vector<8x128xf32> to vector<1x128xf32>
    %439 = arith.mulf %433, %48 : vector<16x128xf32>
    %cst_263 = arith.constant dense<0.000000e+00> : vector<8x128xf32>
    %440 = tpu.matmul %56, %439, %cst_263 {dimension_numbers = #tpu.dot_dimension_numbers<[1], [0], [0], [1], [0, 0, 1, 1], [], []>} : vector<8x16xf32>, vector<16x128xf32>, vector<8x128xf32> -> vector<8x128xf32>
    %441 = vector.extract_strided_slice %440 {offsets = [0, 0], sizes = [1, 128], strides = [1, 1]} : vector<8x128xf32> to vector<1x128xf32>
    %c0_264 = arith.constant 0 : index
    %c12 = arith.constant 12 : index
    %c0_265 = arith.constant 0 : index
    %442 = vector.load %arg5[%c0_264, %c12, %c0_265] : memref<1x96x128xf32, #tpu.memory_space<vmem>>, vector<1x1x128xf32>
    %443 = vector.shape_cast %442 : vector<1x1x128xf32> to vector<1x128xf32>
    %444 = arith.addf %443, %435 : vector<1x128xf32>
    %c0_266 = arith.constant 0 : index
    %c12_267 = arith.constant 12 : index
    %c0_268 = arith.constant 0 : index
    %445 = vector.load %arg5[%c0_266, %c12_267, %c0_268] : memref<1x96x128xf32, #tpu.memory_space<vmem>>, vector<1x1x128xf32>
    %446 = vector.shape_cast %445 : vector<1x1x128xf32> to vector<1x128xf32>
    %447 = vector.shape_cast %444 : vector<1x128xf32> to vector<1x1x128xf32>
    tpu.vector_store %arg5[%c0_266, %c12_267, %c0_268], %447 {strides = array<i32>} : memref<1x96x128xf32, #tpu.memory_space<vmem>>, vector<1x1x128xf32>,
    %c0_269 = arith.constant 0 : index
    %c44 = arith.constant 44 : index
    %c0_270 = arith.constant 0 : index
    %448 = vector.load %arg5[%c0_269, %c44, %c0_270] : memref<1x96x128xf32, #tpu.memory_space<vmem>>, vector<1x1x128xf32>
    %449 = vector.shape_cast %448 : vector<1x1x128xf32> to vector<1x128xf32>
    %450 = arith.addf %449, %438 : vector<1x128xf32>
    %c0_271 = arith.constant 0 : index
    %c44_272 = arith.constant 44 : index
    %c0_273 = arith.constant 0 : index
    %451 = vector.load %arg5[%c0_271, %c44_272, %c0_273] : memref<1x96x128xf32, #tpu.memory_space<vmem>>, vector<1x1x128xf32>
    %452 = vector.shape_cast %451 : vector<1x1x128xf32> to vector<1x128xf32>
    %453 = vector.shape_cast %450 : vector<1x128xf32> to vector<1x1x128xf32>
    tpu.vector_store %arg5[%c0_271, %c44_272, %c0_273], %453 {strides = array<i32>} : memref<1x96x128xf32, #tpu.memory_space<vmem>>, vector<1x1x128xf32>,
    %c0_274 = arith.constant 0 : index
    %c76 = arith.constant 76 : index
    %c0_275 = arith.constant 0 : index
    %454 = vector.load %arg5[%c0_274, %c76, %c0_275] : memref<1x96x128xf32, #tpu.memory_space<vmem>>, vector<1x1x128xf32>
    %455 = vector.shape_cast %454 : vector<1x1x128xf32> to vector<1x128xf32>
    %456 = arith.addf %455, %441 : vector<1x128xf32>
    %c0_276 = arith.constant 0 : index
    %c76_277 = arith.constant 76 : index
    %c0_278 = arith.constant 0 : index
    %457 = vector.load %arg5[%c0_276, %c76_277, %c0_278] : memref<1x96x128xf32, #tpu.memory_space<vmem>>, vector<1x1x128xf32>
    %458 = vector.shape_cast %457 : vector<1x1x128xf32> to vector<1x128xf32>
    %459 = vector.shape_cast %456 : vector<1x128xf32> to vector<1x1x128xf32>
    tpu.vector_store %arg5[%c0_276, %c76_277, %c0_278], %459 {strides = array<i32>} : memref<1x96x128xf32, #tpu.memory_space<vmem>>, vector<1x1x128xf32>,
    %c13_i32 = arith.constant 13 : i32
    %460 = vector.broadcast %c13_i32 : i32 to vector<16x128xi32>
    %461 = arith.cmpi eq, %55, %460 : vector<16x128xi32>
    %cst_279 = arith.constant 1.000000e+00 : f32
    %cst_280 = arith.constant 0.000000e+00 : f32
    %462 = vector.broadcast %cst_279 : f32 to vector<16x128xf32>
    %463 = vector.broadcast %cst_280 : f32 to vector<16x128xf32>
    %464 = arith.select %461, %462, %463 : vector<16x128xi1>, vector<16x128xf32>
    %cst_281 = arith.constant dense<0.000000e+00> : vector<8x128xf32>
    %465 = tpu.matmul %56, %464, %cst_281 {dimension_numbers = #tpu.dot_dimension_numbers<[1], [0], [0], [1], [0, 0, 1, 1], [], []>} : vector<8x16xf32>, vector<16x128xf32>, vector<8x128xf32> -> vector<8x128xf32>
    %466 = vector.extract_strided_slice %465 {offsets = [0, 0], sizes = [1, 128], strides = [1, 1]} : vector<8x128xf32> to vector<1x128xf32>
    %467 = arith.mulf %464, %45 : vector<16x128xf32>
    %cst_282 = arith.constant dense<0.000000e+00> : vector<8x128xf32>
    %468 = tpu.matmul %56, %467, %cst_282 {dimension_numbers = #tpu.dot_dimension_numbers<[1], [0], [0], [1], [0, 0, 1, 1], [], []>} : vector<8x16xf32>, vector<16x128xf32>, vector<8x128xf32> -> vector<8x128xf32>
    %469 = vector.extract_strided_slice %468 {offsets = [0, 0], sizes = [1, 128], strides = [1, 1]} : vector<8x128xf32> to vector<1x128xf32>
    %470 = arith.mulf %464, %48 : vector<16x128xf32>
    %cst_283 = arith.constant dense<0.000000e+00> : vector<8x128xf32>
    %471 = tpu.matmul %56, %470, %cst_283 {dimension_numbers = #tpu.dot_dimension_numbers<[1], [0], [0], [1], [0, 0, 1, 1], [], []>} : vector<8x16xf32>, vector<16x128xf32>, vector<8x128xf32> -> vector<8x128xf32>
    %472 = vector.extract_strided_slice %471 {offsets = [0, 0], sizes = [1, 128], strides = [1, 1]} : vector<8x128xf32> to vector<1x128xf32>
    %c0_284 = arith.constant 0 : index
    %c13 = arith.constant 13 : index
    %c0_285 = arith.constant 0 : index
    %473 = vector.load %arg5[%c0_284, %c13, %c0_285] : memref<1x96x128xf32, #tpu.memory_space<vmem>>, vector<1x1x128xf32>
    %474 = vector.shape_cast %473 : vector<1x1x128xf32> to vector<1x128xf32>
    %475 = arith.addf %474, %466 : vector<1x128xf32>
    %c0_286 = arith.constant 0 : index
    %c13_287 = arith.constant 13 : index
    %c0_288 = arith.constant 0 : index
    %476 = vector.load %arg5[%c0_286, %c13_287, %c0_288] : memref<1x96x128xf32, #tpu.memory_space<vmem>>, vector<1x1x128xf32>
    %477 = vector.shape_cast %476 : vector<1x1x128xf32> to vector<1x128xf32>
    %478 = vector.shape_cast %475 : vector<1x128xf32> to vector<1x1x128xf32>
    tpu.vector_store %arg5[%c0_286, %c13_287, %c0_288], %478 {strides = array<i32>} : memref<1x96x128xf32, #tpu.memory_space<vmem>>, vector<1x1x128xf32>,
    %c0_289 = arith.constant 0 : index
    %c45 = arith.constant 45 : index
    %c0_290 = arith.constant 0 : index
    %479 = vector.load %arg5[%c0_289, %c45, %c0_290] : memref<1x96x128xf32, #tpu.memory_space<vmem>>, vector<1x1x128xf32>
    %480 = vector.shape_cast %479 : vector<1x1x128xf32> to vector<1x128xf32>
    %481 = arith.addf %480, %469 : vector<1x128xf32>
    %c0_291 = arith.constant 0 : index
    %c45_292 = arith.constant 45 : index
    %c0_293 = arith.constant 0 : index
    %482 = vector.load %arg5[%c0_291, %c45_292, %c0_293] : memref<1x96x128xf32, #tpu.memory_space<vmem>>, vector<1x1x128xf32>
    %483 = vector.shape_cast %482 : vector<1x1x128xf32> to vector<1x128xf32>
    %484 = vector.shape_cast %481 : vector<1x128xf32> to vector<1x1x128xf32>
    tpu.vector_store %arg5[%c0_291, %c45_292, %c0_293], %484 {strides = array<i32>} : memref<1x96x128xf32, #tpu.memory_space<vmem>>, vector<1x1x128xf32>,
    %c0_294 = arith.constant 0 : index
    %c77 = arith.constant 77 : index
    %c0_295 = arith.constant 0 : index
    %485 = vector.load %arg5[%c0_294, %c77, %c0_295] : memref<1x96x128xf32, #tpu.memory_space<vmem>>, vector<1x1x128xf32>
    %486 = vector.shape_cast %485 : vector<1x1x128xf32> to vector<1x128xf32>
    %487 = arith.addf %486, %472 : vector<1x128xf32>
    %c0_296 = arith.constant 0 : index
    %c77_297 = arith.constant 77 : index
    %c0_298 = arith.constant 0 : index
    %488 = vector.load %arg5[%c0_296, %c77_297, %c0_298] : memref<1x96x128xf32, #tpu.memory_space<vmem>>, vector<1x1x128xf32>
    %489 = vector.shape_cast %488 : vector<1x1x128xf32> to vector<1x128xf32>
    %490 = vector.shape_cast %487 : vector<1x128xf32> to vector<1x1x128xf32>
    tpu.vector_store %arg5[%c0_296, %c77_297, %c0_298], %490 {strides = array<i32>} : memref<1x96x128xf32, #tpu.memory_space<vmem>>, vector<1x1x128xf32>,
    %c14_i32 = arith.constant 14 : i32
    %491 = vector.broadcast %c14_i32 : i32 to vector<16x128xi32>
    %492 = arith.cmpi eq, %55, %491 : vector<16x128xi32>
    %cst_299 = arith.constant 1.000000e+00 : f32
    %cst_300 = arith.constant 0.000000e+00 : f32
    %493 = vector.broadcast %cst_299 : f32 to vector<16x128xf32>
    %494 = vector.broadcast %cst_300 : f32 to vector<16x128xf32>
    %495 = arith.select %492, %493, %494 : vector<16x128xi1>, vector<16x128xf32>
    %cst_301 = arith.constant dense<0.000000e+00> : vector<8x128xf32>
    %496 = tpu.matmul %56, %495, %cst_301 {dimension_numbers = #tpu.dot_dimension_numbers<[1], [0], [0], [1], [0, 0, 1, 1], [], []>} : vector<8x16xf32>, vector<16x128xf32>, vector<8x128xf32> -> vector<8x128xf32>
    %497 = vector.extract_strided_slice %496 {offsets = [0, 0], sizes = [1, 128], strides = [1, 1]} : vector<8x128xf32> to vector<1x128xf32>
    %498 = arith.mulf %495, %45 : vector<16x128xf32>
    %cst_302 = arith.constant dense<0.000000e+00> : vector<8x128xf32>
    %499 = tpu.matmul %56, %498, %cst_302 {dimension_numbers = #tpu.dot_dimension_numbers<[1], [0], [0], [1], [0, 0, 1, 1], [], []>} : vector<8x16xf32>, vector<16x128xf32>, vector<8x128xf32> -> vector<8x128xf32>
    %500 = vector.extract_strided_slice %499 {offsets = [0, 0], sizes = [1, 128], strides = [1, 1]} : vector<8x128xf32> to vector<1x128xf32>
    %501 = arith.mulf %495, %48 : vector<16x128xf32>
    %cst_303 = arith.constant dense<0.000000e+00> : vector<8x128xf32>
    %502 = tpu.matmul %56, %501, %cst_303 {dimension_numbers = #tpu.dot_dimension_numbers<[1], [0], [0], [1], [0, 0, 1, 1], [], []>} : vector<8x16xf32>, vector<16x128xf32>, vector<8x128xf32> -> vector<8x128xf32>
    %503 = vector.extract_strided_slice %502 {offsets = [0, 0], sizes = [1, 128], strides = [1, 1]} : vector<8x128xf32> to vector<1x128xf32>
    %c0_304 = arith.constant 0 : index
    %c14 = arith.constant 14 : index
    %c0_305 = arith.constant 0 : index
    %504 = vector.load %arg5[%c0_304, %c14, %c0_305] : memref<1x96x128xf32, #tpu.memory_space<vmem>>, vector<1x1x128xf32>
    %505 = vector.shape_cast %504 : vector<1x1x128xf32> to vector<1x128xf32>
    %506 = arith.addf %505, %497 : vector<1x128xf32>
    %c0_306 = arith.constant 0 : index
    %c14_307 = arith.constant 14 : index
    %c0_308 = arith.constant 0 : index
    %507 = vector.load %arg5[%c0_306, %c14_307, %c0_308] : memref<1x96x128xf32, #tpu.memory_space<vmem>>, vector<1x1x128xf32>
    %508 = vector.shape_cast %507 : vector<1x1x128xf32> to vector<1x128xf32>
    %509 = vector.shape_cast %506 : vector<1x128xf32> to vector<1x1x128xf32>
    tpu.vector_store %arg5[%c0_306, %c14_307, %c0_308], %509 {strides = array<i32>} : memref<1x96x128xf32, #tpu.memory_space<vmem>>, vector<1x1x128xf32>,
    %c0_309 = arith.constant 0 : index
    %c46 = arith.constant 46 : index
    %c0_310 = arith.constant 0 : index
    %510 = vector.load %arg5[%c0_309, %c46, %c0_310] : memref<1x96x128xf32, #tpu.memory_space<vmem>>, vector<1x1x128xf32>
    %511 = vector.shape_cast %510 : vector<1x1x128xf32> to vector<1x128xf32>
    %512 = arith.addf %511, %500 : vector<1x128xf32>
    %c0_311 = arith.constant 0 : index
    %c46_312 = arith.constant 46 : index
    %c0_313 = arith.constant 0 : index
    %513 = vector.load %arg5[%c0_311, %c46_312, %c0_313] : memref<1x96x128xf32, #tpu.memory_space<vmem>>, vector<1x1x128xf32>
    %514 = vector.shape_cast %513 : vector<1x1x128xf32> to vector<1x128xf32>
    %515 = vector.shape_cast %512 : vector<1x128xf32> to vector<1x1x128xf32>
    tpu.vector_store %arg5[%c0_311, %c46_312, %c0_313], %515 {strides = array<i32>} : memref<1x96x128xf32, #tpu.memory_space<vmem>>, vector<1x1x128xf32>,
    %c0_314 = arith.constant 0 : index
    %c78 = arith.constant 78 : index
    %c0_315 = arith.constant 0 : index
    %516 = vector.load %arg5[%c0_314, %c78, %c0_315] : memref<1x96x128xf32, #tpu.memory_space<vmem>>, vector<1x1x128xf32>
    %517 = vector.shape_cast %516 : vector<1x1x128xf32> to vector<1x128xf32>
    %518 = arith.addf %517, %503 : vector<1x128xf32>
    %c0_316 = arith.constant 0 : index
    %c78_317 = arith.constant 78 : index
    %c0_318 = arith.constant 0 : index
    %519 = vector.load %arg5[%c0_316, %c78_317, %c0_318] : memref<1x96x128xf32, #tpu.memory_space<vmem>>, vector<1x1x128xf32>
    %520 = vector.shape_cast %519 : vector<1x1x128xf32> to vector<1x128xf32>
    %521 = vector.shape_cast %518 : vector<1x128xf32> to vector<1x1x128xf32>
    tpu.vector_store %arg5[%c0_316, %c78_317, %c0_318], %521 {strides = array<i32>} : memref<1x96x128xf32, #tpu.memory_space<vmem>>, vector<1x1x128xf32>,
    %c15_i32 = arith.constant 15 : i32
    %522 = vector.broadcast %c15_i32 : i32 to vector<16x128xi32>
    %523 = arith.cmpi eq, %55, %522 : vector<16x128xi32>
    %cst_319 = arith.constant 1.000000e+00 : f32
    %cst_320 = arith.constant 0.000000e+00 : f32
    %524 = vector.broadcast %cst_319 : f32 to vector<16x128xf32>
    %525 = vector.broadcast %cst_320 : f32 to vector<16x128xf32>
    %526 = arith.select %523, %524, %525 : vector<16x128xi1>, vector<16x128xf32>
    %cst_321 = arith.constant dense<0.000000e+00> : vector<8x128xf32>
    %527 = tpu.matmul %56, %526, %cst_321 {dimension_numbers = #tpu.dot_dimension_numbers<[1], [0], [0], [1], [0, 0, 1, 1], [], []>} : vector<8x16xf32>, vector<16x128xf32>, vector<8x128xf32> -> vector<8x128xf32>
    %528 = vector.extract_strided_slice %527 {offsets = [0, 0], sizes = [1, 128], strides = [1, 1]} : vector<8x128xf32> to vector<1x128xf32>
    %529 = arith.mulf %526, %45 : vector<16x128xf32>
    %cst_322 = arith.constant dense<0.000000e+00> : vector<8x128xf32>
    %530 = tpu.matmul %56, %529, %cst_322 {dimension_numbers = #tpu.dot_dimension_numbers<[1], [0], [0], [1], [0, 0, 1, 1], [], []>} : vector<8x16xf32>, vector<16x128xf32>, vector<8x128xf32> -> vector<8x128xf32>
    %531 = vector.extract_strided_slice %530 {offsets = [0, 0], sizes = [1, 128], strides = [1, 1]} : vector<8x128xf32> to vector<1x128xf32>
    %532 = arith.mulf %526, %48 : vector<16x128xf32>
    %cst_323 = arith.constant dense<0.000000e+00> : vector<8x128xf32>
    %533 = tpu.matmul %56, %532, %cst_323 {dimension_numbers = #tpu.dot_dimension_numbers<[1], [0], [0], [1], [0, 0, 1, 1], [], []>} : vector<8x16xf32>, vector<16x128xf32>, vector<8x128xf32> -> vector<8x128xf32>
    %534 = vector.extract_strided_slice %533 {offsets = [0, 0], sizes = [1, 128], strides = [1, 1]} : vector<8x128xf32> to vector<1x128xf32>
    %c0_324 = arith.constant 0 : index
    %c15 = arith.constant 15 : index
    %c0_325 = arith.constant 0 : index
    %535 = vector.load %arg5[%c0_324, %c15, %c0_325] : memref<1x96x128xf32, #tpu.memory_space<vmem>>, vector<1x1x128xf32>
    %536 = vector.shape_cast %535 : vector<1x1x128xf32> to vector<1x128xf32>
    %537 = arith.addf %536, %528 : vector<1x128xf32>
    %c0_326 = arith.constant 0 : index
    %c15_327 = arith.constant 15 : index
    %c0_328 = arith.constant 0 : index
    %538 = vector.load %arg5[%c0_326, %c15_327, %c0_328] : memref<1x96x128xf32, #tpu.memory_space<vmem>>, vector<1x1x128xf32>
    %539 = vector.shape_cast %538 : vector<1x1x128xf32> to vector<1x128xf32>
    %540 = vector.shape_cast %537 : vector<1x128xf32> to vector<1x1x128xf32>
    tpu.vector_store %arg5[%c0_326, %c15_327, %c0_328], %540 {strides = array<i32>} : memref<1x96x128xf32, #tpu.memory_space<vmem>>, vector<1x1x128xf32>,
    %c0_329 = arith.constant 0 : index
    %c47 = arith.constant 47 : index
    %c0_330 = arith.constant 0 : index
    %541 = vector.load %arg5[%c0_329, %c47, %c0_330] : memref<1x96x128xf32, #tpu.memory_space<vmem>>, vector<1x1x128xf32>
    %542 = vector.shape_cast %541 : vector<1x1x128xf32> to vector<1x128xf32>
    %543 = arith.addf %542, %531 : vector<1x128xf32>
    %c0_331 = arith.constant 0 : index
    %c47_332 = arith.constant 47 : index
    %c0_333 = arith.constant 0 : index
    %544 = vector.load %arg5[%c0_331, %c47_332, %c0_333] : memref<1x96x128xf32, #tpu.memory_space<vmem>>, vector<1x1x128xf32>
    %545 = vector.shape_cast %544 : vector<1x1x128xf32> to vector<1x128xf32>
    %546 = vector.shape_cast %543 : vector<1x128xf32> to vector<1x1x128xf32>
    tpu.vector_store %arg5[%c0_331, %c47_332, %c0_333], %546 {strides = array<i32>} : memref<1x96x128xf32, #tpu.memory_space<vmem>>, vector<1x1x128xf32>,
    %c0_334 = arith.constant 0 : index
    %c79 = arith.constant 79 : index
    %c0_335 = arith.constant 0 : index
    %547 = vector.load %arg5[%c0_334, %c79, %c0_335] : memref<1x96x128xf32, #tpu.memory_space<vmem>>, vector<1x1x128xf32>
    %548 = vector.shape_cast %547 : vector<1x1x128xf32> to vector<1x128xf32>
    %549 = arith.addf %548, %534 : vector<1x128xf32>
    %c0_336 = arith.constant 0 : index
    %c79_337 = arith.constant 79 : index
    %c0_338 = arith.constant 0 : index
    %550 = vector.load %arg5[%c0_336, %c79_337, %c0_338] : memref<1x96x128xf32, #tpu.memory_space<vmem>>, vector<1x1x128xf32>
    %551 = vector.shape_cast %550 : vector<1x1x128xf32> to vector<1x128xf32>
    %552 = vector.shape_cast %549 : vector<1x128xf32> to vector<1x1x128xf32>
    tpu.vector_store %arg5[%c0_336, %c79_337, %c0_338], %552 {strides = array<i32>} : memref<1x96x128xf32, #tpu.memory_space<vmem>>, vector<1x1x128xf32>,
    %c16_i32_339 = arith.constant 16 : i32
    %553 = vector.broadcast %c16_i32_339 : i32 to vector<16x128xi32>
    %554 = arith.cmpi eq, %55, %553 : vector<16x128xi32>
    %cst_340 = arith.constant 1.000000e+00 : f32
    %cst_341 = arith.constant 0.000000e+00 : f32
    %555 = vector.broadcast %cst_340 : f32 to vector<16x128xf32>
    %556 = vector.broadcast %cst_341 : f32 to vector<16x128xf32>
    %557 = arith.select %554, %555, %556 : vector<16x128xi1>, vector<16x128xf32>
    %cst_342 = arith.constant dense<0.000000e+00> : vector<8x128xf32>
    %558 = tpu.matmul %56, %557, %cst_342 {dimension_numbers = #tpu.dot_dimension_numbers<[1], [0], [0], [1], [0, 0, 1, 1], [], []>} : vector<8x16xf32>, vector<16x128xf32>, vector<8x128xf32> -> vector<8x128xf32>
    %559 = vector.extract_strided_slice %558 {offsets = [0, 0], sizes = [1, 128], strides = [1, 1]} : vector<8x128xf32> to vector<1x128xf32>
    %560 = arith.mulf %557, %45 : vector<16x128xf32>
    %cst_343 = arith.constant dense<0.000000e+00> : vector<8x128xf32>
    %561 = tpu.matmul %56, %560, %cst_343 {dimension_numbers = #tpu.dot_dimension_numbers<[1], [0], [0], [1], [0, 0, 1, 1], [], []>} : vector<8x16xf32>, vector<16x128xf32>, vector<8x128xf32> -> vector<8x128xf32>
    %562 = vector.extract_strided_slice %561 {offsets = [0, 0], sizes = [1, 128], strides = [1, 1]} : vector<8x128xf32> to vector<1x128xf32>
    %563 = arith.mulf %557, %48 : vector<16x128xf32>
    %cst_344 = arith.constant dense<0.000000e+00> : vector<8x128xf32>
    %564 = tpu.matmul %56, %563, %cst_344 {dimension_numbers = #tpu.dot_dimension_numbers<[1], [0], [0], [1], [0, 0, 1, 1], [], []>} : vector<8x16xf32>, vector<16x128xf32>, vector<8x128xf32> -> vector<8x128xf32>
    %565 = vector.extract_strided_slice %564 {offsets = [0, 0], sizes = [1, 128], strides = [1, 1]} : vector<8x128xf32> to vector<1x128xf32>
    %c0_345 = arith.constant 0 : index
    %c16 = arith.constant 16 : index
    %c0_346 = arith.constant 0 : index
    %566 = vector.load %arg5[%c0_345, %c16, %c0_346] : memref<1x96x128xf32, #tpu.memory_space<vmem>>, vector<1x1x128xf32>
    %567 = vector.shape_cast %566 : vector<1x1x128xf32> to vector<1x128xf32>
    %568 = arith.addf %567, %559 : vector<1x128xf32>
    %c0_347 = arith.constant 0 : index
    %c16_348 = arith.constant 16 : index
    %c0_349 = arith.constant 0 : index
    %569 = vector.load %arg5[%c0_347, %c16_348, %c0_349] : memref<1x96x128xf32, #tpu.memory_space<vmem>>, vector<1x1x128xf32>
    %570 = vector.shape_cast %569 : vector<1x1x128xf32> to vector<1x128xf32>
    %571 = vector.shape_cast %568 : vector<1x128xf32> to vector<1x1x128xf32>
    tpu.vector_store %arg5[%c0_347, %c16_348, %c0_349], %571 {strides = array<i32>} : memref<1x96x128xf32, #tpu.memory_space<vmem>>, vector<1x1x128xf32>,
    %c0_350 = arith.constant 0 : index
    %c48 = arith.constant 48 : index
    %c0_351 = arith.constant 0 : index
    %572 = vector.load %arg5[%c0_350, %c48, %c0_351] : memref<1x96x128xf32, #tpu.memory_space<vmem>>, vector<1x1x128xf32>
    %573 = vector.shape_cast %572 : vector<1x1x128xf32> to vector<1x128xf32>
    %574 = arith.addf %573, %562 : vector<1x128xf32>
    %c0_352 = arith.constant 0 : index
    %c48_353 = arith.constant 48 : index
    %c0_354 = arith.constant 0 : index
    %575 = vector.load %arg5[%c0_352, %c48_353, %c0_354] : memref<1x96x128xf32, #tpu.memory_space<vmem>>, vector<1x1x128xf32>
    %576 = vector.shape_cast %575 : vector<1x1x128xf32> to vector<1x128xf32>
    %577 = vector.shape_cast %574 : vector<1x128xf32> to vector<1x1x128xf32>
    tpu.vector_store %arg5[%c0_352, %c48_353, %c0_354], %577 {strides = array<i32>} : memref<1x96x128xf32, #tpu.memory_space<vmem>>, vector<1x1x128xf32>,
    %c0_355 = arith.constant 0 : index
    %c80 = arith.constant 80 : index
    %c0_356 = arith.constant 0 : index
    %578 = vector.load %arg5[%c0_355, %c80, %c0_356] : memref<1x96x128xf32, #tpu.memory_space<vmem>>, vector<1x1x128xf32>
    %579 = vector.shape_cast %578 : vector<1x1x128xf32> to vector<1x128xf32>
    %580 = arith.addf %579, %565 : vector<1x128xf32>
    %c0_357 = arith.constant 0 : index
    %c80_358 = arith.constant 80 : index
    %c0_359 = arith.constant 0 : index
    %581 = vector.load %arg5[%c0_357, %c80_358, %c0_359] : memref<1x96x128xf32, #tpu.memory_space<vmem>>, vector<1x1x128xf32>
    %582 = vector.shape_cast %581 : vector<1x1x128xf32> to vector<1x128xf32>
    %583 = vector.shape_cast %580 : vector<1x128xf32> to vector<1x1x128xf32>
    tpu.vector_store %arg5[%c0_357, %c80_358, %c0_359], %583 {strides = array<i32>} : memref<1x96x128xf32, #tpu.memory_space<vmem>>, vector<1x1x128xf32>,
    %c17_i32 = arith.constant 17 : i32
    %584 = vector.broadcast %c17_i32 : i32 to vector<16x128xi32>
    %585 = arith.cmpi eq, %55, %584 : vector<16x128xi32>
    %cst_360 = arith.constant 1.000000e+00 : f32
    %cst_361 = arith.constant 0.000000e+00 : f32
    %586 = vector.broadcast %cst_360 : f32 to vector<16x128xf32>
    %587 = vector.broadcast %cst_361 : f32 to vector<16x128xf32>
    %588 = arith.select %585, %586, %587 : vector<16x128xi1>, vector<16x128xf32>
    %cst_362 = arith.constant dense<0.000000e+00> : vector<8x128xf32>
    %589 = tpu.matmul %56, %588, %cst_362 {dimension_numbers = #tpu.dot_dimension_numbers<[1], [0], [0], [1], [0, 0, 1, 1], [], []>} : vector<8x16xf32>, vector<16x128xf32>, vector<8x128xf32> -> vector<8x128xf32>
    %590 = vector.extract_strided_slice %589 {offsets = [0, 0], sizes = [1, 128], strides = [1, 1]} : vector<8x128xf32> to vector<1x128xf32>
    %591 = arith.mulf %588, %45 : vector<16x128xf32>
    %cst_363 = arith.constant dense<0.000000e+00> : vector<8x128xf32>
    %592 = tpu.matmul %56, %591, %cst_363 {dimension_numbers = #tpu.dot_dimension_numbers<[1], [0], [0], [1], [0, 0, 1, 1], [], []>} : vector<8x16xf32>, vector<16x128xf32>, vector<8x128xf32> -> vector<8x128xf32>
    %593 = vector.extract_strided_slice %592 {offsets = [0, 0], sizes = [1, 128], strides = [1, 1]} : vector<8x128xf32> to vector<1x128xf32>
    %594 = arith.mulf %588, %48 : vector<16x128xf32>
    %cst_364 = arith.constant dense<0.000000e+00> : vector<8x128xf32>
    %595 = tpu.matmul %56, %594, %cst_364 {dimension_numbers = #tpu.dot_dimension_numbers<[1], [0], [0], [1], [0, 0, 1, 1], [], []>} : vector<8x16xf32>, vector<16x128xf32>, vector<8x128xf32> -> vector<8x128xf32>
    %596 = vector.extract_strided_slice %595 {offsets = [0, 0], sizes = [1, 128], strides = [1, 1]} : vector<8x128xf32> to vector<1x128xf32>
    %c0_365 = arith.constant 0 : index
    %c17 = arith.constant 17 : index
    %c0_366 = arith.constant 0 : index
    %597 = vector.load %arg5[%c0_365, %c17, %c0_366] : memref<1x96x128xf32, #tpu.memory_space<vmem>>, vector<1x1x128xf32>
    %598 = vector.shape_cast %597 : vector<1x1x128xf32> to vector<1x128xf32>
    %599 = arith.addf %598, %590 : vector<1x128xf32>
    %c0_367 = arith.constant 0 : index
    %c17_368 = arith.constant 17 : index
    %c0_369 = arith.constant 0 : index
    %600 = vector.load %arg5[%c0_367, %c17_368, %c0_369] : memref<1x96x128xf32, #tpu.memory_space<vmem>>, vector<1x1x128xf32>
    %601 = vector.shape_cast %600 : vector<1x1x128xf32> to vector<1x128xf32>
    %602 = vector.shape_cast %599 : vector<1x128xf32> to vector<1x1x128xf32>
    tpu.vector_store %arg5[%c0_367, %c17_368, %c0_369], %602 {strides = array<i32>} : memref<1x96x128xf32, #tpu.memory_space<vmem>>, vector<1x1x128xf32>,
    %c0_370 = arith.constant 0 : index
    %c49 = arith.constant 49 : index
    %c0_371 = arith.constant 0 : index
    %603 = vector.load %arg5[%c0_370, %c49, %c0_371] : memref<1x96x128xf32, #tpu.memory_space<vmem>>, vector<1x1x128xf32>
    %604 = vector.shape_cast %603 : vector<1x1x128xf32> to vector<1x128xf32>
    %605 = arith.addf %604, %593 : vector<1x128xf32>
    %c0_372 = arith.constant 0 : index
    %c49_373 = arith.constant 49 : index
    %c0_374 = arith.constant 0 : index
    %606 = vector.load %arg5[%c0_372, %c49_373, %c0_374] : memref<1x96x128xf32, #tpu.memory_space<vmem>>, vector<1x1x128xf32>
    %607 = vector.shape_cast %606 : vector<1x1x128xf32> to vector<1x128xf32>
    %608 = vector.shape_cast %605 : vector<1x128xf32> to vector<1x1x128xf32>
    tpu.vector_store %arg5[%c0_372, %c49_373, %c0_374], %608 {strides = array<i32>} : memref<1x96x128xf32, #tpu.memory_space<vmem>>, vector<1x1x128xf32>,
    %c0_375 = arith.constant 0 : index
    %c81 = arith.constant 81 : index
    %c0_376 = arith.constant 0 : index
    %609 = vector.load %arg5[%c0_375, %c81, %c0_376] : memref<1x96x128xf32, #tpu.memory_space<vmem>>, vector<1x1x128xf32>
    %610 = vector.shape_cast %609 : vector<1x1x128xf32> to vector<1x128xf32>
    %611 = arith.addf %610, %596 : vector<1x128xf32>
    %c0_377 = arith.constant 0 : index
    %c81_378 = arith.constant 81 : index
    %c0_379 = arith.constant 0 : index
    %612 = vector.load %arg5[%c0_377, %c81_378, %c0_379] : memref<1x96x128xf32, #tpu.memory_space<vmem>>, vector<1x1x128xf32>
    %613 = vector.shape_cast %612 : vector<1x1x128xf32> to vector<1x128xf32>
    %614 = vector.shape_cast %611 : vector<1x128xf32> to vector<1x1x128xf32>
    tpu.vector_store %arg5[%c0_377, %c81_378, %c0_379], %614 {strides = array<i32>} : memref<1x96x128xf32, #tpu.memory_space<vmem>>, vector<1x1x128xf32>,
    %c18_i32 = arith.constant 18 : i32
    %615 = vector.broadcast %c18_i32 : i32 to vector<16x128xi32>
    %616 = arith.cmpi eq, %55, %615 : vector<16x128xi32>
    %cst_380 = arith.constant 1.000000e+00 : f32
    %cst_381 = arith.constant 0.000000e+00 : f32
    %617 = vector.broadcast %cst_380 : f32 to vector<16x128xf32>
    %618 = vector.broadcast %cst_381 : f32 to vector<16x128xf32>
    %619 = arith.select %616, %617, %618 : vector<16x128xi1>, vector<16x128xf32>
    %cst_382 = arith.constant dense<0.000000e+00> : vector<8x128xf32>
    %620 = tpu.matmul %56, %619, %cst_382 {dimension_numbers = #tpu.dot_dimension_numbers<[1], [0], [0], [1], [0, 0, 1, 1], [], []>} : vector<8x16xf32>, vector<16x128xf32>, vector<8x128xf32> -> vector<8x128xf32>
    %621 = vector.extract_strided_slice %620 {offsets = [0, 0], sizes = [1, 128], strides = [1, 1]} : vector<8x128xf32> to vector<1x128xf32>
    %622 = arith.mulf %619, %45 : vector<16x128xf32>
    %cst_383 = arith.constant dense<0.000000e+00> : vector<8x128xf32>
    %623 = tpu.matmul %56, %622, %cst_383 {dimension_numbers = #tpu.dot_dimension_numbers<[1], [0], [0], [1], [0, 0, 1, 1], [], []>} : vector<8x16xf32>, vector<16x128xf32>, vector<8x128xf32> -> vector<8x128xf32>
    %624 = vector.extract_strided_slice %623 {offsets = [0, 0], sizes = [1, 128], strides = [1, 1]} : vector<8x128xf32> to vector<1x128xf32>
    %625 = arith.mulf %619, %48 : vector<16x128xf32>
    %cst_384 = arith.constant dense<0.000000e+00> : vector<8x128xf32>
    %626 = tpu.matmul %56, %625, %cst_384 {dimension_numbers = #tpu.dot_dimension_numbers<[1], [0], [0], [1], [0, 0, 1, 1], [], []>} : vector<8x16xf32>, vector<16x128xf32>, vector<8x128xf32> -> vector<8x128xf32>
    %627 = vector.extract_strided_slice %626 {offsets = [0, 0], sizes = [1, 128], strides = [1, 1]} : vector<8x128xf32> to vector<1x128xf32>
    %c0_385 = arith.constant 0 : index
    %c18 = arith.constant 18 : index
    %c0_386 = arith.constant 0 : index
    %628 = vector.load %arg5[%c0_385, %c18, %c0_386] : memref<1x96x128xf32, #tpu.memory_space<vmem>>, vector<1x1x128xf32>
    %629 = vector.shape_cast %628 : vector<1x1x128xf32> to vector<1x128xf32>
    %630 = arith.addf %629, %621 : vector<1x128xf32>
    %c0_387 = arith.constant 0 : index
    %c18_388 = arith.constant 18 : index
    %c0_389 = arith.constant 0 : index
    %631 = vector.load %arg5[%c0_387, %c18_388, %c0_389] : memref<1x96x128xf32, #tpu.memory_space<vmem>>, vector<1x1x128xf32>
    %632 = vector.shape_cast %631 : vector<1x1x128xf32> to vector<1x128xf32>
    %633 = vector.shape_cast %630 : vector<1x128xf32> to vector<1x1x128xf32>
    tpu.vector_store %arg5[%c0_387, %c18_388, %c0_389], %633 {strides = array<i32>} : memref<1x96x128xf32, #tpu.memory_space<vmem>>, vector<1x1x128xf32>,
    %c0_390 = arith.constant 0 : index
    %c50 = arith.constant 50 : index
    %c0_391 = arith.constant 0 : index
    %634 = vector.load %arg5[%c0_390, %c50, %c0_391] : memref<1x96x128xf32, #tpu.memory_space<vmem>>, vector<1x1x128xf32>
    %635 = vector.shape_cast %634 : vector<1x1x128xf32> to vector<1x128xf32>
    %636 = arith.addf %635, %624 : vector<1x128xf32>
    %c0_392 = arith.constant 0 : index
    %c50_393 = arith.constant 50 : index
    %c0_394 = arith.constant 0 : index
    %637 = vector.load %arg5[%c0_392, %c50_393, %c0_394] : memref<1x96x128xf32, #tpu.memory_space<vmem>>, vector<1x1x128xf32>
    %638 = vector.shape_cast %637 : vector<1x1x128xf32> to vector<1x128xf32>
    %639 = vector.shape_cast %636 : vector<1x128xf32> to vector<1x1x128xf32>
    tpu.vector_store %arg5[%c0_392, %c50_393, %c0_394], %639 {strides = array<i32>} : memref<1x96x128xf32, #tpu.memory_space<vmem>>, vector<1x1x128xf32>,
    %c0_395 = arith.constant 0 : index
    %c82 = arith.constant 82 : index
    %c0_396 = arith.constant 0 : index
    %640 = vector.load %arg5[%c0_395, %c82, %c0_396] : memref<1x96x128xf32, #tpu.memory_space<vmem>>, vector<1x1x128xf32>
    %641 = vector.shape_cast %640 : vector<1x1x128xf32> to vector<1x128xf32>
    %642 = arith.addf %641, %627 : vector<1x128xf32>
    %c0_397 = arith.constant 0 : index
    %c82_398 = arith.constant 82 : index
    %c0_399 = arith.constant 0 : index
    %643 = vector.load %arg5[%c0_397, %c82_398, %c0_399] : memref<1x96x128xf32, #tpu.memory_space<vmem>>, vector<1x1x128xf32>
    %644 = vector.shape_cast %643 : vector<1x1x128xf32> to vector<1x128xf32>
    %645 = vector.shape_cast %642 : vector<1x128xf32> to vector<1x1x128xf32>
    tpu.vector_store %arg5[%c0_397, %c82_398, %c0_399], %645 {strides = array<i32>} : memref<1x96x128xf32, #tpu.memory_space<vmem>>, vector<1x1x128xf32>,
    %c19_i32 = arith.constant 19 : i32
    %646 = vector.broadcast %c19_i32 : i32 to vector<16x128xi32>
    %647 = arith.cmpi eq, %55, %646 : vector<16x128xi32>
    %cst_400 = arith.constant 1.000000e+00 : f32
    %cst_401 = arith.constant 0.000000e+00 : f32
    %648 = vector.broadcast %cst_400 : f32 to vector<16x128xf32>
    %649 = vector.broadcast %cst_401 : f32 to vector<16x128xf32>
    %650 = arith.select %647, %648, %649 : vector<16x128xi1>, vector<16x128xf32>
    %cst_402 = arith.constant dense<0.000000e+00> : vector<8x128xf32>
    %651 = tpu.matmul %56, %650, %cst_402 {dimension_numbers = #tpu.dot_dimension_numbers<[1], [0], [0], [1], [0, 0, 1, 1], [], []>} : vector<8x16xf32>, vector<16x128xf32>, vector<8x128xf32> -> vector<8x128xf32>
    %652 = vector.extract_strided_slice %651 {offsets = [0, 0], sizes = [1, 128], strides = [1, 1]} : vector<8x128xf32> to vector<1x128xf32>
    %653 = arith.mulf %650, %45 : vector<16x128xf32>
    %cst_403 = arith.constant dense<0.000000e+00> : vector<8x128xf32>
    %654 = tpu.matmul %56, %653, %cst_403 {dimension_numbers = #tpu.dot_dimension_numbers<[1], [0], [0], [1], [0, 0, 1, 1], [], []>} : vector<8x16xf32>, vector<16x128xf32>, vector<8x128xf32> -> vector<8x128xf32>
    %655 = vector.extract_strided_slice %654 {offsets = [0, 0], sizes = [1, 128], strides = [1, 1]} : vector<8x128xf32> to vector<1x128xf32>
    %656 = arith.mulf %650, %48 : vector<16x128xf32>
    %cst_404 = arith.constant dense<0.000000e+00> : vector<8x128xf32>
    %657 = tpu.matmul %56, %656, %cst_404 {dimension_numbers = #tpu.dot_dimension_numbers<[1], [0], [0], [1], [0, 0, 1, 1], [], []>} : vector<8x16xf32>, vector<16x128xf32>, vector<8x128xf32> -> vector<8x128xf32>
    %658 = vector.extract_strided_slice %657 {offsets = [0, 0], sizes = [1, 128], strides = [1, 1]} : vector<8x128xf32> to vector<1x128xf32>
    %c0_405 = arith.constant 0 : index
    %c19 = arith.constant 19 : index
    %c0_406 = arith.constant 0 : index
    %659 = vector.load %arg5[%c0_405, %c19, %c0_406] : memref<1x96x128xf32, #tpu.memory_space<vmem>>, vector<1x1x128xf32>
    %660 = vector.shape_cast %659 : vector<1x1x128xf32> to vector<1x128xf32>
    %661 = arith.addf %660, %652 : vector<1x128xf32>
    %c0_407 = arith.constant 0 : index
    %c19_408 = arith.constant 19 : index
    %c0_409 = arith.constant 0 : index
    %662 = vector.load %arg5[%c0_407, %c19_408, %c0_409] : memref<1x96x128xf32, #tpu.memory_space<vmem>>, vector<1x1x128xf32>
    %663 = vector.shape_cast %662 : vector<1x1x128xf32> to vector<1x128xf32>
    %664 = vector.shape_cast %661 : vector<1x128xf32> to vector<1x1x128xf32>
    tpu.vector_store %arg5[%c0_407, %c19_408, %c0_409], %664 {strides = array<i32>} : memref<1x96x128xf32, #tpu.memory_space<vmem>>, vector<1x1x128xf32>,
    %c0_410 = arith.constant 0 : index
    %c51 = arith.constant 51 : index
    %c0_411 = arith.constant 0 : index
    %665 = vector.load %arg5[%c0_410, %c51, %c0_411] : memref<1x96x128xf32, #tpu.memory_space<vmem>>, vector<1x1x128xf32>
    %666 = vector.shape_cast %665 : vector<1x1x128xf32> to vector<1x128xf32>
    %667 = arith.addf %666, %655 : vector<1x128xf32>
    %c0_412 = arith.constant 0 : index
    %c51_413 = arith.constant 51 : index
    %c0_414 = arith.constant 0 : index
    %668 = vector.load %arg5[%c0_412, %c51_413, %c0_414] : memref<1x96x128xf32, #tpu.memory_space<vmem>>, vector<1x1x128xf32>
    %669 = vector.shape_cast %668 : vector<1x1x128xf32> to vector<1x128xf32>
    %670 = vector.shape_cast %667 : vector<1x128xf32> to vector<1x1x128xf32>
    tpu.vector_store %arg5[%c0_412, %c51_413, %c0_414], %670 {strides = array<i32>} : memref<1x96x128xf32, #tpu.memory_space<vmem>>, vector<1x1x128xf32>,
    %c0_415 = arith.constant 0 : index
    %c83 = arith.constant 83 : index
    %c0_416 = arith.constant 0 : index
    %671 = vector.load %arg5[%c0_415, %c83, %c0_416] : memref<1x96x128xf32, #tpu.memory_space<vmem>>, vector<1x1x128xf32>
    %672 = vector.shape_cast %671 : vector<1x1x128xf32> to vector<1x128xf32>
    %673 = arith.addf %672, %658 : vector<1x128xf32>
    %c0_417 = arith.constant 0 : index
    %c83_418 = arith.constant 83 : index
    %c0_419 = arith.constant 0 : index
    %674 = vector.load %arg5[%c0_417, %c83_418, %c0_419] : memref<1x96x128xf32, #tpu.memory_space<vmem>>, vector<1x1x128xf32>
    %675 = vector.shape_cast %674 : vector<1x1x128xf32> to vector<1x128xf32>
    %676 = vector.shape_cast %673 : vector<1x128xf32> to vector<1x1x128xf32>
    tpu.vector_store %arg5[%c0_417, %c83_418, %c0_419], %676 {strides = array<i32>} : memref<1x96x128xf32, #tpu.memory_space<vmem>>, vector<1x1x128xf32>,
    %c20_i32 = arith.constant 20 : i32
    %677 = vector.broadcast %c20_i32 : i32 to vector<16x128xi32>
    %678 = arith.cmpi eq, %55, %677 : vector<16x128xi32>
    %cst_420 = arith.constant 1.000000e+00 : f32
    %cst_421 = arith.constant 0.000000e+00 : f32
    %679 = vector.broadcast %cst_420 : f32 to vector<16x128xf32>
    %680 = vector.broadcast %cst_421 : f32 to vector<16x128xf32>
    %681 = arith.select %678, %679, %680 : vector<16x128xi1>, vector<16x128xf32>
    %cst_422 = arith.constant dense<0.000000e+00> : vector<8x128xf32>
    %682 = tpu.matmul %56, %681, %cst_422 {dimension_numbers = #tpu.dot_dimension_numbers<[1], [0], [0], [1], [0, 0, 1, 1], [], []>} : vector<8x16xf32>, vector<16x128xf32>, vector<8x128xf32> -> vector<8x128xf32>
    %683 = vector.extract_strided_slice %682 {offsets = [0, 0], sizes = [1, 128], strides = [1, 1]} : vector<8x128xf32> to vector<1x128xf32>
    %684 = arith.mulf %681, %45 : vector<16x128xf32>
    %cst_423 = arith.constant dense<0.000000e+00> : vector<8x128xf32>
    %685 = tpu.matmul %56, %684, %cst_423 {dimension_numbers = #tpu.dot_dimension_numbers<[1], [0], [0], [1], [0, 0, 1, 1], [], []>} : vector<8x16xf32>, vector<16x128xf32>, vector<8x128xf32> -> vector<8x128xf32>
    %686 = vector.extract_strided_slice %685 {offsets = [0, 0], sizes = [1, 128], strides = [1, 1]} : vector<8x128xf32> to vector<1x128xf32>
    %687 = arith.mulf %681, %48 : vector<16x128xf32>
    %cst_424 = arith.constant dense<0.000000e+00> : vector<8x128xf32>
    %688 = tpu.matmul %56, %687, %cst_424 {dimension_numbers = #tpu.dot_dimension_numbers<[1], [0], [0], [1], [0, 0, 1, 1], [], []>} : vector<8x16xf32>, vector<16x128xf32>, vector<8x128xf32> -> vector<8x128xf32>
    %689 = vector.extract_strided_slice %688 {offsets = [0, 0], sizes = [1, 128], strides = [1, 1]} : vector<8x128xf32> to vector<1x128xf32>
    %c0_425 = arith.constant 0 : index
    %c20 = arith.constant 20 : index
    %c0_426 = arith.constant 0 : index
    %690 = vector.load %arg5[%c0_425, %c20, %c0_426] : memref<1x96x128xf32, #tpu.memory_space<vmem>>, vector<1x1x128xf32>
    %691 = vector.shape_cast %690 : vector<1x1x128xf32> to vector<1x128xf32>
    %692 = arith.addf %691, %683 : vector<1x128xf32>
    %c0_427 = arith.constant 0 : index
    %c20_428 = arith.constant 20 : index
    %c0_429 = arith.constant 0 : index
    %693 = vector.load %arg5[%c0_427, %c20_428, %c0_429] : memref<1x96x128xf32, #tpu.memory_space<vmem>>, vector<1x1x128xf32>
    %694 = vector.shape_cast %693 : vector<1x1x128xf32> to vector<1x128xf32>
    %695 = vector.shape_cast %692 : vector<1x128xf32> to vector<1x1x128xf32>
    tpu.vector_store %arg5[%c0_427, %c20_428, %c0_429], %695 {strides = array<i32>} : memref<1x96x128xf32, #tpu.memory_space<vmem>>, vector<1x1x128xf32>,
    %c0_430 = arith.constant 0 : index
    %c52 = arith.constant 52 : index
    %c0_431 = arith.constant 0 : index
    %696 = vector.load %arg5[%c0_430, %c52, %c0_431] : memref<1x96x128xf32, #tpu.memory_space<vmem>>, vector<1x1x128xf32>
    %697 = vector.shape_cast %696 : vector<1x1x128xf32> to vector<1x128xf32>
    %698 = arith.addf %697, %686 : vector<1x128xf32>
    %c0_432 = arith.constant 0 : index
    %c52_433 = arith.constant 52 : index
    %c0_434 = arith.constant 0 : index
    %699 = vector.load %arg5[%c0_432, %c52_433, %c0_434] : memref<1x96x128xf32, #tpu.memory_space<vmem>>, vector<1x1x128xf32>
    %700 = vector.shape_cast %699 : vector<1x1x128xf32> to vector<1x128xf32>
    %701 = vector.shape_cast %698 : vector<1x128xf32> to vector<1x1x128xf32>
    tpu.vector_store %arg5[%c0_432, %c52_433, %c0_434], %701 {strides = array<i32>} : memref<1x96x128xf32, #tpu.memory_space<vmem>>, vector<1x1x128xf32>,
    %c0_435 = arith.constant 0 : index
    %c84 = arith.constant 84 : index
    %c0_436 = arith.constant 0 : index
    %702 = vector.load %arg5[%c0_435, %c84, %c0_436] : memref<1x96x128xf32, #tpu.memory_space<vmem>>, vector<1x1x128xf32>
    %703 = vector.shape_cast %702 : vector<1x1x128xf32> to vector<1x128xf32>
    %704 = arith.addf %703, %689 : vector<1x128xf32>
    %c0_437 = arith.constant 0 : index
    %c84_438 = arith.constant 84 : index
    %c0_439 = arith.constant 0 : index
    %705 = vector.load %arg5[%c0_437, %c84_438, %c0_439] : memref<1x96x128xf32, #tpu.memory_space<vmem>>, vector<1x1x128xf32>
    %706 = vector.shape_cast %705 : vector<1x1x128xf32> to vector<1x128xf32>
    %707 = vector.shape_cast %704 : vector<1x128xf32> to vector<1x1x128xf32>
    tpu.vector_store %arg5[%c0_437, %c84_438, %c0_439], %707 {strides = array<i32>} : memref<1x96x128xf32, #tpu.memory_space<vmem>>, vector<1x1x128xf32>,
    %c21_i32 = arith.constant 21 : i32
    %708 = vector.broadcast %c21_i32 : i32 to vector<16x128xi32>
    %709 = arith.cmpi eq, %55, %708 : vector<16x128xi32>
    %cst_440 = arith.constant 1.000000e+00 : f32
    %cst_441 = arith.constant 0.000000e+00 : f32
    %710 = vector.broadcast %cst_440 : f32 to vector<16x128xf32>
    %711 = vector.broadcast %cst_441 : f32 to vector<16x128xf32>
    %712 = arith.select %709, %710, %711 : vector<16x128xi1>, vector<16x128xf32>
    %cst_442 = arith.constant dense<0.000000e+00> : vector<8x128xf32>
    %713 = tpu.matmul %56, %712, %cst_442 {dimension_numbers = #tpu.dot_dimension_numbers<[1], [0], [0], [1], [0, 0, 1, 1], [], []>} : vector<8x16xf32>, vector<16x128xf32>, vector<8x128xf32> -> vector<8x128xf32>
    %714 = vector.extract_strided_slice %713 {offsets = [0, 0], sizes = [1, 128], strides = [1, 1]} : vector<8x128xf32> to vector<1x128xf32>
    %715 = arith.mulf %712, %45 : vector<16x128xf32>
    %cst_443 = arith.constant dense<0.000000e+00> : vector<8x128xf32>
    %716 = tpu.matmul %56, %715, %cst_443 {dimension_numbers = #tpu.dot_dimension_numbers<[1], [0], [0], [1], [0, 0, 1, 1], [], []>} : vector<8x16xf32>, vector<16x128xf32>, vector<8x128xf32> -> vector<8x128xf32>
    %717 = vector.extract_strided_slice %716 {offsets = [0, 0], sizes = [1, 128], strides = [1, 1]} : vector<8x128xf32> to vector<1x128xf32>
    %718 = arith.mulf %712, %48 : vector<16x128xf32>
    %cst_444 = arith.constant dense<0.000000e+00> : vector<8x128xf32>
    %719 = tpu.matmul %56, %718, %cst_444 {dimension_numbers = #tpu.dot_dimension_numbers<[1], [0], [0], [1], [0, 0, 1, 1], [], []>} : vector<8x16xf32>, vector<16x128xf32>, vector<8x128xf32> -> vector<8x128xf32>
    %720 = vector.extract_strided_slice %719 {offsets = [0, 0], sizes = [1, 128], strides = [1, 1]} : vector<8x128xf32> to vector<1x128xf32>
    %c0_445 = arith.constant 0 : index
    %c21 = arith.constant 21 : index
    %c0_446 = arith.constant 0 : index
    %721 = vector.load %arg5[%c0_445, %c21, %c0_446] : memref<1x96x128xf32, #tpu.memory_space<vmem>>, vector<1x1x128xf32>
    %722 = vector.shape_cast %721 : vector<1x1x128xf32> to vector<1x128xf32>
    %723 = arith.addf %722, %714 : vector<1x128xf32>
    %c0_447 = arith.constant 0 : index
    %c21_448 = arith.constant 21 : index
    %c0_449 = arith.constant 0 : index
    %724 = vector.load %arg5[%c0_447, %c21_448, %c0_449] : memref<1x96x128xf32, #tpu.memory_space<vmem>>, vector<1x1x128xf32>
    %725 = vector.shape_cast %724 : vector<1x1x128xf32> to vector<1x128xf32>
    %726 = vector.shape_cast %723 : vector<1x128xf32> to vector<1x1x128xf32>
    tpu.vector_store %arg5[%c0_447, %c21_448, %c0_449], %726 {strides = array<i32>} : memref<1x96x128xf32, #tpu.memory_space<vmem>>, vector<1x1x128xf32>,
    %c0_450 = arith.constant 0 : index
    %c53 = arith.constant 53 : index
    %c0_451 = arith.constant 0 : index
    %727 = vector.load %arg5[%c0_450, %c53, %c0_451] : memref<1x96x128xf32, #tpu.memory_space<vmem>>, vector<1x1x128xf32>
    %728 = vector.shape_cast %727 : vector<1x1x128xf32> to vector<1x128xf32>
    %729 = arith.addf %728, %717 : vector<1x128xf32>
    %c0_452 = arith.constant 0 : index
    %c53_453 = arith.constant 53 : index
    %c0_454 = arith.constant 0 : index
    %730 = vector.load %arg5[%c0_452, %c53_453, %c0_454] : memref<1x96x128xf32, #tpu.memory_space<vmem>>, vector<1x1x128xf32>
    %731 = vector.shape_cast %730 : vector<1x1x128xf32> to vector<1x128xf32>
    %732 = vector.shape_cast %729 : vector<1x128xf32> to vector<1x1x128xf32>
    tpu.vector_store %arg5[%c0_452, %c53_453, %c0_454], %732 {strides = array<i32>} : memref<1x96x128xf32, #tpu.memory_space<vmem>>, vector<1x1x128xf32>,
    %c0_455 = arith.constant 0 : index
    %c85 = arith.constant 85 : index
    %c0_456 = arith.constant 0 : index
    %733 = vector.load %arg5[%c0_455, %c85, %c0_456] : memref<1x96x128xf32, #tpu.memory_space<vmem>>, vector<1x1x128xf32>
    %734 = vector.shape_cast %733 : vector<1x1x128xf32> to vector<1x128xf32>
    %735 = arith.addf %734, %720 : vector<1x128xf32>
    %c0_457 = arith.constant 0 : index
    %c85_458 = arith.constant 85 : index
    %c0_459 = arith.constant 0 : index
    %736 = vector.load %arg5[%c0_457, %c85_458, %c0_459] : memref<1x96x128xf32, #tpu.memory_space<vmem>>, vector<1x1x128xf32>
    %737 = vector.shape_cast %736 : vector<1x1x128xf32> to vector<1x128xf32>
    %738 = vector.shape_cast %735 : vector<1x128xf32> to vector<1x1x128xf32>
    tpu.vector_store %arg5[%c0_457, %c85_458, %c0_459], %738 {strides = array<i32>} : memref<1x96x128xf32, #tpu.memory_space<vmem>>, vector<1x1x128xf32>,
    %c22_i32 = arith.constant 22 : i32
    %739 = vector.broadcast %c22_i32 : i32 to vector<16x128xi32>
    %740 = arith.cmpi eq, %55, %739 : vector<16x128xi32>
    %cst_460 = arith.constant 1.000000e+00 : f32
    %cst_461 = arith.constant 0.000000e+00 : f32
    %741 = vector.broadcast %cst_460 : f32 to vector<16x128xf32>
    %742 = vector.broadcast %cst_461 : f32 to vector<16x128xf32>
    %743 = arith.select %740, %741, %742 : vector<16x128xi1>, vector<16x128xf32>
    %cst_462 = arith.constant dense<0.000000e+00> : vector<8x128xf32>
    %744 = tpu.matmul %56, %743, %cst_462 {dimension_numbers = #tpu.dot_dimension_numbers<[1], [0], [0], [1], [0, 0, 1, 1], [], []>} : vector<8x16xf32>, vector<16x128xf32>, vector<8x128xf32> -> vector<8x128xf32>
    %745 = vector.extract_strided_slice %744 {offsets = [0, 0], sizes = [1, 128], strides = [1, 1]} : vector<8x128xf32> to vector<1x128xf32>
    %746 = arith.mulf %743, %45 : vector<16x128xf32>
    %cst_463 = arith.constant dense<0.000000e+00> : vector<8x128xf32>
    %747 = tpu.matmul %56, %746, %cst_463 {dimension_numbers = #tpu.dot_dimension_numbers<[1], [0], [0], [1], [0, 0, 1, 1], [], []>} : vector<8x16xf32>, vector<16x128xf32>, vector<8x128xf32> -> vector<8x128xf32>
    %748 = vector.extract_strided_slice %747 {offsets = [0, 0], sizes = [1, 128], strides = [1, 1]} : vector<8x128xf32> to vector<1x128xf32>
    %749 = arith.mulf %743, %48 : vector<16x128xf32>
    %cst_464 = arith.constant dense<0.000000e+00> : vector<8x128xf32>
    %750 = tpu.matmul %56, %749, %cst_464 {dimension_numbers = #tpu.dot_dimension_numbers<[1], [0], [0], [1], [0, 0, 1, 1], [], []>} : vector<8x16xf32>, vector<16x128xf32>, vector<8x128xf32> -> vector<8x128xf32>
    %751 = vector.extract_strided_slice %750 {offsets = [0, 0], sizes = [1, 128], strides = [1, 1]} : vector<8x128xf32> to vector<1x128xf32>
    %c0_465 = arith.constant 0 : index
    %c22 = arith.constant 22 : index
    %c0_466 = arith.constant 0 : index
    %752 = vector.load %arg5[%c0_465, %c22, %c0_466] : memref<1x96x128xf32, #tpu.memory_space<vmem>>, vector<1x1x128xf32>
    %753 = vector.shape_cast %752 : vector<1x1x128xf32> to vector<1x128xf32>
    %754 = arith.addf %753, %745 : vector<1x128xf32>
    %c0_467 = arith.constant 0 : index
    %c22_468 = arith.constant 22 : index
    %c0_469 = arith.constant 0 : index
    %755 = vector.load %arg5[%c0_467, %c22_468, %c0_469] : memref<1x96x128xf32, #tpu.memory_space<vmem>>, vector<1x1x128xf32>
    %756 = vector.shape_cast %755 : vector<1x1x128xf32> to vector<1x128xf32>
    %757 = vector.shape_cast %754 : vector<1x128xf32> to vector<1x1x128xf32>
    tpu.vector_store %arg5[%c0_467, %c22_468, %c0_469], %757 {strides = array<i32>} : memref<1x96x128xf32, #tpu.memory_space<vmem>>, vector<1x1x128xf32>,
    %c0_470 = arith.constant 0 : index
    %c54 = arith.constant 54 : index
    %c0_471 = arith.constant 0 : index
    %758 = vector.load %arg5[%c0_470, %c54, %c0_471] : memref<1x96x128xf32, #tpu.memory_space<vmem>>, vector<1x1x128xf32>
    %759 = vector.shape_cast %758 : vector<1x1x128xf32> to vector<1x128xf32>
    %760 = arith.addf %759, %748 : vector<1x128xf32>
    %c0_472 = arith.constant 0 : index
    %c54_473 = arith.constant 54 : index
    %c0_474 = arith.constant 0 : index
    %761 = vector.load %arg5[%c0_472, %c54_473, %c0_474] : memref<1x96x128xf32, #tpu.memory_space<vmem>>, vector<1x1x128xf32>
    %762 = vector.shape_cast %761 : vector<1x1x128xf32> to vector<1x128xf32>
    %763 = vector.shape_cast %760 : vector<1x128xf32> to vector<1x1x128xf32>
    tpu.vector_store %arg5[%c0_472, %c54_473, %c0_474], %763 {strides = array<i32>} : memref<1x96x128xf32, #tpu.memory_space<vmem>>, vector<1x1x128xf32>,
    %c0_475 = arith.constant 0 : index
    %c86 = arith.constant 86 : index
    %c0_476 = arith.constant 0 : index
    %764 = vector.load %arg5[%c0_475, %c86, %c0_476] : memref<1x96x128xf32, #tpu.memory_space<vmem>>, vector<1x1x128xf32>
    %765 = vector.shape_cast %764 : vector<1x1x128xf32> to vector<1x128xf32>
    %766 = arith.addf %765, %751 : vector<1x128xf32>
    %c0_477 = arith.constant 0 : index
    %c86_478 = arith.constant 86 : index
    %c0_479 = arith.constant 0 : index
    %767 = vector.load %arg5[%c0_477, %c86_478, %c0_479] : memref<1x96x128xf32, #tpu.memory_space<vmem>>, vector<1x1x128xf32>
    %768 = vector.shape_cast %767 : vector<1x1x128xf32> to vector<1x128xf32>
    %769 = vector.shape_cast %766 : vector<1x128xf32> to vector<1x1x128xf32>
    tpu.vector_store %arg5[%c0_477, %c86_478, %c0_479], %769 {strides = array<i32>} : memref<1x96x128xf32, #tpu.memory_space<vmem>>, vector<1x1x128xf32>,
    %c23_i32 = arith.constant 23 : i32
    %770 = vector.broadcast %c23_i32 : i32 to vector<16x128xi32>
    %771 = arith.cmpi eq, %55, %770 : vector<16x128xi32>
    %cst_480 = arith.constant 1.000000e+00 : f32
    %cst_481 = arith.constant 0.000000e+00 : f32
    %772 = vector.broadcast %cst_480 : f32 to vector<16x128xf32>
    %773 = vector.broadcast %cst_481 : f32 to vector<16x128xf32>
    %774 = arith.select %771, %772, %773 : vector<16x128xi1>, vector<16x128xf32>
    %cst_482 = arith.constant dense<0.000000e+00> : vector<8x128xf32>
    %775 = tpu.matmul %56, %774, %cst_482 {dimension_numbers = #tpu.dot_dimension_numbers<[1], [0], [0], [1], [0, 0, 1, 1], [], []>} : vector<8x16xf32>, vector<16x128xf32>, vector<8x128xf32> -> vector<8x128xf32>
    %776 = vector.extract_strided_slice %775 {offsets = [0, 0], sizes = [1, 128], strides = [1, 1]} : vector<8x128xf32> to vector<1x128xf32>
    %777 = arith.mulf %774, %45 : vector<16x128xf32>
    %cst_483 = arith.constant dense<0.000000e+00> : vector<8x128xf32>
    %778 = tpu.matmul %56, %777, %cst_483 {dimension_numbers = #tpu.dot_dimension_numbers<[1], [0], [0], [1], [0, 0, 1, 1], [], []>} : vector<8x16xf32>, vector<16x128xf32>, vector<8x128xf32> -> vector<8x128xf32>
    %779 = vector.extract_strided_slice %778 {offsets = [0, 0], sizes = [1, 128], strides = [1, 1]} : vector<8x128xf32> to vector<1x128xf32>
    %780 = arith.mulf %774, %48 : vector<16x128xf32>
    %cst_484 = arith.constant dense<0.000000e+00> : vector<8x128xf32>
    %781 = tpu.matmul %56, %780, %cst_484 {dimension_numbers = #tpu.dot_dimension_numbers<[1], [0], [0], [1], [0, 0, 1, 1], [], []>} : vector<8x16xf32>, vector<16x128xf32>, vector<8x128xf32> -> vector<8x128xf32>
    %782 = vector.extract_strided_slice %781 {offsets = [0, 0], sizes = [1, 128], strides = [1, 1]} : vector<8x128xf32> to vector<1x128xf32>
    %c0_485 = arith.constant 0 : index
    %c23 = arith.constant 23 : index
    %c0_486 = arith.constant 0 : index
    %783 = vector.load %arg5[%c0_485, %c23, %c0_486] : memref<1x96x128xf32, #tpu.memory_space<vmem>>, vector<1x1x128xf32>
    %784 = vector.shape_cast %783 : vector<1x1x128xf32> to vector<1x128xf32>
    %785 = arith.addf %784, %776 : vector<1x128xf32>
    %c0_487 = arith.constant 0 : index
    %c23_488 = arith.constant 23 : index
    %c0_489 = arith.constant 0 : index
    %786 = vector.load %arg5[%c0_487, %c23_488, %c0_489] : memref<1x96x128xf32, #tpu.memory_space<vmem>>, vector<1x1x128xf32>
    %787 = vector.shape_cast %786 : vector<1x1x128xf32> to vector<1x128xf32>
    %788 = vector.shape_cast %785 : vector<1x128xf32> to vector<1x1x128xf32>
    tpu.vector_store %arg5[%c0_487, %c23_488, %c0_489], %788 {strides = array<i32>} : memref<1x96x128xf32, #tpu.memory_space<vmem>>, vector<1x1x128xf32>,
    %c0_490 = arith.constant 0 : index
    %c55 = arith.constant 55 : index
    %c0_491 = arith.constant 0 : index
    %789 = vector.load %arg5[%c0_490, %c55, %c0_491] : memref<1x96x128xf32, #tpu.memory_space<vmem>>, vector<1x1x128xf32>
    %790 = vector.shape_cast %789 : vector<1x1x128xf32> to vector<1x128xf32>
    %791 = arith.addf %790, %779 : vector<1x128xf32>
    %c0_492 = arith.constant 0 : index
    %c55_493 = arith.constant 55 : index
    %c0_494 = arith.constant 0 : index
    %792 = vector.load %arg5[%c0_492, %c55_493, %c0_494] : memref<1x96x128xf32, #tpu.memory_space<vmem>>, vector<1x1x128xf32>
    %793 = vector.shape_cast %792 : vector<1x1x128xf32> to vector<1x128xf32>
    %794 = vector.shape_cast %791 : vector<1x128xf32> to vector<1x1x128xf32>
    tpu.vector_store %arg5[%c0_492, %c55_493, %c0_494], %794 {strides = array<i32>} : memref<1x96x128xf32, #tpu.memory_space<vmem>>, vector<1x1x128xf32>,
    %c0_495 = arith.constant 0 : index
    %c87 = arith.constant 87 : index
    %c0_496 = arith.constant 0 : index
    %795 = vector.load %arg5[%c0_495, %c87, %c0_496] : memref<1x96x128xf32, #tpu.memory_space<vmem>>, vector<1x1x128xf32>
    %796 = vector.shape_cast %795 : vector<1x1x128xf32> to vector<1x128xf32>
    %797 = arith.addf %796, %782 : vector<1x128xf32>
    %c0_497 = arith.constant 0 : index
    %c87_498 = arith.constant 87 : index
    %c0_499 = arith.constant 0 : index
    %798 = vector.load %arg5[%c0_497, %c87_498, %c0_499] : memref<1x96x128xf32, #tpu.memory_space<vmem>>, vector<1x1x128xf32>
    %799 = vector.shape_cast %798 : vector<1x1x128xf32> to vector<1x128xf32>
    %800 = vector.shape_cast %797 : vector<1x128xf32> to vector<1x1x128xf32>
    tpu.vector_store %arg5[%c0_497, %c87_498, %c0_499], %800 {strides = array<i32>} : memref<1x96x128xf32, #tpu.memory_space<vmem>>, vector<1x1x128xf32>,
    %c24_i32 = arith.constant 24 : i32
    %801 = vector.broadcast %c24_i32 : i32 to vector<16x128xi32>
    %802 = arith.cmpi eq, %55, %801 : vector<16x128xi32>
    %cst_500 = arith.constant 1.000000e+00 : f32
    %cst_501 = arith.constant 0.000000e+00 : f32
    %803 = vector.broadcast %cst_500 : f32 to vector<16x128xf32>
    %804 = vector.broadcast %cst_501 : f32 to vector<16x128xf32>
    %805 = arith.select %802, %803, %804 : vector<16x128xi1>, vector<16x128xf32>
    %cst_502 = arith.constant dense<0.000000e+00> : vector<8x128xf32>
    %806 = tpu.matmul %56, %805, %cst_502 {dimension_numbers = #tpu.dot_dimension_numbers<[1], [0], [0], [1], [0, 0, 1, 1], [], []>} : vector<8x16xf32>, vector<16x128xf32>, vector<8x128xf32> -> vector<8x128xf32>
    %807 = vector.extract_strided_slice %806 {offsets = [0, 0], sizes = [1, 128], strides = [1, 1]} : vector<8x128xf32> to vector<1x128xf32>
    %808 = arith.mulf %805, %45 : vector<16x128xf32>
    %cst_503 = arith.constant dense<0.000000e+00> : vector<8x128xf32>
    %809 = tpu.matmul %56, %808, %cst_503 {dimension_numbers = #tpu.dot_dimension_numbers<[1], [0], [0], [1], [0, 0, 1, 1], [], []>} : vector<8x16xf32>, vector<16x128xf32>, vector<8x128xf32> -> vector<8x128xf32>
    %810 = vector.extract_strided_slice %809 {offsets = [0, 0], sizes = [1, 128], strides = [1, 1]} : vector<8x128xf32> to vector<1x128xf32>
    %811 = arith.mulf %805, %48 : vector<16x128xf32>
    %cst_504 = arith.constant dense<0.000000e+00> : vector<8x128xf32>
    %812 = tpu.matmul %56, %811, %cst_504 {dimension_numbers = #tpu.dot_dimension_numbers<[1], [0], [0], [1], [0, 0, 1, 1], [], []>} : vector<8x16xf32>, vector<16x128xf32>, vector<8x128xf32> -> vector<8x128xf32>
    %813 = vector.extract_strided_slice %812 {offsets = [0, 0], sizes = [1, 128], strides = [1, 1]} : vector<8x128xf32> to vector<1x128xf32>
    %c0_505 = arith.constant 0 : index
    %c24 = arith.constant 24 : index
    %c0_506 = arith.constant 0 : index
    %814 = vector.load %arg5[%c0_505, %c24, %c0_506] : memref<1x96x128xf32, #tpu.memory_space<vmem>>, vector<1x1x128xf32>
    %815 = vector.shape_cast %814 : vector<1x1x128xf32> to vector<1x128xf32>
    %816 = arith.addf %815, %807 : vector<1x128xf32>
    %c0_507 = arith.constant 0 : index
    %c24_508 = arith.constant 24 : index
    %c0_509 = arith.constant 0 : index
    %817 = vector.load %arg5[%c0_507, %c24_508, %c0_509] : memref<1x96x128xf32, #tpu.memory_space<vmem>>, vector<1x1x128xf32>
    %818 = vector.shape_cast %817 : vector<1x1x128xf32> to vector<1x128xf32>
    %819 = vector.shape_cast %816 : vector<1x128xf32> to vector<1x1x128xf32>
    tpu.vector_store %arg5[%c0_507, %c24_508, %c0_509], %819 {strides = array<i32>} : memref<1x96x128xf32, #tpu.memory_space<vmem>>, vector<1x1x128xf32>,
    %c0_510 = arith.constant 0 : index
    %c56 = arith.constant 56 : index
    %c0_511 = arith.constant 0 : index
    %820 = vector.load %arg5[%c0_510, %c56, %c0_511] : memref<1x96x128xf32, #tpu.memory_space<vmem>>, vector<1x1x128xf32>
    %821 = vector.shape_cast %820 : vector<1x1x128xf32> to vector<1x128xf32>
    %822 = arith.addf %821, %810 : vector<1x128xf32>
    %c0_512 = arith.constant 0 : index
    %c56_513 = arith.constant 56 : index
    %c0_514 = arith.constant 0 : index
    %823 = vector.load %arg5[%c0_512, %c56_513, %c0_514] : memref<1x96x128xf32, #tpu.memory_space<vmem>>, vector<1x1x128xf32>
    %824 = vector.shape_cast %823 : vector<1x1x128xf32> to vector<1x128xf32>
    %825 = vector.shape_cast %822 : vector<1x128xf32> to vector<1x1x128xf32>
    tpu.vector_store %arg5[%c0_512, %c56_513, %c0_514], %825 {strides = array<i32>} : memref<1x96x128xf32, #tpu.memory_space<vmem>>, vector<1x1x128xf32>,
    %c0_515 = arith.constant 0 : index
    %c88 = arith.constant 88 : index
    %c0_516 = arith.constant 0 : index
    %826 = vector.load %arg5[%c0_515, %c88, %c0_516] : memref<1x96x128xf32, #tpu.memory_space<vmem>>, vector<1x1x128xf32>
    %827 = vector.shape_cast %826 : vector<1x1x128xf32> to vector<1x128xf32>
    %828 = arith.addf %827, %813 : vector<1x128xf32>
    %c0_517 = arith.constant 0 : index
    %c88_518 = arith.constant 88 : index
    %c0_519 = arith.constant 0 : index
    %829 = vector.load %arg5[%c0_517, %c88_518, %c0_519] : memref<1x96x128xf32, #tpu.memory_space<vmem>>, vector<1x1x128xf32>
    %830 = vector.shape_cast %829 : vector<1x1x128xf32> to vector<1x128xf32>
    %831 = vector.shape_cast %828 : vector<1x128xf32> to vector<1x1x128xf32>
    tpu.vector_store %arg5[%c0_517, %c88_518, %c0_519], %831 {strides = array<i32>} : memref<1x96x128xf32, #tpu.memory_space<vmem>>, vector<1x1x128xf32>,
    %c25_i32 = arith.constant 25 : i32
    %832 = vector.broadcast %c25_i32 : i32 to vector<16x128xi32>
    %833 = arith.cmpi eq, %55, %832 : vector<16x128xi32>
    %cst_520 = arith.constant 1.000000e+00 : f32
    %cst_521 = arith.constant 0.000000e+00 : f32
    %834 = vector.broadcast %cst_520 : f32 to vector<16x128xf32>
    %835 = vector.broadcast %cst_521 : f32 to vector<16x128xf32>
    %836 = arith.select %833, %834, %835 : vector<16x128xi1>, vector<16x128xf32>
    %cst_522 = arith.constant dense<0.000000e+00> : vector<8x128xf32>
    %837 = tpu.matmul %56, %836, %cst_522 {dimension_numbers = #tpu.dot_dimension_numbers<[1], [0], [0], [1], [0, 0, 1, 1], [], []>} : vector<8x16xf32>, vector<16x128xf32>, vector<8x128xf32> -> vector<8x128xf32>
    %838 = vector.extract_strided_slice %837 {offsets = [0, 0], sizes = [1, 128], strides = [1, 1]} : vector<8x128xf32> to vector<1x128xf32>
    %839 = arith.mulf %836, %45 : vector<16x128xf32>
    %cst_523 = arith.constant dense<0.000000e+00> : vector<8x128xf32>
    %840 = tpu.matmul %56, %839, %cst_523 {dimension_numbers = #tpu.dot_dimension_numbers<[1], [0], [0], [1], [0, 0, 1, 1], [], []>} : vector<8x16xf32>, vector<16x128xf32>, vector<8x128xf32> -> vector<8x128xf32>
    %841 = vector.extract_strided_slice %840 {offsets = [0, 0], sizes = [1, 128], strides = [1, 1]} : vector<8x128xf32> to vector<1x128xf32>
    %842 = arith.mulf %836, %48 : vector<16x128xf32>
    %cst_524 = arith.constant dense<0.000000e+00> : vector<8x128xf32>
    %843 = tpu.matmul %56, %842, %cst_524 {dimension_numbers = #tpu.dot_dimension_numbers<[1], [0], [0], [1], [0, 0, 1, 1], [], []>} : vector<8x16xf32>, vector<16x128xf32>, vector<8x128xf32> -> vector<8x128xf32>
    %844 = vector.extract_strided_slice %843 {offsets = [0, 0], sizes = [1, 128], strides = [1, 1]} : vector<8x128xf32> to vector<1x128xf32>
    %c0_525 = arith.constant 0 : index
    %c25 = arith.constant 25 : index
    %c0_526 = arith.constant 0 : index
    %845 = vector.load %arg5[%c0_525, %c25, %c0_526] : memref<1x96x128xf32, #tpu.memory_space<vmem>>, vector<1x1x128xf32>
    %846 = vector.shape_cast %845 : vector<1x1x128xf32> to vector<1x128xf32>
    %847 = arith.addf %846, %838 : vector<1x128xf32>
    %c0_527 = arith.constant 0 : index
    %c25_528 = arith.constant 25 : index
    %c0_529 = arith.constant 0 : index
    %848 = vector.load %arg5[%c0_527, %c25_528, %c0_529] : memref<1x96x128xf32, #tpu.memory_space<vmem>>, vector<1x1x128xf32>
    %849 = vector.shape_cast %848 : vector<1x1x128xf32> to vector<1x128xf32>
    %850 = vector.shape_cast %847 : vector<1x128xf32> to vector<1x1x128xf32>
    tpu.vector_store %arg5[%c0_527, %c25_528, %c0_529], %850 {strides = array<i32>} : memref<1x96x128xf32, #tpu.memory_space<vmem>>, vector<1x1x128xf32>,
    %c0_530 = arith.constant 0 : index
    %c57 = arith.constant 57 : index
    %c0_531 = arith.constant 0 : index
    %851 = vector.load %arg5[%c0_530, %c57, %c0_531] : memref<1x96x128xf32, #tpu.memory_space<vmem>>, vector<1x1x128xf32>
    %852 = vector.shape_cast %851 : vector<1x1x128xf32> to vector<1x128xf32>
    %853 = arith.addf %852, %841 : vector<1x128xf32>
    %c0_532 = arith.constant 0 : index
    %c57_533 = arith.constant 57 : index
    %c0_534 = arith.constant 0 : index
    %854 = vector.load %arg5[%c0_532, %c57_533, %c0_534] : memref<1x96x128xf32, #tpu.memory_space<vmem>>, vector<1x1x128xf32>
    %855 = vector.shape_cast %854 : vector<1x1x128xf32> to vector<1x128xf32>
    %856 = vector.shape_cast %853 : vector<1x128xf32> to vector<1x1x128xf32>
    tpu.vector_store %arg5[%c0_532, %c57_533, %c0_534], %856 {strides = array<i32>} : memref<1x96x128xf32, #tpu.memory_space<vmem>>, vector<1x1x128xf32>,
    %c0_535 = arith.constant 0 : index
    %c89 = arith.constant 89 : index
    %c0_536 = arith.constant 0 : index
    %857 = vector.load %arg5[%c0_535, %c89, %c0_536] : memref<1x96x128xf32, #tpu.memory_space<vmem>>, vector<1x1x128xf32>
    %858 = vector.shape_cast %857 : vector<1x1x128xf32> to vector<1x128xf32>
    %859 = arith.addf %858, %844 : vector<1x128xf32>
    %c0_537 = arith.constant 0 : index
    %c89_538 = arith.constant 89 : index
    %c0_539 = arith.constant 0 : index
    %860 = vector.load %arg5[%c0_537, %c89_538, %c0_539] : memref<1x96x128xf32, #tpu.memory_space<vmem>>, vector<1x1x128xf32>
    %861 = vector.shape_cast %860 : vector<1x1x128xf32> to vector<1x128xf32>
    %862 = vector.shape_cast %859 : vector<1x128xf32> to vector<1x1x128xf32>
    tpu.vector_store %arg5[%c0_537, %c89_538, %c0_539], %862 {strides = array<i32>} : memref<1x96x128xf32, #tpu.memory_space<vmem>>, vector<1x1x128xf32>,
    %c26_i32 = arith.constant 26 : i32
    %863 = vector.broadcast %c26_i32 : i32 to vector<16x128xi32>
    %864 = arith.cmpi eq, %55, %863 : vector<16x128xi32>
    %cst_540 = arith.constant 1.000000e+00 : f32
    %cst_541 = arith.constant 0.000000e+00 : f32
    %865 = vector.broadcast %cst_540 : f32 to vector<16x128xf32>
    %866 = vector.broadcast %cst_541 : f32 to vector<16x128xf32>
    %867 = arith.select %864, %865, %866 : vector<16x128xi1>, vector<16x128xf32>
    %cst_542 = arith.constant dense<0.000000e+00> : vector<8x128xf32>
    %868 = tpu.matmul %56, %867, %cst_542 {dimension_numbers = #tpu.dot_dimension_numbers<[1], [0], [0], [1], [0, 0, 1, 1], [], []>} : vector<8x16xf32>, vector<16x128xf32>, vector<8x128xf32> -> vector<8x128xf32>
    %869 = vector.extract_strided_slice %868 {offsets = [0, 0], sizes = [1, 128], strides = [1, 1]} : vector<8x128xf32> to vector<1x128xf32>
    %870 = arith.mulf %867, %45 : vector<16x128xf32>
    %cst_543 = arith.constant dense<0.000000e+00> : vector<8x128xf32>
    %871 = tpu.matmul %56, %870, %cst_543 {dimension_numbers = #tpu.dot_dimension_numbers<[1], [0], [0], [1], [0, 0, 1, 1], [], []>} : vector<8x16xf32>, vector<16x128xf32>, vector<8x128xf32> -> vector<8x128xf32>
    %872 = vector.extract_strided_slice %871 {offsets = [0, 0], sizes = [1, 128], strides = [1, 1]} : vector<8x128xf32> to vector<1x128xf32>
    %873 = arith.mulf %867, %48 : vector<16x128xf32>
    %cst_544 = arith.constant dense<0.000000e+00> : vector<8x128xf32>
    %874 = tpu.matmul %56, %873, %cst_544 {dimension_numbers = #tpu.dot_dimension_numbers<[1], [0], [0], [1], [0, 0, 1, 1], [], []>} : vector<8x16xf32>, vector<16x128xf32>, vector<8x128xf32> -> vector<8x128xf32>
    %875 = vector.extract_strided_slice %874 {offsets = [0, 0], sizes = [1, 128], strides = [1, 1]} : vector<8x128xf32> to vector<1x128xf32>
    %c0_545 = arith.constant 0 : index
    %c26 = arith.constant 26 : index
    %c0_546 = arith.constant 0 : index
    %876 = vector.load %arg5[%c0_545, %c26, %c0_546] : memref<1x96x128xf32, #tpu.memory_space<vmem>>, vector<1x1x128xf32>
    %877 = vector.shape_cast %876 : vector<1x1x128xf32> to vector<1x128xf32>
    %878 = arith.addf %877, %869 : vector<1x128xf32>
    %c0_547 = arith.constant 0 : index
    %c26_548 = arith.constant 26 : index
    %c0_549 = arith.constant 0 : index
    %879 = vector.load %arg5[%c0_547, %c26_548, %c0_549] : memref<1x96x128xf32, #tpu.memory_space<vmem>>, vector<1x1x128xf32>
    %880 = vector.shape_cast %879 : vector<1x1x128xf32> to vector<1x128xf32>
    %881 = vector.shape_cast %878 : vector<1x128xf32> to vector<1x1x128xf32>
    tpu.vector_store %arg5[%c0_547, %c26_548, %c0_549], %881 {strides = array<i32>} : memref<1x96x128xf32, #tpu.memory_space<vmem>>, vector<1x1x128xf32>,
    %c0_550 = arith.constant 0 : index
    %c58 = arith.constant 58 : index
    %c0_551 = arith.constant 0 : index
    %882 = vector.load %arg5[%c0_550, %c58, %c0_551] : memref<1x96x128xf32, #tpu.memory_space<vmem>>, vector<1x1x128xf32>
    %883 = vector.shape_cast %882 : vector<1x1x128xf32> to vector<1x128xf32>
    %884 = arith.addf %883, %872 : vector<1x128xf32>
    %c0_552 = arith.constant 0 : index
    %c58_553 = arith.constant 58 : index
    %c0_554 = arith.constant 0 : index
    %885 = vector.load %arg5[%c0_552, %c58_553, %c0_554] : memref<1x96x128xf32, #tpu.memory_space<vmem>>, vector<1x1x128xf32>
    %886 = vector.shape_cast %885 : vector<1x1x128xf32> to vector<1x128xf32>
    %887 = vector.shape_cast %884 : vector<1x128xf32> to vector<1x1x128xf32>
    tpu.vector_store %arg5[%c0_552, %c58_553, %c0_554], %887 {strides = array<i32>} : memref<1x96x128xf32, #tpu.memory_space<vmem>>, vector<1x1x128xf32>,
    %c0_555 = arith.constant 0 : index
    %c90 = arith.constant 90 : index
    %c0_556 = arith.constant 0 : index
    %888 = vector.load %arg5[%c0_555, %c90, %c0_556] : memref<1x96x128xf32, #tpu.memory_space<vmem>>, vector<1x1x128xf32>
    %889 = vector.shape_cast %888 : vector<1x1x128xf32> to vector<1x128xf32>
    %890 = arith.addf %889, %875 : vector<1x128xf32>
    %c0_557 = arith.constant 0 : index
    %c90_558 = arith.constant 90 : index
    %c0_559 = arith.constant 0 : index
    %891 = vector.load %arg5[%c0_557, %c90_558, %c0_559] : memref<1x96x128xf32, #tpu.memory_space<vmem>>, vector<1x1x128xf32>
    %892 = vector.shape_cast %891 : vector<1x1x128xf32> to vector<1x128xf32>
    %893 = vector.shape_cast %890 : vector<1x128xf32> to vector<1x1x128xf32>
    tpu.vector_store %arg5[%c0_557, %c90_558, %c0_559], %893 {strides = array<i32>} : memref<1x96x128xf32, #tpu.memory_space<vmem>>, vector<1x1x128xf32>,
    %c27_i32 = arith.constant 27 : i32
    %894 = vector.broadcast %c27_i32 : i32 to vector<16x128xi32>
    %895 = arith.cmpi eq, %55, %894 : vector<16x128xi32>
    %cst_560 = arith.constant 1.000000e+00 : f32
    %cst_561 = arith.constant 0.000000e+00 : f32
    %896 = vector.broadcast %cst_560 : f32 to vector<16x128xf32>
    %897 = vector.broadcast %cst_561 : f32 to vector<16x128xf32>
    %898 = arith.select %895, %896, %897 : vector<16x128xi1>, vector<16x128xf32>
    %cst_562 = arith.constant dense<0.000000e+00> : vector<8x128xf32>
    %899 = tpu.matmul %56, %898, %cst_562 {dimension_numbers = #tpu.dot_dimension_numbers<[1], [0], [0], [1], [0, 0, 1, 1], [], []>} : vector<8x16xf32>, vector<16x128xf32>, vector<8x128xf32> -> vector<8x128xf32>
    %900 = vector.extract_strided_slice %899 {offsets = [0, 0], sizes = [1, 128], strides = [1, 1]} : vector<8x128xf32> to vector<1x128xf32>
    %901 = arith.mulf %898, %45 : vector<16x128xf32>
    %cst_563 = arith.constant dense<0.000000e+00> : vector<8x128xf32>
    %902 = tpu.matmul %56, %901, %cst_563 {dimension_numbers = #tpu.dot_dimension_numbers<[1], [0], [0], [1], [0, 0, 1, 1], [], []>} : vector<8x16xf32>, vector<16x128xf32>, vector<8x128xf32> -> vector<8x128xf32>
    %903 = vector.extract_strided_slice %902 {offsets = [0, 0], sizes = [1, 128], strides = [1, 1]} : vector<8x128xf32> to vector<1x128xf32>
    %904 = arith.mulf %898, %48 : vector<16x128xf32>
    %cst_564 = arith.constant dense<0.000000e+00> : vector<8x128xf32>
    %905 = tpu.matmul %56, %904, %cst_564 {dimension_numbers = #tpu.dot_dimension_numbers<[1], [0], [0], [1], [0, 0, 1, 1], [], []>} : vector<8x16xf32>, vector<16x128xf32>, vector<8x128xf32> -> vector<8x128xf32>
    %906 = vector.extract_strided_slice %905 {offsets = [0, 0], sizes = [1, 128], strides = [1, 1]} : vector<8x128xf32> to vector<1x128xf32>
    %c0_565 = arith.constant 0 : index
    %c27 = arith.constant 27 : index
    %c0_566 = arith.constant 0 : index
    %907 = vector.load %arg5[%c0_565, %c27, %c0_566] : memref<1x96x128xf32, #tpu.memory_space<vmem>>, vector<1x1x128xf32>
    %908 = vector.shape_cast %907 : vector<1x1x128xf32> to vector<1x128xf32>
    %909 = arith.addf %908, %900 : vector<1x128xf32>
    %c0_567 = arith.constant 0 : index
    %c27_568 = arith.constant 27 : index
    %c0_569 = arith.constant 0 : index
    %910 = vector.load %arg5[%c0_567, %c27_568, %c0_569] : memref<1x96x128xf32, #tpu.memory_space<vmem>>, vector<1x1x128xf32>
    %911 = vector.shape_cast %910 : vector<1x1x128xf32> to vector<1x128xf32>
    %912 = vector.shape_cast %909 : vector<1x128xf32> to vector<1x1x128xf32>
    tpu.vector_store %arg5[%c0_567, %c27_568, %c0_569], %912 {strides = array<i32>} : memref<1x96x128xf32, #tpu.memory_space<vmem>>, vector<1x1x128xf32>,
    %c0_570 = arith.constant 0 : index
    %c59 = arith.constant 59 : index
    %c0_571 = arith.constant 0 : index
    %913 = vector.load %arg5[%c0_570, %c59, %c0_571] : memref<1x96x128xf32, #tpu.memory_space<vmem>>, vector<1x1x128xf32>
    %914 = vector.shape_cast %913 : vector<1x1x128xf32> to vector<1x128xf32>
    %915 = arith.addf %914, %903 : vector<1x128xf32>
    %c0_572 = arith.constant 0 : index
    %c59_573 = arith.constant 59 : index
    %c0_574 = arith.constant 0 : index
    %916 = vector.load %arg5[%c0_572, %c59_573, %c0_574] : memref<1x96x128xf32, #tpu.memory_space<vmem>>, vector<1x1x128xf32>
    %917 = vector.shape_cast %916 : vector<1x1x128xf32> to vector<1x128xf32>
    %918 = vector.shape_cast %915 : vector<1x128xf32> to vector<1x1x128xf32>
    tpu.vector_store %arg5[%c0_572, %c59_573, %c0_574], %918 {strides = array<i32>} : memref<1x96x128xf32, #tpu.memory_space<vmem>>, vector<1x1x128xf32>,
    %c0_575 = arith.constant 0 : index
    %c91 = arith.constant 91 : index
    %c0_576 = arith.constant 0 : index
    %919 = vector.load %arg5[%c0_575, %c91, %c0_576] : memref<1x96x128xf32, #tpu.memory_space<vmem>>, vector<1x1x128xf32>
    %920 = vector.shape_cast %919 : vector<1x1x128xf32> to vector<1x128xf32>
    %921 = arith.addf %920, %906 : vector<1x128xf32>
    %c0_577 = arith.constant 0 : index
    %c91_578 = arith.constant 91 : index
    %c0_579 = arith.constant 0 : index
    %922 = vector.load %arg5[%c0_577, %c91_578, %c0_579] : memref<1x96x128xf32, #tpu.memory_space<vmem>>, vector<1x1x128xf32>
    %923 = vector.shape_cast %922 : vector<1x1x128xf32> to vector<1x128xf32>
    %924 = vector.shape_cast %921 : vector<1x128xf32> to vector<1x1x128xf32>
    tpu.vector_store %arg5[%c0_577, %c91_578, %c0_579], %924 {strides = array<i32>} : memref<1x96x128xf32, #tpu.memory_space<vmem>>, vector<1x1x128xf32>,
    %c28_i32 = arith.constant 28 : i32
    %925 = vector.broadcast %c28_i32 : i32 to vector<16x128xi32>
    %926 = arith.cmpi eq, %55, %925 : vector<16x128xi32>
    %cst_580 = arith.constant 1.000000e+00 : f32
    %cst_581 = arith.constant 0.000000e+00 : f32
    %927 = vector.broadcast %cst_580 : f32 to vector<16x128xf32>
    %928 = vector.broadcast %cst_581 : f32 to vector<16x128xf32>
    %929 = arith.select %926, %927, %928 : vector<16x128xi1>, vector<16x128xf32>
    %cst_582 = arith.constant dense<0.000000e+00> : vector<8x128xf32>
    %930 = tpu.matmul %56, %929, %cst_582 {dimension_numbers = #tpu.dot_dimension_numbers<[1], [0], [0], [1], [0, 0, 1, 1], [], []>} : vector<8x16xf32>, vector<16x128xf32>, vector<8x128xf32> -> vector<8x128xf32>
    %931 = vector.extract_strided_slice %930 {offsets = [0, 0], sizes = [1, 128], strides = [1, 1]} : vector<8x128xf32> to vector<1x128xf32>
    %932 = arith.mulf %929, %45 : vector<16x128xf32>
    %cst_583 = arith.constant dense<0.000000e+00> : vector<8x128xf32>
    %933 = tpu.matmul %56, %932, %cst_583 {dimension_numbers = #tpu.dot_dimension_numbers<[1], [0], [0], [1], [0, 0, 1, 1], [], []>} : vector<8x16xf32>, vector<16x128xf32>, vector<8x128xf32> -> vector<8x128xf32>
    %934 = vector.extract_strided_slice %933 {offsets = [0, 0], sizes = [1, 128], strides = [1, 1]} : vector<8x128xf32> to vector<1x128xf32>
    %935 = arith.mulf %929, %48 : vector<16x128xf32>
    %cst_584 = arith.constant dense<0.000000e+00> : vector<8x128xf32>
    %936 = tpu.matmul %56, %935, %cst_584 {dimension_numbers = #tpu.dot_dimension_numbers<[1], [0], [0], [1], [0, 0, 1, 1], [], []>} : vector<8x16xf32>, vector<16x128xf32>, vector<8x128xf32> -> vector<8x128xf32>
    %937 = vector.extract_strided_slice %936 {offsets = [0, 0], sizes = [1, 128], strides = [1, 1]} : vector<8x128xf32> to vector<1x128xf32>
    %c0_585 = arith.constant 0 : index
    %c28 = arith.constant 28 : index
    %c0_586 = arith.constant 0 : index
    %938 = vector.load %arg5[%c0_585, %c28, %c0_586] : memref<1x96x128xf32, #tpu.memory_space<vmem>>, vector<1x1x128xf32>
    %939 = vector.shape_cast %938 : vector<1x1x128xf32> to vector<1x128xf32>
    %940 = arith.addf %939, %931 : vector<1x128xf32>
    %c0_587 = arith.constant 0 : index
    %c28_588 = arith.constant 28 : index
    %c0_589 = arith.constant 0 : index
    %941 = vector.load %arg5[%c0_587, %c28_588, %c0_589] : memref<1x96x128xf32, #tpu.memory_space<vmem>>, vector<1x1x128xf32>
    %942 = vector.shape_cast %941 : vector<1x1x128xf32> to vector<1x128xf32>
    %943 = vector.shape_cast %940 : vector<1x128xf32> to vector<1x1x128xf32>
    tpu.vector_store %arg5[%c0_587, %c28_588, %c0_589], %943 {strides = array<i32>} : memref<1x96x128xf32, #tpu.memory_space<vmem>>, vector<1x1x128xf32>,
    %c0_590 = arith.constant 0 : index
    %c60 = arith.constant 60 : index
    %c0_591 = arith.constant 0 : index
    %944 = vector.load %arg5[%c0_590, %c60, %c0_591] : memref<1x96x128xf32, #tpu.memory_space<vmem>>, vector<1x1x128xf32>
    %945 = vector.shape_cast %944 : vector<1x1x128xf32> to vector<1x128xf32>
    %946 = arith.addf %945, %934 : vector<1x128xf32>
    %c0_592 = arith.constant 0 : index
    %c60_593 = arith.constant 60 : index
    %c0_594 = arith.constant 0 : index
    %947 = vector.load %arg5[%c0_592, %c60_593, %c0_594] : memref<1x96x128xf32, #tpu.memory_space<vmem>>, vector<1x1x128xf32>
    %948 = vector.shape_cast %947 : vector<1x1x128xf32> to vector<1x128xf32>
    %949 = vector.shape_cast %946 : vector<1x128xf32> to vector<1x1x128xf32>
    tpu.vector_store %arg5[%c0_592, %c60_593, %c0_594], %949 {strides = array<i32>} : memref<1x96x128xf32, #tpu.memory_space<vmem>>, vector<1x1x128xf32>,
    %c0_595 = arith.constant 0 : index
    %c92 = arith.constant 92 : index
    %c0_596 = arith.constant 0 : index
    %950 = vector.load %arg5[%c0_595, %c92, %c0_596] : memref<1x96x128xf32, #tpu.memory_space<vmem>>, vector<1x1x128xf32>
    %951 = vector.shape_cast %950 : vector<1x1x128xf32> to vector<1x128xf32>
    %952 = arith.addf %951, %937 : vector<1x128xf32>
    %c0_597 = arith.constant 0 : index
    %c92_598 = arith.constant 92 : index
    %c0_599 = arith.constant 0 : index
    %953 = vector.load %arg5[%c0_597, %c92_598, %c0_599] : memref<1x96x128xf32, #tpu.memory_space<vmem>>, vector<1x1x128xf32>
    %954 = vector.shape_cast %953 : vector<1x1x128xf32> to vector<1x128xf32>
    %955 = vector.shape_cast %952 : vector<1x128xf32> to vector<1x1x128xf32>
    tpu.vector_store %arg5[%c0_597, %c92_598, %c0_599], %955 {strides = array<i32>} : memref<1x96x128xf32, #tpu.memory_space<vmem>>, vector<1x1x128xf32>,
    %c29_i32 = arith.constant 29 : i32
    %956 = vector.broadcast %c29_i32 : i32 to vector<16x128xi32>
    %957 = arith.cmpi eq, %55, %956 : vector<16x128xi32>
    %cst_600 = arith.constant 1.000000e+00 : f32
    %cst_601 = arith.constant 0.000000e+00 : f32
    %958 = vector.broadcast %cst_600 : f32 to vector<16x128xf32>
    %959 = vector.broadcast %cst_601 : f32 to vector<16x128xf32>
    %960 = arith.select %957, %958, %959 : vector<16x128xi1>, vector<16x128xf32>
    %cst_602 = arith.constant dense<0.000000e+00> : vector<8x128xf32>
    %961 = tpu.matmul %56, %960, %cst_602 {dimension_numbers = #tpu.dot_dimension_numbers<[1], [0], [0], [1], [0, 0, 1, 1], [], []>} : vector<8x16xf32>, vector<16x128xf32>, vector<8x128xf32> -> vector<8x128xf32>
    %962 = vector.extract_strided_slice %961 {offsets = [0, 0], sizes = [1, 128], strides = [1, 1]} : vector<8x128xf32> to vector<1x128xf32>
    %963 = arith.mulf %960, %45 : vector<16x128xf32>
    %cst_603 = arith.constant dense<0.000000e+00> : vector<8x128xf32>
    %964 = tpu.matmul %56, %963, %cst_603 {dimension_numbers = #tpu.dot_dimension_numbers<[1], [0], [0], [1], [0, 0, 1, 1], [], []>} : vector<8x16xf32>, vector<16x128xf32>, vector<8x128xf32> -> vector<8x128xf32>
    %965 = vector.extract_strided_slice %964 {offsets = [0, 0], sizes = [1, 128], strides = [1, 1]} : vector<8x128xf32> to vector<1x128xf32>
    %966 = arith.mulf %960, %48 : vector<16x128xf32>
    %cst_604 = arith.constant dense<0.000000e+00> : vector<8x128xf32>
    %967 = tpu.matmul %56, %966, %cst_604 {dimension_numbers = #tpu.dot_dimension_numbers<[1], [0], [0], [1], [0, 0, 1, 1], [], []>} : vector<8x16xf32>, vector<16x128xf32>, vector<8x128xf32> -> vector<8x128xf32>
    %968 = vector.extract_strided_slice %967 {offsets = [0, 0], sizes = [1, 128], strides = [1, 1]} : vector<8x128xf32> to vector<1x128xf32>
    %c0_605 = arith.constant 0 : index
    %c29 = arith.constant 29 : index
    %c0_606 = arith.constant 0 : index
    %969 = vector.load %arg5[%c0_605, %c29, %c0_606] : memref<1x96x128xf32, #tpu.memory_space<vmem>>, vector<1x1x128xf32>
    %970 = vector.shape_cast %969 : vector<1x1x128xf32> to vector<1x128xf32>
    %971 = arith.addf %970, %962 : vector<1x128xf32>
    %c0_607 = arith.constant 0 : index
    %c29_608 = arith.constant 29 : index
    %c0_609 = arith.constant 0 : index
    %972 = vector.load %arg5[%c0_607, %c29_608, %c0_609] : memref<1x96x128xf32, #tpu.memory_space<vmem>>, vector<1x1x128xf32>
    %973 = vector.shape_cast %972 : vector<1x1x128xf32> to vector<1x128xf32>
    %974 = vector.shape_cast %971 : vector<1x128xf32> to vector<1x1x128xf32>
    tpu.vector_store %arg5[%c0_607, %c29_608, %c0_609], %974 {strides = array<i32>} : memref<1x96x128xf32, #tpu.memory_space<vmem>>, vector<1x1x128xf32>,
    %c0_610 = arith.constant 0 : index
    %c61 = arith.constant 61 : index
    %c0_611 = arith.constant 0 : index
    %975 = vector.load %arg5[%c0_610, %c61, %c0_611] : memref<1x96x128xf32, #tpu.memory_space<vmem>>, vector<1x1x128xf32>
    %976 = vector.shape_cast %975 : vector<1x1x128xf32> to vector<1x128xf32>
    %977 = arith.addf %976, %965 : vector<1x128xf32>
    %c0_612 = arith.constant 0 : index
    %c61_613 = arith.constant 61 : index
    %c0_614 = arith.constant 0 : index
    %978 = vector.load %arg5[%c0_612, %c61_613, %c0_614] : memref<1x96x128xf32, #tpu.memory_space<vmem>>, vector<1x1x128xf32>
    %979 = vector.shape_cast %978 : vector<1x1x128xf32> to vector<1x128xf32>
    %980 = vector.shape_cast %977 : vector<1x128xf32> to vector<1x1x128xf32>
    tpu.vector_store %arg5[%c0_612, %c61_613, %c0_614], %980 {strides = array<i32>} : memref<1x96x128xf32, #tpu.memory_space<vmem>>, vector<1x1x128xf32>,
    %c0_615 = arith.constant 0 : index
    %c93 = arith.constant 93 : index
    %c0_616 = arith.constant 0 : index
    %981 = vector.load %arg5[%c0_615, %c93, %c0_616] : memref<1x96x128xf32, #tpu.memory_space<vmem>>, vector<1x1x128xf32>
    %982 = vector.shape_cast %981 : vector<1x1x128xf32> to vector<1x128xf32>
    %983 = arith.addf %982, %968 : vector<1x128xf32>
    %c0_617 = arith.constant 0 : index
    %c93_618 = arith.constant 93 : index
    %c0_619 = arith.constant 0 : index
    %984 = vector.load %arg5[%c0_617, %c93_618, %c0_619] : memref<1x96x128xf32, #tpu.memory_space<vmem>>, vector<1x1x128xf32>
    %985 = vector.shape_cast %984 : vector<1x1x128xf32> to vector<1x128xf32>
    %986 = vector.shape_cast %983 : vector<1x128xf32> to vector<1x1x128xf32>
    tpu.vector_store %arg5[%c0_617, %c93_618, %c0_619], %986 {strides = array<i32>} : memref<1x96x128xf32, #tpu.memory_space<vmem>>, vector<1x1x128xf32>,
    return
  }
  func.func @transform_0(%arg0: i32, %arg1: i32) -> i32 {
    %c0_i32 = arith.constant 0 : i32
    %c0_i32_0 = arith.constant 0 : i32
    return %c0_i32 : i32
  }
  func.func @transform_1(%arg0: i32, %arg1: i32) -> (i32, i32) {
    %c1_i32 = arith.constant 1 : i32
    %0 = arith.muli %arg0, %c1_i32 : i32
    %1 = arith.addi %0, %arg1 : i32
    %c0_i32 = arith.constant 0 : i32
    %c0_i32_0 = arith.constant 0 : i32
    return %1, %c0_i32 : i32, i32
  }
  func.func @transform_2(%arg0: i32, %arg1: i32) -> (i32, i32) {
    %c1_i32 = arith.constant 1 : i32
    %0 = arith.muli %arg0, %c1_i32 : i32
    %1 = arith.addi %0, %arg1 : i32
    %c0_i32 = arith.constant 0 : i32
    %c0_i32_0 = arith.constant 0 : i32
    return %1, %c0_i32 : i32, i32
  }
  func.func @transform_3(%arg0: i32, %arg1: i32) -> (i32, i32, i32) {
    %c0_i32 = arith.constant 0 : i32
    %c0_i32_0 = arith.constant 0 : i32
    %c0_i32_1 = arith.constant 0 : i32
    return %arg0, %c0_i32, %c0_i32_0 : i32, i32, i32
  }
}

</mosaic_0001>

<bundles_post_ra>
// kernel: _ghm_forward.1
= control target key start
LH: loop header
LB: loop body
LE: loop exit
PB: predicated region body
PF: predicated region fallthrough
CT: control target
= control target key end

     0   :  { %v81_v13 = vlaneseq  ;;  %s4024_s1 = inlined_call_operand.vmem [shape: f32[16,128], index: 1, kind: input, shape index: {}]   ;;  %s4025_s2 = inlined_call_operand.vmem [shape: f32[16,128], index: 2, kind: input, shape index: {}]   ;;  %s4026_s0 = inlined_call_operand.<no memory space> [shape: s32[1], index: 0, kind: input, shape index: {}]   ;;  %s4027_s3 = inlined_call_operand.vmem [shape: f32[1,96,128], index: 3, kind: output, shape index: {}]  }
   0x1   :  { %v2709_v0 = vld [vmem:[%s4024_s1 + $0x8] sm:$0xff]  ;;  %v2714_v1 = vld [vmem:[%s4024_s1] sm:$0xff]  ;;  %v94_v63 = vstv %s4026_s0 }
   0x2   :  { %v98_v2 = vand.u32 2147483647, %v2709_v0  ;;  %v97_v3 = vand.u32 2147483647, %v2714_v1  ;;  %v2724_v20 = vshrl.u32 %v81_v13, 7  ;;  %vm138_vm6 = vcmp.ge.f32.partialorder %v2709_v0, 0.0 }
   0x3   :  { %v78_v33 = vld [vmem:[%s4025_s2 + $0x8] sm:$0xff]  ;;  %vm137_vm9 = vcmp.ge.f32.partialorder %v2714_v1, 0.0  ;;  %v85_v40 = vand.u32 127, %v81_v13  ;;  %v77_v43 = vld [vmem:[%s4025_s2] sm:$0xff]  ;;  %v158_v49 = vmax.f32 %v2709_v0, 0.0  ;;  %v157_v61 = vmax.f32 %v2714_v1, 0.0 }
   0x4   :  { %v100_v4 = vsub.f32 0.0, %v98_v2  ;;  %v99_v5 = vsub.f32 0.0, %v97_v3  ;;  %v83_v28 = vadd.s32 8, %v2724_v20  ;;  %v160_v50 = vmul.f32 %v78_v33, %v2709_v0 }
   0x5   :  { %v89_v58 = vmul.u32 128, %v2724_v20  ;;  %v159_v62 = vmul.f32 %v77_v43, %v2714_v1 }
   0x6   :  { %v103_v6 = vmul.f32 1.442695, %v100_v4  ;;  %v101_v7 = vmul.f32 1.442695, %v99_v5  ;;  %v90_v41 = vmul.u32 128, %v83_v28  ;;  %v162_v0 = vsub.f32 %v158_v49, %v160_v50 }
   0x7   :  { %v161_v1 = vsub.f32 %v157_v61, %v159_v62 }
   0x8   :  { %2671 = vpow2.f32 %v103_v6  ;;  %v92_v53 = vadd.s32 %v90_v41, %v85_v40 }
   0x9   :  { %2673 = vpow2.f32 %v101_v7 }
   0xa   :  { %vm96_vm13 = vcmp.lt.s32.totalorder %v92_v53, %v94_v63 }
   0xe   :  { %v2718_v8 = vpop.eup %2671 }
   0xf   :  { %v2720_v9 = vpop.eup %2673  ;;  %v106_v10 = vadd.f32 1.0, %v2718_v8  ;;  %v150_v35 = vmul.f32 0.5, %v2718_v8  ;;  %vm144_vm10 = vcmp.gt.f32.partialorder %v2718_v8, 0.0001 }
  0x10   :  { %v105_v11 = vadd.f32 1.0, %v2720_v9  ;;  %v149_v39 = vmul.f32 0.5, %v2720_v9  ;;  %vm143_vm12 = vcmp.gt.f32.partialorder %v2720_v9, 0.0001 }
  0x11   :  { %2675 = vrcp.f32 %v106_v10  ;;  %v133_v15 = vand.u32 2147483648, %v106_v10  ;;  %vm127_vm0 = vweird.f32 %v106_v10  ;;  %v131_v18 = vand.u32 2147483647, %v106_v10 }
  0x12   :  { %2677 = vrcp.f32 %v105_v11  ;;  %vm112_vm2 = vweird.f32 %v105_v11  ;;  %v118_v22 = vand.u32 2147483648, %v105_v11  ;;  %v116_v25 = vand.u32 2147483647, %v105_v11 }
  0x13   :  { %v134_v23 = vor.u32 1.1754944e-38, %v133_v15  ;;  %vm132_vm5 = vcmp.eq.f32.partialorder %v131_v18, 8.507059e+37  ;;  %2679 = vlog2.f32 %v106_v10  ;;  %v152_v45 = vsub.f32 1.0, %v150_v35 }
  0x14   :  { %v119_v30 = vor.u32 1.1754944e-38, %v118_v22  ;;  %vm117_vm8 = vcmp.eq.f32.partialorder %v116_v25, 8.507059e+37  ;;  %2681 = vlog2.f32 %v105_v11  ;;  %v151_v51 = vsub.f32 1.0, %v149_v39 }
  0x15   :  { %v154_v57 = vmul.f32 %v2718_v8, %v152_v45  ;;  %v2684_v18 = vmov 0.0   ;;  %v2685_v22 = vmov 1.0  }
  0x16   :  { %v153_v2 = vmul.f32 %v2720_v9, %v151_v51  ;;  %63 = vst [vmem:[%s4027_s3] sm:$0xff] %v2684_v18 }
  0x17   :  { %v2676_v12 = vpop.eup %2675  ;;  %64 = vst [vmem:[%s4027_s3 + $0x8] sm:$0xff] %v2684_v18 }
  0x18   :  { %v123_v14 = vmul.f32 %v2676_v12, %v106_v10  ;;  %v2678_v16 = vpop.eup %2677  ;;  %vm128_vm1 = vweird.f32 %v2676_v12  ;;  %v91_v10 = vadd.s32 %v89_v58, %v85_v40  ;;  %65 = vst [vmem:[%s4027_s3 + $0x10] sm:$0xff] %v2684_v18 }
  0x19   :  { %v108_v19 = vmul.f32 %v2678_v16, %v105_v11  ;;  %vm129_vm3 = vmor %vm127_vm0, %vm128_vm1  ;;  %vm113_vm4 = vweird.f32 %v2678_v16  ;;  %v2680_v46 = vpop.eup %2679  ;;  %vm183_vm0 = vcmask 130048   ;;  %66 = vst [vmem:[%s4027_s3 + $0x18] sm:$0xff] %v2684_v18 }
  0x1a   :  { %v124_v17 = vsub.f32 1.0, %v123_v14  ;;  %vm114_vm7 = vmor %vm112_vm2, %vm113_vm4  ;;  %v2682_v55 = vpop.eup %2681  ;;  %v148_v56 = vmul.f32 0.6931472, %v2680_v46  ;;  %vm2761_vm15 = vcmp.lt.s32.totalorder %v91_v10, %v94_v63  ;;  %67 = vst [vmem:[%s4027_s3 + $0x20] sm:$0xff] %v2684_v18 }
  0x1b   :  { %v109_v24 = vsub.f32 1.0, %v108_v19  ;;  %v146_v6 = vmul.f32 0.6931472, %v2682_v55  ;;  %68 = vst [vmem:[%s4027_s3 + $0x28] sm:$0xff] %v2684_v18 }
  0x1c   :  { %v125_v21 = vmul.f32 %v2676_v12, %v124_v17  ;;  %v156_v7 = vsel %vm144_vm10, %v148_v56, %v154_v57  ;;  %69 = vst [vmem:[%s4027_s3 + $0x30] sm:$0xff] %v2684_v18 }
  0x1d   :  { %v110_v27 = vmul.f32 %v2678_v16, %v109_v24  ;;  %v2751_v15 = vadd.f32 %v162_v0, %v156_v7  ;;  %v155_v17 = vsel %vm143_vm12, %v146_v6, %v153_v2  ;;  %70 = vst [vmem:[%s4027_s3 + $0x38] sm:$0xff] %v2684_v18 }
  0x1e   :  { %v126_v26 = vadd.f32 %v2676_v12, %v125_v21  ;;  %v2778_v24 = vadd.f32 %v161_v1, %v155_v17  ;;  %71 = vst [vmem:[%s4027_s3 + $0x40] sm:$0xff] %v2684_v18 }
  0x1f   :  { %v111_v32 = vadd.f32 %v2678_v16, %v110_v27  ;;  %72 = vst [vmem:[%s4027_s3 + $0x48] sm:$0xff] %v2684_v18 }
  0x20   :  { %v130_v29 = vsel %vm129_vm3, %v2676_v12, %v126_v26  ;;  %73 = vst [vmem:[%s4027_s3 + $0x50] sm:$0xff] %v2684_v18 }
  0x21   :  { %v135_v31 = vsel %vm132_vm5, %v134_v23, %v130_v29  ;;  %v115_v36 = vsel %vm114_vm7, %v2678_v16, %v111_v32  ;;  %74 = vst [vmem:[%s4027_s3 + $0x58] sm:$0xff] %v2684_v18 }
  0x22   :  { %v140_v34 = vmul.f32 %v2718_v8, %v135_v31  ;;  %v120_v38 = vsel %vm117_vm8, %v119_v30, %v115_v36 }
  0x23   :  { %v139_v44 = vmul.f32 %v2720_v9, %v120_v38 }
  0x24   :  { %v142_v37 = vsel %vm138_vm6, %v135_v31, %v140_v34 }
  0x25   :  { %v166_v42 = vsub.f32 %v142_v37, %v78_v33  ;;  %v141_v48 = vsel %vm137_vm9, %v120_v38, %v139_v44 }
  0x26   :  { %v165_v52 = vsub.f32 %v141_v48, %v77_v43 }
  0x27   :  { %v168_v47 = vand.u32 2147483647, %v166_v42 }
  0x28   :  { %v167_v59 = vand.u32 2147483647, %v165_v52 }
  0x29   :  { %v172_v54 = vmin.f32 %v168_v47, 0.999  ;;  %v2753_v16 = vmul.f32 %v168_v47, %v168_v47 }
  0x2a   :  { %v171_v3 = vmin.f32 %v167_v59, 0.999  ;;  %v2780_v25 = vmul.f32 %v167_v59, %v167_v59 }
  0x2b   :  { %v174_v60 = vmul.f32 30.0, %v172_v54 }
  0x2c   :  { %v173_v8 = vmul.f32 30.0, %v171_v3 }
  0x2d   :  { %vm2664_vm11 = vcmp.lt.s32.totalorder %v174_v60, 0  ;;  %v2665_v4 = vceil.f32 %v174_v60  ;;  %v2666_v5 = vfloor.f32 %v174_v60 }
  0x2e   :  { %vm2659_vm14 = vcmp.lt.s32.totalorder %v173_v8, 0  ;;  %v2660_v13 = vceil.f32 %v173_v8  ;;  %v2661_v14 = vfloor.f32 %v173_v8 }
  0x2f   :  { %v2667_v11 = vsel %vm2664_vm11, %v2665_v4, %v2666_v5 }
  0x30   :  { %v2668_v12 = vcvt.f32.s32 %v2667_v11  ;;  %v2662_v20 = vsel %vm2659_vm14, %v2660_v13, %v2661_v14 }
  0x31   :  { %v2663_v21 = vcvt.f32.s32 %v2662_v20 }
  0x32   :  { %v2759_v9 = vsel %vm96_vm13, %v2668_v12, 30 }
  0x33   :  { %vm180_vm1 = vcmp.eq.s32.totalorder %v2759_v9, 0  ;;  %vm261_vm2 = vcmp.eq.s32.totalorder %v2759_v9, 1  ;;  %vm338_vm3 = vcmp.eq.s32.totalorder %v2759_v9, 2  ;;  %v2791_v28 = vsel %vm2761_vm15, %v2663_v21, 30 }
  0x34   :  { %2509 = vmatpush.msk.msra.mxu0 %vm180_vm1, %v2685_v22  ;;  %v182_v23 = vsel %vm180_vm1, 1.0, %v2684_v18  ;;  %v263_v26 = vsel %vm261_vm2, 1.0, %v2684_v18  ;;  %2514 = vmatpush.msk.msra.mxu3 %vm261_vm2, %v2685_v22  ;;  %vm179_vm4 = vcmp.eq.s32.totalorder %v2791_v28, 0  ;;  %vm260_vm5 = vcmp.eq.s32.totalorder %v2791_v28, 1 }
  0x35   :  { %v208_v27 = vmul.f32 %v182_v23, %v2751_v15  ;;  %v230_v29 = vmul.f32 %v182_v23, %v2753_v16  ;;  %v285_v30 = vmul.f32 %v263_v26, %v2751_v15  ;;  %v340_v31 = vsel %vm338_vm3, 1.0, %v2684_v18 }
  0x36   :  { %2510 = vmatpush.msk.msra.mxu0 %vm179_vm4, %v2685_v22  ;;  %v181_v32 = vsel %vm179_vm4, 1.0, %v2684_v18  ;;  %v262_v33 = vsel %vm260_vm5, 1.0, %v2684_v18  ;;  %vm337_vm6 = vcmp.eq.s32.totalorder %v2791_v28, 2  ;;  %vm415_vm7 = vcmp.eq.s32.totalorder %v2759_v9, 3  ;;  %2515 = vmatpush.msk.msra.mxu3 %vm260_vm5, %v2685_v22 }
  0x37   :  { %223 = vmatpush.msra.mxu1 %v208_v27  ;;  %v207_v34 = vmul.f32 %v181_v32, %v2778_v24  ;;  %245 = vmatpush.msra.mxu2 %v230_v29  ;;  %v307_v35 = vmul.f32 %v263_v26, %v2753_v16  ;;  %v229_v36 = vmul.f32 %v181_v32, %v2780_v25  ;;  %v339_v37 = vsel %vm337_vm6, 1.0, %v2684_v18 }
  0x38   :  { %2511 = vmatmul.msk.f32.vlgmr.msra.gmra.mxu0 %vm183_vm0, %v2685_v22  ;;  %v362_v38 = vmul.f32 %v340_v31, %v2751_v15  ;;  %v284_v39 = vmul.f32 %v262_v33, %v2778_v24  ;;  %v306_v40 = vmul.f32 %v262_v33, %v2780_v25  ;;  %v417_v41 = vsel %vm415_vm7, 1.0, %v2684_v18  ;;  %2516 = vmatmul.msk.f32.vlgmr.msra.gmra.mxu3 %vm183_vm0, %v2685_v22 }
  0x39   :  { %300 = vmatpush.msrb.mxu0 %v285_v30  ;;  %224 = vmatpush.msra.mxu1 %v207_v34  ;;  %v361_v42 = vmul.f32 %v339_v37, %v2778_v24  ;;  %vm414_vm8 = vcmp.eq.s32.totalorder %v2791_v28, 3  ;;  %vm492_vm9 = vcmp.eq.s32.totalorder %v2759_v9, 4  ;;  %v384_v43 = vmul.f32 %v340_v31, %v2753_v16 }
  0x3a   :  { %246 = vmatpush.msra.mxu2 %v229_v36  ;;  %2512 = vmatmul.msk.f32.vlgmr.msra.gmra.mxu1 %vm183_vm0, %v2685_v22  ;;  %v439_v44 = vmul.f32 %v417_v41, %v2751_v15  ;;  %v461_v45 = vmul.f32 %v417_v41, %v2753_v16  ;;  %v416_v46 = vsel %vm414_vm8, 1.0, %v2684_v18  ;;  %vm491_vm10 = vcmp.eq.s32.totalorder %v2791_v28, 4 }
  0x3b   :  { %2513 = vmatmul.msk.f32.vlgmr.msra.gmra.mxu2 %vm183_vm0, %v2685_v22  ;;  %322 = vmatpush.msrb.mxu1 %v307_v35  ;;  %v494_v47 = vsel %vm492_vm9, 1.0, %v2684_v18  ;;  %v383_v48 = vmul.f32 %v339_v37, %v2780_v25  ;;  %v438_v49 = vmul.f32 %v416_v46, %v2778_v24  ;;  %v460_v50 = vmul.f32 %v416_v46, %v2780_v25 }
  0x3c   :  { %2519 = vmatpush.msk.msrb.mxu2 %vm338_vm3, %v2685_v22  ;;  %377 = vmatpush.msrb.mxu3 %v362_v38  ;;  %v493_v51 = vsel %vm491_vm10, 1.0, %v2684_v18  ;;  %v516_v52 = vmul.f32 %v494_v47, %v2751_v15  ;;  %vm569_vm11 = vcmp.eq.s32.totalorder %v2759_v9, 5  ;;  %v538_v53 = vmul.f32 %v494_v47, %v2753_v16 }
  0x3d   :  { %301 = vmatpush.msrb.mxu0 %v284_v39  ;;  %323 = vmatpush.msrb.mxu1 %v306_v40  ;;  %v571_v54 = vsel %vm569_vm11, 1.0, %v2684_v18  ;;  %vm646_vm12 = vcmp.eq.s32.totalorder %v2759_v9, 6  ;;  %v515_v55 = vmul.f32 %v493_v51, %v2778_v24  ;;  %v537_v56 = vmul.f32 %v493_v51, %v2780_v25 }
  0x3e   :  { %2520 = vmatpush.msk.msrb.mxu2 %vm337_vm6, %v2685_v22  ;;  %378 = vmatpush.msrb.mxu3 %v361_v42  ;;  %vm645_vm13 = vcmp.eq.s32.totalorder %v2791_v28, 6  ;;  %vm568_vm14 = vcmp.eq.s32.totalorder %v2791_v28, 5  ;;  %v593_v57 = vmul.f32 %v571_v54, %v2751_v15  ;;  %v648_v58 = vsel %vm646_vm12, 1.0, %v2684_v18 }
  0x3f   :  { %2524 = vmatpush.msk.msra.mxu1 %vm415_vm7, %v2685_v22  ;;  %399 = vmatpush.msra.mxu0 %v384_v43  ;;  %v570_v59 = vsel %vm568_vm14, 1.0, %v2684_v18  ;;  %v615_v60 = vmul.f32 %v571_v54, %v2753_v16  ;;  %v647_v61 = vsel %vm645_vm13, 1.0, %v2684_v18  ;;  %v670_v62 = vmul.f32 %v648_v58, %v2751_v15 }
  0x40   :  { %2517 = vmatmul.msk.f32.vlgmr.msrb.gmra.mxu0 %vm183_vm0, %v2685_v22  ;;  %454 = vmatpush.msra.mxu2 %v439_v44  ;;  %v592_v63 = vmul.f32 %v570_v59, %v2778_v24  ;;  %v614_v0 = vmul.f32 %v570_v59, %v2780_v25  ;;  %v669_v2 = vmul.f32 %v647_v61, %v2778_v24  ;;  %vm723_vm15 = vcmp.eq.s32.totalorder %v2759_v9, 7 }
  0x41   :  { %476 = vmatpush.msra.mxu3 %v461_v45  ;;  %2525 = vmatpush.msk.msra.mxu1 %vm414_vm8, %v2685_v22  ;;  %v692_v3 = vmul.f32 %v648_v58, %v2753_v16  ;;  %vm722_vm1 = vcmp.eq.s32.totalorder %v2791_v28, 7  ;;  %v725_v4 = vsel %vm723_vm15, 1.0, %v2684_v18  ;;  %v691_v10 = vmul.f32 %v647_v61, %v2780_v25 }
  0x42   :  { %2518 = vmatmul.msk.f32.vlgmr.msrb.gmra.mxu1 %vm183_vm0, %v2685_v22  ;;  %2522 = vmatmul.msk.f32.vlgmr.msrb.gmra.mxu3 %vm183_vm0, %v2685_v22  ;;  %v724_v5 = vsel %vm722_vm1, 1.0, %v2684_v18  ;;  %v747_v6 = vmul.f32 %v725_v4, %v2751_v15  ;;  %v769_v7 = vmul.f32 %v725_v4, %v2753_v16  ;;  %vm800_vm2 = vcmp.eq.s32.totalorder %v2759_v9, 8 }
  0x43   :  { %2521 = vmatmul.msk.f32.vlgmr.msrb.gmra.mxu2 %vm183_vm0, %v2685_v22  ;;  %400 = vmatpush.msra.mxu0 %v383_v48  ;;  %v746_v8 = vmul.f32 %v724_v5, %v2778_v24  ;;  %v768_v11 = vmul.f32 %v724_v5, %v2780_v25  ;;  %vm799_vm3 = vcmp.eq.s32.totalorder %v2791_v28, 8  ;;  %v802_v1 = vsel %vm800_vm2, 1.0, %v2684_v18 }
  0x44   :  { %455 = vmatpush.msra.mxu2 %v438_v49  ;;  %477 = vmatpush.msra.mxu3 %v460_v50  ;;  %v801_v12 = vsel %vm799_vm3, 1.0, %v2684_v18  ;;  %v824_v13 = vmul.f32 %v802_v1, %v2751_v15  ;;  %v846_v14 = vmul.f32 %v802_v1, %v2753_v16  ;;  %vm877_vm4 = vcmp.eq.s32.totalorder %v2759_v9, 9 }
  0x45   :  { %2529 = vmatpush.msk.msrb.mxu0 %vm492_vm9, %v2685_v22  ;;  %531 = vmatpush.msrb.mxu1 %v516_v52  ;;  %v879_v17 = vsel %vm877_vm4, 1.0, %v2684_v18  ;;  %v823_v19 = vmul.f32 %v801_v12, %v2778_v24  ;;  %v845_v20 = vmul.f32 %v801_v12, %v2780_v25  ;;  %vm954_vm5 = vcmp.eq.s32.totalorder %v2759_v9, 10 }
  0x46   :  { %553 = vmatpush.msrb.mxu2 %v538_v53  ;;  %2534 = vmatpush.msk.msrb.mxu3 %vm569_vm11, %v2685_v22  ;;  %vm876_vm6 = vcmp.eq.s32.totalorder %v2791_v28, 9  ;;  %v901_v21 = vmul.f32 %v879_v17, %v2751_v15  ;;  %vm953_vm7 = vcmp.eq.s32.totalorder %v2791_v28, 10  ;;  %v956_v23 = vsel %vm954_vm5, 1.0, %v2684_v18 }
  0x47   :  { %532 = vmatpush.msrb.mxu1 %v515_v55  ;;  %2530 = vmatpush.msk.msrb.mxu0 %vm491_vm10, %v2685_v22  ;;  %v878_v26 = vsel %vm876_vm6, 1.0, %v2684_v18  ;;  %v923_v27 = vmul.f32 %v879_v17, %v2753_v16  ;;  %v955_v29 = vsel %vm953_vm7, 1.0, %v2684_v18  ;;  %v978_v30 = vmul.f32 %v956_v23, %v2751_v15 }
  0x48   :  { %2523 = vmatmul.msk.f32.vlgmr.msra.gmra.mxu0 %vm183_vm0, %v2685_v22  ;;  %554 = vmatpush.msrb.mxu2 %v537_v56  ;;  %v900_v31 = vmul.f32 %v878_v26, %v2778_v24  ;;  %v922_v32 = vmul.f32 %v878_v26, %v2780_v25  ;;  %v977_v33 = vmul.f32 %v955_v29, %v2778_v24  ;;  %vm1031_vm8 = vcmp.eq.s32.totalorder %v2759_v9, 11 }
  0x49   :  { %2535 = vmatpush.msk.msrb.mxu3 %vm568_vm14, %v2685_v22  ;;  %608 = vmatpush.msra.mxu0 %v593_v57  ;;  %v1000_v34 = vmul.f32 %v956_v23, %v2753_v16  ;;  %vm1030_vm9 = vcmp.eq.s32.totalorder %v2791_v28, 11  ;;  %v1033_v35 = vsel %vm1031_vm8, 1.0, %v2684_v18  ;;  %v999_v39 = vmul.f32 %v955_v29, %v2780_v25 }
  0x4a   :  { %2526 = vmatmul.msk.f32.vlgmr.msra.gmra.mxu1 %vm183_vm0, %v2685_v22  ;;  %2528 = vmatmul.msk.f32.vlgmr.msra.gmra.mxu3 %vm183_vm0, %v2685_v22  ;;  %v1032_v36 = vsel %vm1030_vm9, 1.0, %v2684_v18  ;;  %v1055_v37 = vmul.f32 %v1033_v35, %v2751_v15  ;;  %v1077_v38 = vmul.f32 %v1033_v35, %v2753_v16  ;;  %vm1108_vm10 = vcmp.eq.s32.totalorder %v2759_v9, 12 }
  0x4b   :  { %2527 = vmatmul.msk.f32.vlgmr.msra.gmra.mxu2 %vm183_vm0, %v2685_v22  ;;  %630 = vmatpush.msra.mxu1 %v615_v60  ;;  %v1054_v40 = vmul.f32 %v1032_v36, %v2778_v24  ;;  %v1076_v41 = vmul.f32 %v1032_v36, %v2780_v25  ;;  %vm1107_vm11 = vcmp.eq.s32.totalorder %v2791_v28, 12  ;;  %v1110_v42 = vsel %vm1108_vm10, 1.0, %v2684_v18 }
  0x4c   :  { %2539 = vmatpush.msk.msra.mxu2 %vm646_vm12, %v2685_v22  ;;  %685 = vmatpush.msra.mxu3 %v670_v62  ;;  %v1109_v43 = vsel %vm1107_vm11, 1.0, %v2684_v18  ;;  %v1132_v44 = vmul.f32 %v1110_v42, %v2751_v15  ;;  %v1154_v45 = vmul.f32 %v1110_v42, %v2753_v16  ;;  %vm1185_vm12 = vcmp.eq.s32.totalorder %v2759_v9, 13 }
  0x4d   :  { %609 = vmatpush.msra.mxu0 %v592_v63  ;;  %631 = vmatpush.msra.mxu1 %v614_v0  ;;  %v1187_v46 = vsel %vm1185_vm12, 1.0, %v2684_v18  ;;  %v1131_v47 = vmul.f32 %v1109_v43, %v2778_v24  ;;  %v1153_v48 = vmul.f32 %v1109_v43, %v2780_v25  ;;  %vm1184_vm14 = vcmp.eq.s32.totalorder %v2791_v28, 13 }
  0x4e   :  { %2540 = vmatpush.msk.msra.mxu2 %vm645_vm13, %v2685_v22  ;;  %686 = vmatpush.msra.mxu3 %v669_v2  ;;  %vm1262_vm13 = vcmp.eq.s32.totalorder %v2759_v9, 14  ;;  %v1209_v49 = vmul.f32 %v1187_v46, %v2751_v15  ;;  %v1186_v51 = vsel %vm1184_vm14, 1.0, %v2684_v18  ;;  %v1231_v52 = vmul.f32 %v1187_v46, %v2753_v16 }
  0x4f   :  { %v1264_v50 = vsel %vm1262_vm13, 1.0, %v2684_v18  ;;  %v1208_v55 = vmul.f32 %v1186_v51, %v2778_v24  ;;  %v1230_v56 = vmul.f32 %v1186_v51, %v2780_v25 }
  0x50   :  { %2531 = vmatmul.msk.f32.vlgmr.msrb.gmra.mxu0 %vm183_vm0, %v2685_v22  ;;  %v1286_v54 = vmul.f32 %v1264_v50, %v2751_v15  ;;  %v1308_v58 = vmul.f32 %v1264_v50, %v2753_v16 }
  0x51   :  { %707 = vmatpush.msrb.mxu0 %v692_v3 }
  0x52   :  { %2532 = vmatmul.msk.f32.vlgmr.msrb.gmra.mxu1 %vm183_vm0, %v2685_v22  ;;  %2536 = vmatmul.msk.f32.vlgmr.msrb.gmra.mxu3 %vm183_vm0, %v2685_v22 }
  0x53   :  { %2533 = vmatmul.msk.f32.vlgmr.msrb.gmra.mxu2 %vm183_vm0, %v2685_v22  ;;  %2544 = vmatpush.msk.msrb.mxu1 %vm723_vm15, %v2685_v22  ;;  %vm1261_vm15 = vcmp.eq.s32.totalorder %v2791_v28, 14 }
  0x54   :  { %762 = vmatpush.msrb.mxu2 %v747_v6  ;;  %784 = vmatpush.msrb.mxu3 %v769_v7  ;;  %v1263_v53 = vsel %vm1261_vm15, 1.0, %v2684_v18 }
  0x55   :  { %708 = vmatpush.msrb.mxu0 %v691_v10  ;;  %2545 = vmatpush.msk.msrb.mxu1 %vm722_vm1, %v2685_v22  ;;  %v1285_v57 = vmul.f32 %v1263_v53, %v2778_v24  ;;  %vm1339_vm1 = vcmp.eq.s32.totalorder %v2759_v9, 15  ;;  %v1307_v63 = vmul.f32 %v1263_v53, %v2780_v25 }
  0x56   :  { %763 = vmatpush.msrb.mxu2 %v746_v8  ;;  %785 = vmatpush.msrb.mxu3 %v768_v11  ;;  %v1341_v59 = vsel %vm1339_vm1, 1.0, %v2684_v18 }
  0x57   :  { %v1363_v61 = vmul.f32 %v1341_v59, %v2751_v15  ;;  %v1385_v62 = vmul.f32 %v1341_v59, %v2753_v16 }
  0x58   :  { %2537 = vmatmul.msk.f32.vlgmr.msra.gmra.mxu0 %vm183_vm0, %v2685_v22 }
  0x59   :  { %2549 = vmatpush.msk.msra.mxu0 %vm800_vm2, %v2685_v22  ;;  %vm1338_vm2 = vcmp.eq.s32.totalorder %v2791_v28, 15 }
  0x5a   :  { %2538 = vmatmul.msk.f32.vlgmr.msra.gmra.mxu1 %vm183_vm0, %v2685_v22  ;;  %2542 = vmatmul.msk.f32.vlgmr.msra.gmra.mxu3 %vm183_vm0, %v2685_v22  ;;  %v1340_v60 = vsel %vm1338_vm2, 1.0, %v2684_v18 }
  0x5b   :  { %2541 = vmatmul.msk.f32.vlgmr.msra.gmra.mxu2 %vm183_vm0, %v2685_v22  ;;  %839 = vmatpush.msra.mxu1 %v824_v13  ;;  %v1362_v0 = vmul.f32 %v1340_v60, %v2778_v24  ;;  %v1384_v2 = vmul.f32 %v1340_v60, %v2780_v25 }
  0x5c   :  { %861 = vmatpush.msra.mxu2 %v846_v14  ;;  %2554 = vmatpush.msk.msra.mxu3 %vm877_vm4, %v2685_v22  ;;  %vm1415_vm4 = vcmp.eq.s32.totalorder %v2791_v28, 16 }
  0x5d   :  { %2550 = vmatpush.msk.msra.mxu0 %vm799_vm3, %v2685_v22  ;;  %840 = vmatpush.msra.mxu1 %v823_v19  ;;  %vm1416_vm3 = vcmp.eq.s32.totalorder %v2759_v9, 16  ;;  %v1417_v4 = vsel %vm1415_vm4, 1.0, %v2684_v18 }
  0x5e   :  { %862 = vmatpush.msra.mxu2 %v845_v20  ;;  %2555 = vmatpush.msk.msra.mxu3 %vm876_vm6, %v2685_v22  ;;  %v1418_v3 = vsel %vm1416_vm3, 1.0, %v2684_v18  ;;  %v1439_v10 = vmul.f32 %v1417_v4, %v2778_v24  ;;  %v1461_v8 = vmul.f32 %v1417_v4, %v2780_v25  ;;  %vm1570_vm6 = vcmp.eq.s32.totalorder %v2759_v9, 18 }
  0x5f   :  { %v1440_v5 = vmul.f32 %v1418_v3, %v2751_v15  ;;  %v1462_v6 = vmul.f32 %v1418_v3, %v2753_v16  ;;  %v1572_v1 = vsel %vm1570_vm6, 1.0, %v2684_v18 }
  0x60   :  { %2543 = vmatmul.msk.f32.vlgmr.msrb.gmra.mxu0 %vm183_vm0, %v2685_v22  ;;  %v1594_v17 = vmul.f32 %v1572_v1, %v2751_v15  ;;  %v1616_v23 = vmul.f32 %v1572_v1, %v2753_v16 }
  0x61   :  { %916 = vmatpush.msrb.mxu0 %v901_v21 }
  0x62   :  { %2546 = vmatmul.msk.f32.vlgmr.msrb.gmra.mxu1 %vm183_vm0, %v2685_v22  ;;  %2548 = vmatmul.msk.f32.vlgmr.msrb.gmra.mxu3 %vm183_vm0, %v2685_v22 }
  0x63   :  { %2547 = vmatmul.msk.f32.vlgmr.msrb.gmra.mxu2 %vm183_vm0, %v2685_v22  ;;  %938 = vmatpush.msrb.mxu1 %v923_v27 }
  0x64   :  { %2559 = vmatpush.msk.msrb.mxu2 %vm954_vm5, %v2685_v22  ;;  %993 = vmatpush.msrb.mxu3 %v978_v30  ;;  %vm1493_vm5 = vcmp.eq.s32.totalorder %v2759_v9, 17 }
  0x65   :  { %917 = vmatpush.msrb.mxu0 %v900_v31  ;;  %939 = vmatpush.msrb.mxu1 %v922_v32  ;;  %v1495_v7 = vsel %vm1493_vm5, 1.0, %v2684_v18 }
  0x66   :  { %2560 = vmatpush.msk.msrb.mxu2 %vm953_vm7, %v2685_v22  ;;  %994 = vmatpush.msrb.mxu3 %v977_v33  ;;  %vm1492_vm7 = vcmp.eq.s32.totalorder %v2791_v28, 17  ;;  %v1517_v11 = vmul.f32 %v1495_v7, %v2751_v15  ;;  %v1539_v13 = vmul.f32 %v1495_v7, %v2753_v16  ;;  %v331_v7 = vld [vmem:[%s4027_s3 + $0x21] sm:$0x1] }
  0x67   :  { %v1494_v12 = vsel %vm1492_vm7, 1.0, %v2684_v18 }
  0x68   :  { %2551 = vmatmul.msk.f32.vlgmr.msra.gmra.mxu0 %vm183_vm0, %v2685_v22  ;;  %v1516_v19 = vmul.f32 %v1494_v12, %v2778_v24  ;;  %v1538_v20 = vmul.f32 %v1494_v12, %v2780_v25 }
  0x69   :  { %1015 = vmatpush.msra.mxu0 %v1000_v34 }
  0x6a   :  { %2552 = vmatmul.msk.f32.vlgmr.msra.gmra.mxu1 %vm183_vm0, %v2685_v22  ;;  %2556 = vmatmul.msk.f32.vlgmr.msra.gmra.mxu3 %vm183_vm0, %v2685_v22 }
  0x6b   :  { %2553 = vmatmul.msk.f32.vlgmr.msra.gmra.mxu2 %vm183_vm0, %v2685_v22  ;;  %2564 = vmatpush.msk.msra.mxu1 %vm1031_vm8, %v2685_v22  ;;  %vm1569_vm8 = vcmp.eq.s32.totalorder %v2791_v28, 18 }
  0x6c   :  { %1070 = vmatpush.msra.mxu2 %v1055_v37  ;;  %1092 = vmatpush.msra.mxu3 %v1077_v38  ;;  %v1571_v14 = vsel %vm1569_vm8, 1.0, %v2684_v18 }
  0x6d   :  { %1016 = vmatpush.msra.mxu0 %v999_v39  ;;  %2565 = vmatpush.msk.msra.mxu1 %vm1030_vm9, %v2685_v22  ;;  %v1593_v21 = vmul.f32 %v1571_v14, %v2778_v24  ;;  %vm1647_vm9 = vcmp.eq.s32.totalorder %v2759_v9, 19  ;;  %v1615_v31 = vmul.f32 %v1571_v14, %v2780_v25 }
  0x6e   :  { %1071 = vmatpush.msra.mxu2 %v1054_v40  ;;  %1093 = vmatpush.msra.mxu3 %v1076_v41  ;;  %v1649_v26 = vsel %vm1647_vm9, 1.0, %v2684_v18 }
  0x6f   :  { %v1671_v29 = vmul.f32 %v1649_v26, %v2751_v15  ;;  %v1693_v30 = vmul.f32 %v1649_v26, %v2753_v16 }
  0x70   :  { %2557 = vmatmul.msk.f32.vlgmr.msrb.gmra.mxu0 %vm183_vm0, %v2685_v22 }
  0x71   :  { %2569 = vmatpush.msk.msrb.mxu0 %vm1108_vm10, %v2685_v22  ;;  %vm1646_vm10 = vcmp.eq.s32.totalorder %v2791_v28, 19 }
  0x72   :  { %2558 = vmatmul.msk.f32.vlgmr.msrb.gmra.mxu1 %vm183_vm0, %v2685_v22  ;;  %2562 = vmatmul.msk.f32.vlgmr.msrb.gmra.mxu3 %vm183_vm0, %v2685_v22  ;;  %v1648_v27 = vsel %vm1646_vm10, 1.0, %v2684_v18 }
  0x73   :  { %2561 = vmatmul.msk.f32.vlgmr.msrb.gmra.mxu2 %vm183_vm0, %v2685_v22  ;;  %1147 = vmatpush.msrb.mxu1 %v1132_v44  ;;  %v1670_v32 = vmul.f32 %v1648_v27, %v2778_v24  ;;  %v1692_v33 = vmul.f32 %v1648_v27, %v2780_v25 }
  0x74   :  { %1169 = vmatpush.msrb.mxu2 %v1154_v45  ;;  %2574 = vmatpush.msk.msrb.mxu3 %vm1185_vm12, %v2685_v22  ;;  %vm1723_vm12 = vcmp.eq.s32.totalorder %v2791_v28, 20 }
  0x75   :  { %2570 = vmatpush.msk.msrb.mxu0 %vm1107_vm11, %v2685_v22  ;;  %1148 = vmatpush.msrb.mxu1 %v1131_v47  ;;  %vm1724_vm11 = vcmp.eq.s32.totalorder %v2759_v9, 20  ;;  %v1725_v35 = vsel %vm1723_vm12, 1.0, %v2684_v18 }
  0x76   :  { %1170 = vmatpush.msrb.mxu2 %v1153_v48  ;;  %2575 = vmatpush.msk.msrb.mxu3 %vm1184_vm14, %v2685_v22  ;;  %v1726_v34 = vsel %vm1724_vm11, 1.0, %v2684_v18  ;;  %v1747_v39 = vmul.f32 %v1725_v35, %v2778_v24  ;;  %v1769_v40 = vmul.f32 %v1725_v35, %v2780_v25  ;;  %vm1878_vm14 = vcmp.eq.s32.totalorder %v2759_v9, 22  ;;  %v411_v35 = vld [vmem:[%s4027_s3 + $0x42] sm:$0x1] }
  0x77   :  { %v1748_v36 = vmul.f32 %v1726_v34, %v2751_v15  ;;  %v1770_v37 = vmul.f32 %v1726_v34, %v2753_v16  ;;  %v1880_v42 = vsel %vm1878_vm14, 1.0, %v2684_v18 }
  0x78   :  { %2563 = vmatmul.msk.f32.vlgmr.msra.gmra.mxu0 %vm183_vm0, %v2685_v22  ;;  %v1902_v46 = vmul.f32 %v1880_v42, %v2751_v15  ;;  %v1924_v50 = vmul.f32 %v1880_v42, %v2753_v16 }
  0x79   :  { %1224 = vmatpush.msra.mxu0 %v1209_v49 }
  0x7a   :  { %2566 = vmatmul.msk.f32.vlgmr.msra.gmra.mxu1 %vm183_vm0, %v2685_v22  ;;  %2568 = vmatmul.msk.f32.vlgmr.msra.gmra.mxu3 %vm183_vm0, %v2685_v22 }
  0x7b   :  { %2567 = vmatmul.msk.f32.vlgmr.msra.gmra.mxu2 %vm183_vm0, %v2685_v22  ;;  %1246 = vmatpush.msra.mxu1 %v1231_v52 }
  0x7c   :  { %2579 = vmatpush.msk.msra.mxu2 %vm1262_vm13, %v2685_v22  ;;  %1301 = vmatpush.msra.mxu3 %v1286_v54  ;;  %vm1801_vm13 = vcmp.eq.s32.totalorder %v2759_v9, 21 }
  0x7d   :  { %1225 = vmatpush.msra.mxu0 %v1208_v55  ;;  %1247 = vmatpush.msra.mxu1 %v1230_v56  ;;  %v1803_v38 = vsel %vm1801_vm13, 1.0, %v2684_v18  ;;  %v251_v56 = vld [vmem:[%s4027_s3] sm:$0x1] }
  0x7e   :  { %2580 = vmatpush.msk.msra.mxu2 %vm1261_vm15, %v2685_v22  ;;  %1302 = vmatpush.msra.mxu3 %v1285_v57  ;;  %vm1800_vm15 = vcmp.eq.s32.totalorder %v2791_v28, 21  ;;  %v1825_v41 = vmul.f32 %v1803_v38, %v2751_v15  ;;  %v1847_v44 = vmul.f32 %v1803_v38, %v2753_v16  ;;  %v408_v38 = vld [vmem:[%s4027_s3 + $0x22] sm:$0x1] }
  0x7f   :  { %v1802_v43 = vsel %vm1800_vm15, 1.0, %v2684_v18 }
  0x80   :  { %2571 = vmatmul.msk.f32.vlgmr.msrb.gmra.mxu0 %vm183_vm0, %v2685_v22  ;;  %v1824_v47 = vmul.f32 %v1802_v43, %v2778_v24  ;;  %v1846_v48 = vmul.f32 %v1802_v43, %v2780_v25  ;;  %v482_v43 = vld [vmem:[%s4027_s3 + $0x3] sm:$0x1] }
  0x81   :  { %1323 = vmatpush.msrb.mxu0 %v1308_v58 }
  0x82   :  { %2572 = vmatmul.msk.f32.vlgmr.msrb.gmra.mxu1 %vm183_vm0, %v2685_v22  ;;  %2576 = vmatmul.msk.f32.vlgmr.msrb.gmra.mxu3 %vm183_vm0, %v2685_v22 }
  0x83   :  { %2573 = vmatmul.msk.f32.vlgmr.msrb.gmra.mxu2 %vm183_vm0, %v2685_v22  ;;  %2584 = vmatpush.msk.msrb.mxu1 %vm1339_vm1, %v2685_v22  ;;  %vm1877_vm1 = vcmp.eq.s32.totalorder %v2791_v28, 22 }
  0x84   :  { %1378 = vmatpush.msrb.mxu2 %v1363_v61  ;;  %1400 = vmatpush.msrb.mxu3 %v1385_v62  ;;  %v1879_v45 = vsel %vm1877_vm1, 1.0, %v2684_v18  ;;  %v254_v62 = vld [vmem:[%s4027_s3 + $0x20] sm:$0x1] }
  0x85   :  { %1324 = vmatpush.msrb.mxu0 %v1307_v63  ;;  %2585 = vmatpush.msk.msrb.mxu1 %vm1338_vm2, %v2685_v22  ;;  %v1901_v49 = vmul.f32 %v1879_v45, %v2778_v24  ;;  %vm1955_vm2 = vcmp.eq.s32.totalorder %v2759_v9, 23  ;;  %v1923_v55 = vmul.f32 %v1879_v45, %v2780_v25 }
  0x86   :  { %1379 = vmatpush.msrb.mxu2 %v1362_v0  ;;  %1401 = vmatpush.msrb.mxu3 %v1384_v2  ;;  %v1957_v51 = vsel %vm1955_vm2, 1.0, %v2684_v18 }
  0x87   :  { %v1979_v53 = vmul.f32 %v1957_v51, %v2751_v15  ;;  %v2001_v54 = vmul.f32 %v1957_v51, %v2753_v16 }
  0x88   :  { %2577 = vmatmul.msk.f32.vlgmr.msra.gmra.mxu0 %vm183_vm0, %v2685_v22 }
  0x89   :  { %2589 = vmatpush.msk.msra.mxu0 %vm1416_vm3, %v2685_v22  ;;  %vm1954_vm3 = vcmp.eq.s32.totalorder %v2791_v28, 23 }
  0x8a   :  { %2578 = vmatmul.msk.f32.vlgmr.msra.gmra.mxu1 %vm183_vm0, %v2685_v22  ;;  %2582 = vmatmul.msk.f32.vlgmr.msra.gmra.mxu3 %vm183_vm0, %v2685_v22  ;;  %v1956_v52 = vsel %vm1954_vm3, 1.0, %v2684_v18 }
  0x8b   :  { %2581 = vmatmul.msk.f32.vlgmr.msra.gmra.mxu2 %vm183_vm0, %v2685_v22  ;;  %1455 = vmatpush.msra.mxu1 %v1440_v5  ;;  %v1978_v57 = vmul.f32 %v1956_v52, %v2778_v24  ;;  %v2000_v58 = vmul.f32 %v1956_v52, %v2780_v25 }
  0x8c   :  { %1477 = vmatpush.msra.mxu2 %v1462_v6  ;;  %2594 = vmatpush.msk.msra.mxu3 %vm1493_vm5, %v2685_v22  ;;  %vm2031_vm5 = vcmp.eq.s32.totalorder %v2791_v28, 24 }
  0x8d   :  { %2590 = vmatpush.msk.msra.mxu0 %vm1415_vm4, %v2685_v22  ;;  %1456 = vmatpush.msra.mxu1 %v1439_v10  ;;  %vm2032_vm4 = vcmp.eq.s32.totalorder %v2759_v9, 24  ;;  %v2033_v63 = vsel %vm2031_vm5, 1.0, %v2684_v18 }
  0x8e   :  { %1478 = vmatpush.msra.mxu2 %v1461_v8  ;;  %2595 = vmatpush.msk.msra.mxu3 %vm1492_vm7, %v2685_v22  ;;  %v2034_v60 = vsel %vm2032_vm4, 1.0, %v2684_v18  ;;  %v2055_v6 = vmul.f32 %v2033_v63, %v2778_v24  ;;  %v2077_v10 = vmul.f32 %v2033_v63, %v2780_v25  ;;  %vm2186_vm7 = vcmp.eq.s32.totalorder %v2759_v9, 26  ;;  %v257_v8 = vld [vmem:[%s4027_s3 + $0x40] sm:$0x1]  ;;  %v562_v63 = vld [vmem:[%s4027_s3 + $0x24] sm:$0x1] }
  0x8f   :  { %v2056_v2 = vmul.f32 %v2034_v60, %v2751_v15  ;;  %v2078_v4 = vmul.f32 %v2034_v60, %v2753_v16 }
  0x90   :  { %2583 = vmatmul.msk.f32.vlgmr.msrb.gmra.mxu0 %vm183_vm0, %v2685_v22 }
  0x91   :  { %1532 = vmatpush.msrb.mxu0 %v1517_v11  ;;  %v328_v11 = vld [vmem:[%s4027_s3 + $0x1] sm:$0x1] }
  0x92   :  { %2586 = vmatmul.msk.f32.vlgmr.msrb.gmra.mxu1 %vm183_vm0, %v2685_v22  ;;  %2588 = vmatmul.msk.f32.vlgmr.msrb.gmra.mxu3 %vm183_vm0, %v2685_v22 }
  0x93   :  { %2587 = vmatmul.msk.f32.vlgmr.msrb.gmra.mxu2 %vm183_vm0, %v2685_v22  ;;  %1554 = vmatpush.msrb.mxu1 %v1539_v13 }
  0x94   :  { %2599 = vmatpush.msk.msrb.mxu2 %vm1570_vm6, %v2685_v22  ;;  %1609 = vmatpush.msrb.mxu3 %v1594_v17  ;;  %vm2109_vm6 = vcmp.eq.s32.totalorder %v2759_v9, 25  ;;  %v334_v17 = vld [vmem:[%s4027_s3 + $0x41] sm:$0x1] }
  0x95   :  { %1533 = vmatpush.msrb.mxu0 %v1516_v19  ;;  %1555 = vmatpush.msrb.mxu1 %v1538_v20  ;;  %v2111_v5 = vsel %vm2109_vm6, 1.0, %v2684_v18  ;;  %v2188_v19 = vsel %vm2186_vm7, 1.0, %v2684_v18 }
  0x96   :  { %2600 = vmatpush.msk.msrb.mxu2 %vm1569_vm8, %v2685_v22  ;;  %1610 = vmatpush.msrb.mxu3 %v1593_v21  ;;  %vm2108_vm8 = vcmp.eq.s32.totalorder %v2791_v28, 25  ;;  %v2133_v12 = vmul.f32 %v2111_v5, %v2751_v15 }
  0x98   :  { %2591 = vmatmul.msk.f32.vlgmr.msra.gmra.mxu0 %vm183_vm0, %v2685_v22 }
  0x99   :  { %1631 = vmatpush.msra.mxu0 %v1616_v23  ;;  %v2110_v23 = vsel %vm2108_vm8, 1.0, %v2684_v18 }
  0x9a   :  { %2592 = vmatmul.msk.f32.vlgmr.msra.gmra.mxu1 %vm183_vm0, %v2685_v22  ;;  %2596 = vmatmul.msk.f32.vlgmr.msra.gmra.mxu3 %vm183_vm0, %v2685_v22  ;;  %v2154_v34 = vmul.f32 %v2110_v23, %v2780_v25 }
  0x9b   :  { %2593 = vmatmul.msk.f32.vlgmr.msra.gmra.mxu2 %vm183_vm0, %v2685_v22  ;;  %2604 = vmatpush.msk.msra.mxu1 %vm1647_vm9, %v2685_v22  ;;  %vm2185_vm9 = vcmp.eq.s32.totalorder %v2791_v28, 26 }
  0x9c   :  { %1686 = vmatpush.msra.mxu2 %v1671_v29  ;;  %1708 = vmatpush.msra.mxu3 %v1693_v30  ;;  %v2155_v29 = vmul.f32 %v2111_v5, %v2753_v16  ;;  %v2187_v30 = vsel %vm2185_vm9, 1.0, %v2684_v18 }
  0x9d   :  { %1632 = vmatpush.msra.mxu0 %v1615_v31  ;;  %2605 = vmatpush.msk.msra.mxu1 %vm1646_vm10, %v2685_v22  ;;  %vm2263_vm10 = vcmp.eq.s32.totalorder %v2759_v9, 27 }
  0x9e   :  { %1687 = vmatpush.msra.mxu2 %v1670_v32  ;;  %1709 = vmatpush.msra.mxu3 %v1692_v33  ;;  %v2210_v32 = vmul.f32 %v2188_v19, %v2751_v15  ;;  %v2132_v33 = vmul.f32 %v2110_v23, %v2778_v24  ;;  %v642_v23 = vld [vmem:[%s4027_s3 + $0x45] sm:$0x1] }
  0xa0   :  { %2597 = vmatmul.msk.f32.vlgmr.msrb.gmra.mxu0 %vm183_vm0, %v2685_v22 }
  0xa1   :  { %2609 = vmatpush.msk.msrb.mxu0 %vm1724_vm11, %v2685_v22  ;;  %vm2262_vm11 = vcmp.eq.s32.totalorder %v2791_v28, 27 }
  0xa2   :  { %2598 = vmatmul.msk.f32.vlgmr.msrb.gmra.mxu1 %vm183_vm0, %v2685_v22  ;;  %2602 = vmatmul.msk.f32.vlgmr.msrb.gmra.mxu3 %vm183_vm0, %v2685_v22 }
  0xa3   :  { %2601 = vmatmul.msk.f32.vlgmr.msrb.gmra.mxu2 %vm183_vm0, %v2685_v22  ;;  %1763 = vmatpush.msrb.mxu1 %v1748_v36  ;;  %v2209_v36 = vmul.f32 %v2187_v30, %v2778_v24 }
  0xa4   :  { %1785 = vmatpush.msrb.mxu2 %v1770_v37  ;;  %2614 = vmatpush.msk.msrb.mxu3 %vm1801_vm13, %v2685_v22  ;;  %v405_v37 = vld [vmem:[%s4027_s3 + $0x2] sm:$0x1]  ;;  %vm2339_vm13 = vcmp.eq.s32.totalorder %v2791_v28, 28 }
  0xa5   :  { %2610 = vmatpush.msk.msrb.mxu0 %vm1723_vm12, %v2685_v22  ;;  %1764 = vmatpush.msrb.mxu1 %v1747_v39  ;;  %vm2340_vm12 = vcmp.eq.s32.totalorder %v2759_v9, 28 }
  0xa6   :  { %1786 = vmatpush.msrb.mxu2 %v1769_v40  ;;  %2615 = vmatpush.msk.msrb.mxu3 %vm1800_vm15, %v2685_v22  ;;  %v2232_v40 = vmul.f32 %v2188_v19, %v2753_v16  ;;  %vm2416_vm15 = vcmp.eq.s32.totalorder %v2791_v28, 29 }
  0xa8   :  { %2603 = vmatmul.msk.f32.vlgmr.msra.gmra.mxu0 %vm183_vm0, %v2685_v22 }
  0xa9   :  { %1840 = vmatpush.msra.mxu0 %v1825_v41 }
  0xaa   :  { %2606 = vmatmul.msk.f32.vlgmr.msra.gmra.mxu1 %vm183_vm0, %v2685_v22  ;;  %2608 = vmatmul.msk.f32.vlgmr.msra.gmra.mxu3 %vm183_vm0, %v2685_v22 }
  0xab   :  { %2607 = vmatmul.msk.f32.vlgmr.msra.gmra.mxu2 %vm183_vm0, %v2685_v22  ;;  %1862 = vmatpush.msra.mxu1 %v1847_v44  ;;  %v2265_v44 = vsel %vm2263_vm10, 1.0, %v2684_v18 }
  0xac   :  { %2619 = vmatpush.msk.msra.mxu2 %vm1878_vm14, %v2685_v22  ;;  %1917 = vmatpush.msra.mxu3 %v1902_v46  ;;  %v2287_v51 = vmul.f32 %v2265_v44, %v2751_v15  ;;  %v2309_v52 = vmul.f32 %v2265_v44, %v2753_v16  ;;  %vm2417_vm14 = vcmp.eq.s32.totalorder %v2759_v9, 29  ;;  %v796_v44 = vld [vmem:[%s4027_s3 + $0x47] sm:$0x1] }
  0xad   :  { %1841 = vmatpush.msra.mxu0 %v1824_v47  ;;  %1863 = vmatpush.msra.mxu1 %v1846_v48 }
  0xae   :  { %2620 = vmatpush.msk.msra.mxu2 %vm1877_vm1, %v2685_v22  ;;  %1918 = vmatpush.msra.mxu3 %v1901_v49  ;;  %v2264_v49 = vsel %vm2262_vm11, 1.0, %v2684_v18  ;;  %v559_v18 = vld [vmem:[%s4027_s3 + $0x4] sm:$0x1] }
  0xb0   :  { %2611 = vmatmul.msk.f32.vlgmr.msrb.gmra.mxu0 %vm183_vm0, %v2685_v22 }
  0xb1   :  { %1939 = vmatpush.msrb.mxu0 %v1924_v50 }
  0xb2   :  { %2612 = vmatmul.msk.f32.vlgmr.msrb.gmra.mxu1 %vm183_vm0, %v2685_v22  ;;  %2616 = vmatmul.msk.f32.vlgmr.msrb.gmra.mxu3 %vm183_vm0, %v2685_v22 }
  0xb3   :  { %2613 = vmatmul.msk.f32.vlgmr.msrb.gmra.mxu2 %vm183_vm0, %v2685_v22  ;;  %2624 = vmatpush.msk.msrb.mxu1 %vm1955_vm2, %v2685_v22 }
  0xb4   :  { %1994 = vmatpush.msrb.mxu2 %v1979_v53  ;;  %2016 = vmatpush.msrb.mxu3 %v2001_v54  ;;  %v2231_v53 = vmul.f32 %v2187_v30, %v2780_v25  ;;  %v2286_v54 = vmul.f32 %v2264_v49, %v2778_v24 }
  0xb5   :  { %v204_v59 = vpop.f32.mrf.mxu0  ;;  %1940 = vmatpush.msrb.mxu0 %v1923_v55  ;;  %2625 = vmatpush.msk.msrb.mxu1 %vm1954_vm3, %v2685_v22  ;;  %v2308_v55 = vmul.f32 %v2264_v49, %v2780_v25 }
  0xb6   :  { %v252_v61 = vadd.f32 %v251_v56, %v204_v59  ;;  %1995 = vmatpush.msrb.mxu2 %v1978_v57  ;;  %2017 = vmatpush.msrb.mxu3 %v2000_v58  ;;  %v485_v56 = vld [vmem:[%s4027_s3 + $0x23] sm:$0x1]  ;;  %v2683_v59 = vld [vmem:[%s4027_s3 + $0x8] sm:$0xff] }
  0xb7   :  { %v226_v0 = vpop.f32.mrf.mxu1  ;;  %v488_v57 = vld [vmem:[%s4027_s3 + $0x43] sm:$0x1]  ;;  %v2342_v60 = vsel %vm2340_vm12, 1.0, %v2683_v59 }
  0xb8   :  { %253 = vst [vmem:[%s4027_s3] sm:$0x1] %v252_v61  ;;  %2617 = vmatmul.msk.f32.vlgmr.msra.gmra.mxu0 %vm183_vm0, %v2685_v22  ;;  %v255_v3 = vadd.f32 %v254_v62, %v226_v0 }
  0xb9   :  { %2629 = vmatpush.msk.msra.mxu0 %vm2032_vm4, %v2685_v22 }
  0xba   :  { %256 = vst [vmem:[%s4027_s3 + $0x20] sm:$0x1] %v255_v3  ;;  %2618 = vmatmul.msk.f32.vlgmr.msra.gmra.mxu1 %vm183_vm0, %v2685_v22  ;;  %2622 = vmatmul.msk.f32.vlgmr.msra.gmra.mxu3 %vm183_vm0, %v2685_v22  ;;  %v2341_v3 = vsel %vm2339_vm13, 1.0, %v2683_v59 }
  0xbb   :  { %2621 = vmatmul.msk.f32.vlgmr.msra.gmra.mxu2 %vm183_vm0, %v2685_v22  ;;  %2071 = vmatpush.msra.mxu1 %v2056_v2  ;;  %v281_v21 = vpop.f32.mrf.mxu3 }
  0xbc   :  { %2093 = vmatpush.msra.mxu2 %v2078_v4  ;;  %2634 = vmatpush.msk.msra.mxu3 %vm2109_vm6, %v2685_v22  ;;  %v329_v26 = vadd.f32 %v328_v11, %v281_v21  ;;  %v2363_v11 = vmul.f32 %v2341_v3, %v2778_v24 }
  0xbd   :  { %v303_v1 = vpop.f32.mrf.mxu0  ;;  %2630 = vmatpush.msk.msra.mxu0 %vm2031_vm5, %v2685_v22  ;;  %2072 = vmatpush.msra.mxu1 %v2055_v6  ;;  %v2364_v6 = vmul.f32 %v2342_v60, %v2751_v15 }
  0xbe   :  { %v248_v13 = vpop.f32.mrf.mxu2  ;;  %v332_v14 = vadd.f32 %v331_v7, %v303_v1  ;;  %2094 = vmatpush.msra.mxu2 %v2077_v10  ;;  %2635 = vmatpush.msk.msra.mxu3 %vm2108_vm8, %v2685_v22  ;;  %330 = vst [vmem:[%s4027_s3 + $0x1] sm:$0x1] %v329_v26  ;;  %v2386_v10 = vmul.f32 %v2342_v60, %v2753_v16  ;;  %v639_v1 = vld [vmem:[%s4027_s3 + $0x25] sm:$0x1]  ;;  %v2418_v26 = vsel %vm2416_vm15, 1.0, %v2683_v59 }
  0xbf   :  { %v258_v20 = vadd.f32 %v257_v8, %v248_v13  ;;  %v325_v27 = vpop.f32.mrf.mxu1  ;;  %v2419_v8 = vsel %vm2417_vm14, 1.0, %v2683_v59  ;;  %v565_v13 = vld [vmem:[%s4027_s3 + $0x44] sm:$0x1]  ;;  %v950_v59 = vld [vmem:[%s4027_s3 + $0x49] sm:$0x1] }
  0xc0   :  { %333 = vst [vmem:[%s4027_s3 + $0x21] sm:$0x1] %v332_v14  ;;  %2623 = vmatmul.msk.f32.vlgmr.msrb.gmra.mxu0 %vm183_vm0, %v2685_v22  ;;  %v335_v31 = vadd.f32 %v334_v17, %v325_v27  ;;  %v636_v14 = vld [vmem:[%s4027_s3 + $0x5] sm:$0x1]  ;;  %v2441_v19 = vmul.f32 %v2419_v8, %v2751_v15  ;;  %v2463_v30 = vmul.f32 %v2419_v8, %v2753_v16  ;;  %v719_v16 = vld [vmem:[%s4027_s3 + $0x46] sm:$0x1] }
  0xc1   :  { %259 = vst [vmem:[%s4027_s3 + $0x40] sm:$0x1] %v258_v20  ;;  %2148 = vmatpush.msrb.mxu0 %v2133_v12  ;;  %v2385_v12 = vmul.f32 %v2341_v3, %v2780_v25  ;;  %v1024_v3 = vld [vmem:[%s4027_s3 + $0x2a] sm:$0x1] }
  0xc2   :  { %336 = vst [vmem:[%s4027_s3 + $0x41] sm:$0x1] %v335_v31  ;;  %2626 = vmatmul.msk.f32.vlgmr.msrb.gmra.mxu1 %vm183_vm0, %v2685_v22  ;;  %2628 = vmatmul.msk.f32.vlgmr.msrb.gmra.mxu3 %vm183_vm0, %v2685_v22  ;;  %v2440_v31 = vmul.f32 %v2418_v26, %v2778_v24  ;;  %v713_v24 = vld [vmem:[%s4027_s3 + $0x6] sm:$0x1] }
  0xc3   :  { %2627 = vmatmul.msk.f32.vlgmr.msrb.gmra.mxu2 %vm183_vm0, %v2685_v22  ;;  %2170 = vmatpush.msrb.mxu1 %v2155_v29 }
  0xc4   :  { %2639 = vmatpush.msk.msrb.mxu2 %vm2186_vm7, %v2685_v22  ;;  %2225 = vmatpush.msrb.mxu3 %v2210_v32  ;;  %v2462_v32 = vmul.f32 %v2418_v26, %v2780_v25  ;;  %v716_v25 = vld [vmem:[%s4027_s3 + $0x26] sm:$0x1] }
  0xc5   :  { %v402_v39 = vpop.f32.mrf.mxu0  ;;  %2149 = vmatpush.msrb.mxu0 %v2132_v33  ;;  %2171 = vmatpush.msrb.mxu1 %v2154_v34  ;;  %v380_v46 = vpop.f32.mrf.mxu3 }
  0xc6   :  { %v358_v41 = vpop.f32.mrf.mxu2  ;;  %v412_v42 = vadd.f32 %v411_v35, %v402_v39  ;;  %2640 = vmatpush.msk.msrb.mxu2 %vm2185_vm9, %v2685_v22  ;;  %2226 = vmatpush.msrb.mxu3 %v2209_v36  ;;  %v409_v47 = vadd.f32 %v408_v38, %v380_v46  ;;  %v790_v36 = vld [vmem:[%s4027_s3 + $0x7] sm:$0x1] }
  0xc7   :  { %v406_v45 = vadd.f32 %v405_v37, %v358_v41  ;;  %v435_v48 = vpop.f32.mrf.mxu1 }
  0xc8   :  { %413 = vst [vmem:[%s4027_s3 + $0x42] sm:$0x1] %v412_v42  ;;  %2631 = vmatmul.msk.f32.vlgmr.msra.gmra.mxu0 %vm183_vm0, %v2685_v22  ;;  %v483_v50 = vadd.f32 %v482_v43, %v435_v48  ;;  %v867_v42 = vld [vmem:[%s4027_s3 + $0x8] sm:$0x1]  ;;  %v793_v43 = vld [vmem:[%s4027_s3 + $0x27] sm:$0x1] }
  0xc9   :  { %407 = vst [vmem:[%s4027_s3 + $0x2] sm:$0x1] %v406_v45  ;;  %2247 = vmatpush.msra.mxu0 %v2232_v40  ;;  %v870_v48 = vld [vmem:[%s4027_s3 + $0x28] sm:$0x1] }
  0xca   :  { %410 = vst [vmem:[%s4027_s3 + $0x22] sm:$0x1] %v409_v47  ;;  %2632 = vmatmul.msk.f32.vlgmr.msra.gmra.mxu1 %vm183_vm0, %v2685_v22  ;;  %2636 = vmatmul.msk.f32.vlgmr.msra.gmra.mxu3 %vm183_vm0, %v2685_v22 }
  0xcb   :  { %484 = vst [vmem:[%s4027_s3 + $0x3] sm:$0x1] %v483_v50  ;;  %2633 = vmatmul.msk.f32.vlgmr.msra.gmra.mxu2 %vm183_vm0, %v2685_v22  ;;  %2644 = vmatpush.msk.msra.mxu1 %vm2263_vm10, %v2685_v22 }
  0xcc   :  { %2302 = vmatpush.msra.mxu2 %v2287_v51  ;;  %2324 = vmatpush.msra.mxu3 %v2309_v52 }
  0xcd   :  { %v512_v58 = vpop.f32.mrf.mxu0  ;;  %2248 = vmatpush.msra.mxu0 %v2231_v53  ;;  %2645 = vmatpush.msk.msra.mxu1 %vm2262_vm11, %v2685_v22  ;;  %v479_v2 = vpop.f32.mrf.mxu3 }
  0xce   :  { %v457_v61 = vpop.f32.mrf.mxu2  ;;  %v560_v62 = vadd.f32 %v559_v18, %v512_v58  ;;  %2303 = vmatpush.msra.mxu2 %v2286_v54  ;;  %2325 = vmatpush.msra.mxu3 %v2308_v55  ;;  %v489_v4 = vadd.f32 %v488_v57, %v479_v2  ;;  %v947_v18 = vld [vmem:[%s4027_s3 + $0x29] sm:$0x1]  ;;  %v873_v54 = vld [vmem:[%s4027_s3 + $0x48] sm:$0x1]  ;;  %v1021_v2 = vld [vmem:[%s4027_s3 + $0xa] sm:$0x1] }
  0xcf   :  { %v486_v0 = vadd.f32 %v485_v56, %v457_v61  ;;  %v534_v5 = vpop.f32.mrf.mxu1  ;;  %v944_v55 = vld [vmem:[%s4027_s3 + $0x9] sm:$0x1] }
  0xd0   :  { %561 = vst [vmem:[%s4027_s3 + $0x4] sm:$0x1] %v560_v62  ;;  %2637 = vmatmul.msk.f32.vlgmr.msrb.gmra.mxu0 %vm183_vm0, %v2685_v22  ;;  %v563_v7 = vadd.f32 %v562_v63, %v534_v5 }
  0xd1   :  { %487 = vst [vmem:[%s4027_s3 + $0x23] sm:$0x1] %v486_v0  ;;  %2649 = vmatpush.msk.msrb.mxu0 %vm2340_vm12, %v2685_v22  ;;  %v1027_v0 = vld [vmem:[%s4027_s3 + $0x4a] sm:$0x1] }
  0xd2   :  { %490 = vst [vmem:[%s4027_s3 + $0x43] sm:$0x1] %v489_v4  ;;  %2638 = vmatmul.msk.f32.vlgmr.msrb.gmra.mxu1 %vm183_vm0, %v2685_v22  ;;  %2642 = vmatmul.msk.f32.vlgmr.msrb.gmra.mxu3 %vm183_vm0, %v2685_v22 }
  0xd3   :  { %564 = vst [vmem:[%s4027_s3 + $0x24] sm:$0x1] %v563_v7  ;;  %2641 = vmatmul.msk.f32.vlgmr.msrb.gmra.mxu2 %vm183_vm0, %v2685_v22  ;;  %2379 = vmatpush.msrb.mxu1 %v2364_v6  ;;  %v1098_v7 = vld [vmem:[%s4027_s3 + $0xb] sm:$0x1] }
  0xd4   :  { %2401 = vmatpush.msrb.mxu2 %v2386_v10  ;;  %2654 = vmatpush.msk.msrb.mxu3 %vm2417_vm14, %v2685_v22 }
  0xd5   :  { %v611_v17 = vpop.f32.mrf.mxu0  ;;  %2650 = vmatpush.msk.msrb.mxu0 %vm2339_vm13, %v2685_v22  ;;  %2380 = vmatpush.msrb.mxu1 %v2363_v11  ;;  %v589_v29 = vpop.f32.mrf.mxu3 }
  0xd6   :  { %v556_v20 = vpop.f32.mrf.mxu2  ;;  %v640_v21 = vadd.f32 %v639_v1, %v611_v17  ;;  %2402 = vmatpush.msrb.mxu2 %v2385_v12  ;;  %2655 = vmatpush.msk.msrb.mxu3 %vm2416_vm15, %v2685_v22  ;;  %v637_v9 = vadd.f32 %v636_v14, %v589_v29  ;;  %v1101_v14 = vld [vmem:[%s4027_s3 + $0x2b] sm:$0x1] }
  0xd7   :  { %v566_v27 = vadd.f32 %v565_v13, %v556_v20  ;;  %v633_v15 = vpop.f32.mrf.mxu1  ;;  %v1175_v13 = vld [vmem:[%s4027_s3 + $0xc] sm:$0x1]  ;;  %v1104_v17 = vld [vmem:[%s4027_s3 + $0x4b] sm:$0x1] }
  0xd8   :  { %641 = vst [vmem:[%s4027_s3 + $0x25] sm:$0x1] %v640_v21  ;;  %2643 = vmatmul.msk.f32.vlgmr.msra.gmra.mxu0 %vm183_vm0, %v2685_v22  ;;  %v643_v28 = vadd.f32 %v642_v23, %v633_v15  ;;  %v1178_v23 = vld [vmem:[%s4027_s3 + $0x2c] sm:$0x1] }
  0xd9   :  { %567 = vst [vmem:[%s4027_s3 + $0x44] sm:$0x1] %v566_v27  ;;  %2456 = vmatpush.msra.mxu0 %v2441_v19 }
  0xda   :  { %638 = vst [vmem:[%s4027_s3 + $0x5] sm:$0x1] %v637_v9  ;;  %2646 = vmatmul.msk.f32.vlgmr.msra.gmra.mxu1 %vm183_vm0, %v2685_v22  ;;  %2648 = vmatmul.msk.f32.vlgmr.msra.gmra.mxu3 %vm183_vm0, %v2685_v22 }
  0xdb   :  { %644 = vst [vmem:[%s4027_s3 + $0x45] sm:$0x1] %v643_v28  ;;  %2647 = vmatmul.msk.f32.vlgmr.msra.gmra.mxu2 %vm183_vm0, %v2685_v22  ;;  %2478 = vmatpush.msra.mxu1 %v2463_v30  ;;  %v1255_v30 = vld [vmem:[%s4027_s3 + $0x2d] sm:$0x1]  ;;  %v1181_v28 = vld [vmem:[%s4027_s3 + $0x4c] sm:$0x1] }
  0xdc   :  { %2457 = vmatpush.msra.mxu0 %v2440_v31  ;;  %v1252_v31 = vld [vmem:[%s4027_s3 + $0xd] sm:$0x1] }
  0xdd   :  { %v710_v33 = vpop.f32.mrf.mxu0  ;;  %2479 = vmatpush.msra.mxu1 %v2462_v32  ;;  %v688_v38 = vpop.f32.mrf.mxu3 }
  0xde   :  { %v666_v34 = vpop.f32.mrf.mxu2  ;;  %v720_v35 = vadd.f32 %v719_v16, %v710_v33  ;;  %v717_v39 = vadd.f32 %v716_v25, %v688_v38  ;;  %v1258_v25 = vld [vmem:[%s4027_s3 + $0x4d] sm:$0x1]  ;;  %v1335_v38 = vld [vmem:[%s4027_s3 + $0x4e] sm:$0x1] }
  0xdf   :  { %v714_v37 = vadd.f32 %v713_v24, %v666_v34  ;;  %v743_v40 = vpop.f32.mrf.mxu1 }
  0xe0   :  { %721 = vst [vmem:[%s4027_s3 + $0x46] sm:$0x1] %v720_v35  ;;  %2651 = vmatmul.msk.f32.vlgmr.msrb.gmra.mxu0 %vm183_vm0, %v2685_v22  ;;  %v791_v41 = vadd.f32 %v790_v36, %v743_v40  ;;  %v1332_v40 = vld [vmem:[%s4027_s3 + $0x2e] sm:$0x1] }
  0xe1   :  { %715 = vst [vmem:[%s4027_s3 + $0x6] sm:$0x1] %v714_v37 }
  0xe2   :  { %718 = vst [vmem:[%s4027_s3 + $0x26] sm:$0x1] %v717_v39  ;;  %2652 = vmatmul.msk.f32.vlgmr.msrb.gmra.mxu1 %vm183_vm0, %v2685_v22  ;;  %2656 = vmatmul.msk.f32.vlgmr.msrb.gmra.mxu3 %vm183_vm0, %v2685_v22  ;;  %v1329_v39 = vld [vmem:[%s4027_s3 + $0xe] sm:$0x1] }
  0xe3   :  { %792 = vst [vmem:[%s4027_s3 + $0x7] sm:$0x1] %v791_v41  ;;  %2653 = vmatmul.msk.f32.vlgmr.msrb.gmra.mxu2 %vm183_vm0, %v2685_v22 }
  0xe5   :  { %v820_v45 = vpop.f32.mrf.mxu0  ;;  %v787_v50 = vpop.f32.mrf.mxu3 }
  0xe6   :  { %v765_v46 = vpop.f32.mrf.mxu2  ;;  %v868_v47 = vadd.f32 %v867_v42, %v820_v45  ;;  %v797_v51 = vadd.f32 %v796_v44, %v787_v50  ;;  %v1406_v44 = vld [vmem:[%s4027_s3 + $0xf] sm:$0x1]  ;;  %v1483_v50 = vld [vmem:[%s4027_s3 + $0x10] sm:$0x1] }
  0xe7   :  { %v794_v49 = vadd.f32 %v793_v43, %v765_v46  ;;  %v842_v52 = vpop.f32.mrf.mxu1 }
  0xe8   :  { %869 = vst [vmem:[%s4027_s3 + $0x8] sm:$0x1] %v868_v47  ;;  %2657 = vmatmul.msk.f32.vlgmr.msra.gmra.mxu0 %vm183_vm0, %v2685_v22  ;;  %v871_v53 = vadd.f32 %v870_v48, %v842_v52  ;;  %v1412_v52 = vld [vmem:[%s4027_s3 + $0x4f] sm:$0x1] }
  0xe9   :  { %795 = vst [vmem:[%s4027_s3 + $0x27] sm:$0x1] %v794_v49 }
  0xea   :  { %798 = vst [vmem:[%s4027_s3 + $0x47] sm:$0x1] %v797_v51  ;;  %2658 = vmatmul.msk.f32.vlgmr.msra.gmra.mxu1 %vm183_vm0, %v2685_v22  ;;  %v1409_v51 = vld [vmem:[%s4027_s3 + $0x2f] sm:$0x1] }
  0xeb   :  { %872 = vst [vmem:[%s4027_s3 + $0x28] sm:$0x1] %v871_v53 }
  0xed   :  { %v919_v56 = vpop.f32.mrf.mxu0  ;;  %v897_v60 = vpop.f32.mrf.mxu3 }
  0xee   :  { %v864_v57 = vpop.f32.mrf.mxu2  ;;  %v948_v58 = vadd.f32 %v947_v18, %v919_v56  ;;  %v945_v61 = vadd.f32 %v944_v55, %v897_v60  ;;  %v1486_v55 = vld [vmem:[%s4027_s3 + $0x30] sm:$0x1]  ;;  %v1563_v60 = vld [vmem:[%s4027_s3 + $0x31] sm:$0x1] }
  0xef   :  { %v874_v22 = vadd.f32 %v873_v54, %v864_v57  ;;  %v941_v62 = vpop.f32.mrf.mxu1 }
  0xf0   :  { %949 = vst [vmem:[%s4027_s3 + $0x29] sm:$0x1] %v948_v58  ;;  %v951_v63 = vadd.f32 %v950_v59, %v941_v62  ;;  %v1560_v62 = vld [vmem:[%s4027_s3 + $0x11] sm:$0x1] }
  0xf1   :  { %875 = vst [vmem:[%s4027_s3 + $0x48] sm:$0x1] %v874_v22 }
  0xf2   :  { %946 = vst [vmem:[%s4027_s3 + $0x9] sm:$0x1] %v945_v61  ;;  %v1489_v61 = vld [vmem:[%s4027_s3 + $0x50] sm:$0x1] }
  0xf3   :  { %952 = vst [vmem:[%s4027_s3 + $0x49] sm:$0x1] %v951_v63 }
  0xf5   :  { %v1018_v4 = vpop.f32.mrf.mxu0  ;;  %v996_v8 = vpop.f32.mrf.mxu3 }
  0xf6   :  { %v974_v5 = vpop.f32.mrf.mxu2  ;;  %v1028_v6 = vadd.f32 %v1027_v0, %v1018_v4  ;;  %v1025_v11 = vadd.f32 %v1024_v3, %v996_v8  ;;  %v1566_v3 = vld [vmem:[%s4027_s3 + $0x51] sm:$0x1]  ;;  %v1643_v8 = vld [vmem:[%s4027_s3 + $0x52] sm:$0x1] }
  0xf7   :  { %v1022_v10 = vadd.f32 %v1021_v2, %v974_v5  ;;  %v1051_v1 = vpop.f32.mrf.mxu1 }
  0xf8   :  { %1029 = vst [vmem:[%s4027_s3 + $0x4a] sm:$0x1] %v1028_v6  ;;  %v1099_v12 = vadd.f32 %v1098_v7, %v1051_v1  ;;  %v1640_v1 = vld [vmem:[%s4027_s3 + $0x32] sm:$0x1] }
  0xf9   :  { %1023 = vst [vmem:[%s4027_s3 + $0xa] sm:$0x1] %v1022_v10 }
  0xfa   :  { %1026 = vst [vmem:[%s4027_s3 + $0x2a] sm:$0x1] %v1025_v11  ;;  %v1637_v11 = vld [vmem:[%s4027_s3 + $0x12] sm:$0x1] }
  0xfb   :  { %1100 = vst [vmem:[%s4027_s3 + $0xb] sm:$0x1] %v1099_v12 }
  0xfd   :  { %v1128_v19 = vpop.f32.mrf.mxu0  ;;  %v1095_v27 = vpop.f32.mrf.mxu3 }
  0xfe   :  { %v1073_v20 = vpop.f32.mrf.mxu2  ;;  %v1176_v21 = vadd.f32 %v1175_v13, %v1128_v19  ;;  %v1105_v29 = vadd.f32 %v1104_v17, %v1095_v27  ;;  %v1714_v17 = vld [vmem:[%s4027_s3 + $0x13] sm:$0x1]  ;;  %v1791_v27 = vld [vmem:[%s4027_s3 + $0x14] sm:$0x1] }
  0xff   :  { %v1102_v26 = vadd.f32 %v1101_v14, %v1073_v20  ;;  %v1150_v9 = vpop.f32.mrf.mxu1 }
 0x100   :  { %1177 = vst [vmem:[%s4027_s3 + $0xc] sm:$0x1] %v1176_v21  ;;  %v1179_v15 = vadd.f32 %v1178_v23, %v1150_v9  ;;  %v1720_v9 = vld [vmem:[%s4027_s3 + $0x53] sm:$0x1] }
 0x101   :  { %1103 = vst [vmem:[%s4027_s3 + $0x2b] sm:$0x1] %v1102_v26 }
 0x102   :  { %1106 = vst [vmem:[%s4027_s3 + $0x4b] sm:$0x1] %v1105_v29  ;;  %v1717_v29 = vld [vmem:[%s4027_s3 + $0x33] sm:$0x1] }
 0x103   :  { %1180 = vst [vmem:[%s4027_s3 + $0x2c] sm:$0x1] %v1179_v15 }
 0x105   :  { %v1227_v32 = vpop.f32.mrf.mxu0  ;;  %v1205_v34 = vpop.f32.mrf.mxu3 }
 0x106   :  { %v1172_v16 = vpop.f32.mrf.mxu2  ;;  %v1256_v24 = vadd.f32 %v1255_v30, %v1227_v32  ;;  %v1253_v35 = vadd.f32 %v1252_v31, %v1205_v34  ;;  %v1794_v31 = vld [vmem:[%s4027_s3 + $0x34] sm:$0x1]  ;;  %v1871_v34 = vld [vmem:[%s4027_s3 + $0x35] sm:$0x1] }
 0x107   :  { %v1182_v33 = vadd.f32 %v1181_v28, %v1172_v16  ;;  %v1249_v36 = vpop.f32.mrf.mxu1 }
 0x108   :  { %1257 = vst [vmem:[%s4027_s3 + $0x2d] sm:$0x1] %v1256_v24  ;;  %v1259_v37 = vadd.f32 %v1258_v25, %v1249_v36  ;;  %v1868_v36 = vld [vmem:[%s4027_s3 + $0x15] sm:$0x1] }
 0x109   :  { %1183 = vst [vmem:[%s4027_s3 + $0x4c] sm:$0x1] %v1182_v33 }
 0x10a   :  { %1254 = vst [vmem:[%s4027_s3 + $0xd] sm:$0x1] %v1253_v35  ;;  %v1797_v35 = vld [vmem:[%s4027_s3 + $0x54] sm:$0x1] }
 0x10b   :  { %1260 = vst [vmem:[%s4027_s3 + $0x4d] sm:$0x1] %v1259_v37 }
 0x10d   :  { %v1326_v41 = vpop.f32.mrf.mxu0  ;;  %v1304_v46 = vpop.f32.mrf.mxu3 }
 0x10e   :  { %v1282_v42 = vpop.f32.mrf.mxu2  ;;  %v1336_v43 = vadd.f32 %v1335_v38, %v1326_v41  ;;  %v1333_v47 = vadd.f32 %v1332_v40, %v1304_v46  ;;  %v1874_v40 = vld [vmem:[%s4027_s3 + $0x55] sm:$0x1]  ;;  %v1951_v46 = vld [vmem:[%s4027_s3 + $0x56] sm:$0x1] }
 0x10f   :  { %v1330_v45 = vadd.f32 %v1329_v39, %v1282_v42  ;;  %v1359_v48 = vpop.f32.mrf.mxu1 }
 0x110   :  { %1337 = vst [vmem:[%s4027_s3 + $0x4e] sm:$0x1] %v1336_v43  ;;  %v1407_v49 = vadd.f32 %v1406_v44, %v1359_v48  ;;  %v1948_v48 = vld [vmem:[%s4027_s3 + $0x36] sm:$0x1] }
 0x111   :  { %1331 = vst [vmem:[%s4027_s3 + $0xe] sm:$0x1] %v1330_v45 }
 0x112   :  { %1334 = vst [vmem:[%s4027_s3 + $0x2e] sm:$0x1] %v1333_v47  ;;  %v1945_v47 = vld [vmem:[%s4027_s3 + $0x16] sm:$0x1] }
 0x113   :  { %1408 = vst [vmem:[%s4027_s3 + $0xf] sm:$0x1] %v1407_v49 }
 0x115   :  { %v1436_v53 = vpop.f32.mrf.mxu0  ;;  %v1403_v57 = vpop.f32.mrf.mxu3 }
 0x116   :  { %v1381_v18 = vpop.f32.mrf.mxu2  ;;  %v1484_v54 = vadd.f32 %v1483_v50, %v1436_v53  ;;  %v1413_v58 = vadd.f32 %v1412_v52, %v1403_v57  ;;  %v2022_v52 = vld [vmem:[%s4027_s3 + $0x17] sm:$0x1]  ;;  %v2099_v57 = vld [vmem:[%s4027_s3 + $0x18] sm:$0x1] }
 0x117   :  { %v1410_v56 = vadd.f32 %v1409_v51, %v1381_v18  ;;  %v1458_v59 = vpop.f32.mrf.mxu1 }
 0x118   :  { %1485 = vst [vmem:[%s4027_s3 + $0x10] sm:$0x1] %v1484_v54  ;;  %v1487_v22 = vadd.f32 %v1486_v55, %v1458_v59  ;;  %v2028_v59 = vld [vmem:[%s4027_s3 + $0x57] sm:$0x1] }
 0x119   :  { %1411 = vst [vmem:[%s4027_s3 + $0x2f] sm:$0x1] %v1410_v56 }
 0x11a   :  { %1414 = vst [vmem:[%s4027_s3 + $0x4f] sm:$0x1] %v1413_v58  ;;  %v2025_v58 = vld [vmem:[%s4027_s3 + $0x37] sm:$0x1] }
 0x11b   :  { %1488 = vst [vmem:[%s4027_s3 + $0x30] sm:$0x1] %v1487_v22 }
 0x11d   :  { %v1535_v63 = vpop.f32.mrf.mxu0  ;;  %v1513_v5 = vpop.f32.mrf.mxu3 }
 0x11e   :  { %v1480_v0 = vpop.f32.mrf.mxu2  ;;  %v1564_v2 = vadd.f32 %v1563_v60, %v1535_v63  ;;  %v1561_v6 = vadd.f32 %v1560_v62, %v1513_v5  ;;  %v2102_v62 = vld [vmem:[%s4027_s3 + $0x38] sm:$0x1]  ;;  %v2179_v5 = vld [vmem:[%s4027_s3 + $0x39] sm:$0x1] }
 0x11f   :  { %v1490_v4 = vadd.f32 %v1489_v61, %v1480_v0  ;;  %v1557_v7 = vpop.f32.mrf.mxu1 }
 0x120   :  { %1565 = vst [vmem:[%s4027_s3 + $0x31] sm:$0x1] %v1564_v2  ;;  %v1567_v10 = vadd.f32 %v1566_v3, %v1557_v7  ;;  %v2176_v7 = vld [vmem:[%s4027_s3 + $0x19] sm:$0x1] }
 0x121   :  { %1491 = vst [vmem:[%s4027_s3 + $0x50] sm:$0x1] %v1490_v4 }
 0x122   :  { %1562 = vst [vmem:[%s4027_s3 + $0x11] sm:$0x1] %v1561_v6  ;;  %v2105_v6 = vld [vmem:[%s4027_s3 + $0x58] sm:$0x1] }
 0x123   :  { %1568 = vst [vmem:[%s4027_s3 + $0x51] sm:$0x1] %v1567_v10 }
 0x125   :  { %v1634_v12 = vpop.f32.mrf.mxu0  ;;  %v1612_v20 = vpop.f32.mrf.mxu3 }
 0x126   :  { %v1590_v13 = vpop.f32.mrf.mxu2  ;;  %v1644_v14 = vadd.f32 %v1643_v8, %v1634_v12  ;;  %v1641_v21 = vadd.f32 %v1640_v1, %v1612_v20  ;;  %v2182_v1 = vld [vmem:[%s4027_s3 + $0x59] sm:$0x1]  ;;  %v2259_v20 = vld [vmem:[%s4027_s3 + $0x5a] sm:$0x1] }
 0x127   :  { %v1638_v19 = vadd.f32 %v1637_v11, %v1590_v13  ;;  %v1667_v23 = vpop.f32.mrf.mxu1 }
 0x128   :  { %1645 = vst [vmem:[%s4027_s3 + $0x52] sm:$0x1] %v1644_v14  ;;  %v1715_v26 = vadd.f32 %v1714_v17, %v1667_v23  ;;  %v2256_v23 = vld [vmem:[%s4027_s3 + $0x3a] sm:$0x1] }
 0x129   :  { %1639 = vst [vmem:[%s4027_s3 + $0x12] sm:$0x1] %v1638_v19 }
 0x12a   :  { %1642 = vst [vmem:[%s4027_s3 + $0x32] sm:$0x1] %v1641_v21  ;;  %v2253_v21 = vld [vmem:[%s4027_s3 + $0x1a] sm:$0x1] }
 0x12b   :  { %1716 = vst [vmem:[%s4027_s3 + $0x13] sm:$0x1] %v1715_v26 }
 0x12d   :  { %v1744_v15 = vpop.f32.mrf.mxu0  ;;  %v1711_v16 = vpop.f32.mrf.mxu3 }
 0x12e   :  { %v1689_v30 = vpop.f32.mrf.mxu2  ;;  %v1792_v28 = vadd.f32 %v1791_v27, %v1744_v15  ;;  %v1721_v24 = vadd.f32 %v1720_v9, %v1711_v16  ;;  %v2330_v9 = vld [vmem:[%s4027_s3 + $0x1b] sm:$0x1]  ;;  %v2407_v16 = vld [vmem:[%s4027_s3 + $0x1c] sm:$0x1] }
 0x12f   :  { %v1718_v32 = vadd.f32 %v1717_v29, %v1689_v30  ;;  %v1766_v25 = vpop.f32.mrf.mxu1 }
 0x130   :  { %1793 = vst [vmem:[%s4027_s3 + $0x14] sm:$0x1] %v1792_v28  ;;  %v1795_v33 = vadd.f32 %v1794_v31, %v1766_v25  ;;  %v2336_v25 = vld [vmem:[%s4027_s3 + $0x5b] sm:$0x1] }
 0x131   :  { %1719 = vst [vmem:[%s4027_s3 + $0x33] sm:$0x1] %v1718_v32 }
 0x132   :  { %1722 = vst [vmem:[%s4027_s3 + $0x53] sm:$0x1] %v1721_v24  ;;  %v2333_v24 = vld [vmem:[%s4027_s3 + $0x3b] sm:$0x1] }
 0x133   :  { %1796 = vst [vmem:[%s4027_s3 + $0x34] sm:$0x1] %v1795_v33 }
 0x135   :  { %v1843_v37 = vpop.f32.mrf.mxu0  ;;  %v1821_v42 = vpop.f32.mrf.mxu3 }
 0x136   :  { %v1788_v38 = vpop.f32.mrf.mxu2  ;;  %v1872_v39 = vadd.f32 %v1871_v34, %v1843_v37  ;;  %v1869_v43 = vadd.f32 %v1868_v36, %v1821_v42  ;;  %v2410_v36 = vld [vmem:[%s4027_s3 + $0x3c] sm:$0x1]  ;;  %v2487_v42 = vld [vmem:[%s4027_s3 + $0x3d] sm:$0x1] }
 0x137   :  { %v1798_v41 = vadd.f32 %v1797_v35, %v1788_v38  ;;  %v1865_v44 = vpop.f32.mrf.mxu1 }
 0x138   :  { %1873 = vst [vmem:[%s4027_s3 + $0x35] sm:$0x1] %v1872_v39  ;;  %v1875_v45 = vadd.f32 %v1874_v40, %v1865_v44  ;;  %v2484_v44 = vld [vmem:[%s4027_s3 + $0x1d] sm:$0x1] }
 0x139   :  { %1799 = vst [vmem:[%s4027_s3 + $0x54] sm:$0x1] %v1798_v41 }
 0x13a   :  { %1870 = vst [vmem:[%s4027_s3 + $0x15] sm:$0x1] %v1869_v43  ;;  %v2413_v43 = vld [vmem:[%s4027_s3 + $0x5c] sm:$0x1] }
 0x13b   :  { %1876 = vst [vmem:[%s4027_s3 + $0x55] sm:$0x1] %v1875_v45 }
 0x13d   :  { %v1942_v49 = vpop.f32.mrf.mxu0  ;;  %v1920_v18 = vpop.f32.mrf.mxu3 }
 0x13e   :  { %v1898_v50 = vpop.f32.mrf.mxu2  ;;  %v1952_v51 = vadd.f32 %v1951_v46, %v1942_v49  ;;  %v1949_v54 = vadd.f32 %v1948_v48, %v1920_v18  ;;  %v2490_v48 = vld [vmem:[%s4027_s3 + $0x5d] sm:$0x1] }
 0x13f   :  { %v1946_v53 = vadd.f32 %v1945_v47, %v1898_v50  ;;  %v1975_v55 = vpop.f32.mrf.mxu1 }
 0x140   :  { %1953 = vst [vmem:[%s4027_s3 + $0x56] sm:$0x1] %v1952_v51  ;;  %v2023_v56 = vadd.f32 %v2022_v52, %v1975_v55 }
 0x141   :  { %1947 = vst [vmem:[%s4027_s3 + $0x16] sm:$0x1] %v1946_v53 }
 0x142   :  { %1950 = vst [vmem:[%s4027_s3 + $0x36] sm:$0x1] %v1949_v54 }
 0x143   :  { %2024 = vst [vmem:[%s4027_s3 + $0x17] sm:$0x1] %v2023_v56 }
 0x145   :  { %v2052_v22 = vpop.f32.mrf.mxu0  ;;  %v2019_v0 = vpop.f32.mrf.mxu3 }
 0x146   :  { %v1997_v60 = vpop.f32.mrf.mxu2  ;;  %v2100_v61 = vadd.f32 %v2099_v57, %v2052_v22  ;;  %v2029_v2 = vadd.f32 %v2028_v59, %v2019_v0 }
 0x147   :  { %v2026_v63 = vadd.f32 %v2025_v58, %v1997_v60  ;;  %v2074_v3 = vpop.f32.mrf.mxu1 }
 0x148   :  { %2101 = vst [vmem:[%s4027_s3 + $0x18] sm:$0x1] %v2100_v61  ;;  %v2103_v4 = vadd.f32 %v2102_v62, %v2074_v3 }
 0x149   :  { %2027 = vst [vmem:[%s4027_s3 + $0x37] sm:$0x1] %v2026_v63 }
 0x14a   :  { %2030 = vst [vmem:[%s4027_s3 + $0x57] sm:$0x1] %v2029_v2 }
 0x14b   :  { %2104 = vst [vmem:[%s4027_s3 + $0x38] sm:$0x1] %v2103_v4 }
 0x14d   :  { %v2151_v10 = vpop.f32.mrf.mxu0  ;;  %v2129_v13 = vpop.f32.mrf.mxu3 }
 0x14e   :  { %v2096_v8 = vpop.f32.mrf.mxu2  ;;  %v2180_v11 = vadd.f32 %v2179_v5, %v2151_v10  ;;  %v2177_v14 = vadd.f32 %v2176_v7, %v2129_v13 }
 0x14f   :  { %v2106_v12 = vadd.f32 %v2105_v6, %v2096_v8  ;;  %v2173_v17 = vpop.f32.mrf.mxu1 }
 0x150   :  { %2181 = vst [vmem:[%s4027_s3 + $0x39] sm:$0x1] %v2180_v11  ;;  %v2183_v19 = vadd.f32 %v2182_v1, %v2173_v17 }
 0x151   :  { %2107 = vst [vmem:[%s4027_s3 + $0x58] sm:$0x1] %v2106_v12 }
 0x152   :  { %2178 = vst [vmem:[%s4027_s3 + $0x19] sm:$0x1] %v2177_v14 }
 0x153   :  { %2184 = vst [vmem:[%s4027_s3 + $0x59] sm:$0x1] %v2183_v19 }
 0x155   :  { %v2250_v26 = vpop.f32.mrf.mxu0  ;;  %v2228_v30 = vpop.f32.mrf.mxu3 }
 0x156   :  { %v2206_v27 = vpop.f32.mrf.mxu2  ;;  %v2260_v29 = vadd.f32 %v2259_v20, %v2250_v26  ;;  %v2257_v28 = vadd.f32 %v2256_v23, %v2228_v30 }
 0x157   :  { %v2254_v15 = vadd.f32 %v2253_v21, %v2206_v27  ;;  %v2283_v31 = vpop.f32.mrf.mxu1 }
 0x158   :  { %2261 = vst [vmem:[%s4027_s3 + $0x5a] sm:$0x1] %v2260_v29  ;;  %v2331_v32 = vadd.f32 %v2330_v9, %v2283_v31 }
 0x159   :  { %2255 = vst [vmem:[%s4027_s3 + $0x1a] sm:$0x1] %v2254_v15 }
 0x15a   :  { %2258 = vst [vmem:[%s4027_s3 + $0x3a] sm:$0x1] %v2257_v28 }
 0x15b   :  { %2332 = vst [vmem:[%s4027_s3 + $0x1b] sm:$0x1] %v2331_v32 }
 0x15d   :  { %v2360_v33 = vpop.f32.mrf.mxu0  ;;  %v2327_v38 = vpop.f32.mrf.mxu3 }
 0x15e   :  { %v2305_v34 = vpop.f32.mrf.mxu2  ;;  %v2408_v35 = vadd.f32 %v2407_v16, %v2360_v33  ;;  %v2337_v39 = vadd.f32 %v2336_v25, %v2327_v38 }
 0x15f   :  { %v2334_v37 = vadd.f32 %v2333_v24, %v2305_v34  ;;  %v2382_v40 = vpop.f32.mrf.mxu1 }
 0x160   :  { %2409 = vst [vmem:[%s4027_s3 + $0x1c] sm:$0x1] %v2408_v35  ;;  %v2411_v41 = vadd.f32 %v2410_v36, %v2382_v40 }
 0x161   :  { %2335 = vst [vmem:[%s4027_s3 + $0x3b] sm:$0x1] %v2334_v37 }
 0x162   :  { %2338 = vst [vmem:[%s4027_s3 + $0x5b] sm:$0x1] %v2337_v39 }
 0x163   :  { %2412 = vst [vmem:[%s4027_s3 + $0x3c] sm:$0x1] %v2411_v41 }
 0x165   :  { %v2459_v45 = vpop.f32.mrf.mxu0  ;;  %v2437_v50 = vpop.f32.mrf.mxu3 }
 0x166   :  { %v2404_v46 = vpop.f32.mrf.mxu2  ;;  %v2488_v47 = vadd.f32 %v2487_v42, %v2459_v45  ;;  %v2485_v51 = vadd.f32 %v2484_v44, %v2437_v50 }
 0x167   :  { %v2414_v49 = vadd.f32 %v2413_v43, %v2404_v46  ;;  %v2481_v52 = vpop.f32.mrf.mxu1 }
 0x168   :  { %2489 = vst [vmem:[%s4027_s3 + $0x3d] sm:$0x1] %v2488_v47  ;;  %v2491_v53 = vadd.f32 %v2490_v48, %v2481_v52 }
 0x169   :  { %2415 = vst [vmem:[%s4027_s3 + $0x5c] sm:$0x1] %v2414_v49 }
 0x16a   :  { %2486 = vst [vmem:[%s4027_s3 + $0x1d] sm:$0x1] %v2485_v51 }
 0x16b   :  { %2492 = vst [vmem:[%s4027_s3 + $0x5d] sm:$0x1] %v2491_v53 }

</bundles_post_ra>
